<compile_context>
chip_gen: v7x
topology: tpu7x:2x2x1
jax: 0.10.0
libtpu: 0.0.40
codegen_flags: <defaults>
</compile_context>

<pallas_src>
import functools

import jax
import jax.numpy as jnp
from jax.experimental import pallas as pl
from jax.experimental.pallas import tpu as pltpu


# ---------------------------------------------------------------------------
# Pallas kernel factory (T, Bp, H are static, closed over).
# ---------------------------------------------------------------------------
def _make_encoder_kernel(T, Bp, H):
    def kernel(x_ref,        # [T*Bp, Ep] bf16  embedded seq, time-major, padded
               wih_ref,      # [Ep, 4H]   bf16  W_ih^T, gate order (i, f, o, g)
               whh_hbm_ref,  # [H, 4H]    bf16  W_hh^T in HBM (memory_space=ANY)
               b_ref,        # [1, 4H]    f32   b_ih + b_hh, gate order (i, f, o, g)
               wproj_ref,    # [H, P]     bf16  [fc_mu^T | fc_logvar^T | 0-pad]
               bproj_ref,    # [1, P]     f32   [b_mu    | b_logvar    | 0-pad]
               out_ref,      # [Bp, P]    f32   lane-dense fused output slab
               gx_ref,       # [T*Bp, 4H] f32   VMEM scratch for hoisted gates_x
               whh_vmem,     # [H, 4H]    bf16  VMEM scratch for W_hh
               whh_sem):     # DMA semaphore
        # Kick off the W_hh copy; it overlaps with the big hoisted GEMM below.
        whh_copy = pltpu.make_async_copy(whh_hbm_ref, whh_vmem, whh_sem)
        whh_copy.start()

        # Hoisted input projection: one GEMM + one bias broadcast for all T
        # timesteps, parked in VMEM scratch (keeps the unrolled loop from
        # holding 64 live vregs of gates_x).
        gx_ref[...] = (jnp.dot(x_ref[...], wih_ref[...],
                               preferred_element_type=jnp.float32)
                       + b_ref[...])                                # [T*Bp, 4H]

        whh_copy.wait()
        whh = whh_vmem[...]                                          # [H, 4H] bf16

        h = jnp.zeros((Bp, H), jnp.float32)
        c = jnp.zeros((Bp, H), jnp.float32)

        # Fully unrolled serial recurrence (T small & static). Per step: one
        # bf16 h @ W_hh MXU push, one tanh EUP push over the [Bp,3H] gate slab
        # (sigmoid(x) = 0.5*tanh(0.5*x)+0.5), one tanh over [Bp,H], pointwise.
        for t in range(T):
            gates = gx_ref[t * Bp:(t + 1) * Bp, :] + jnp.dot(
                h.astype(jnp.bfloat16), whh,
                preferred_element_type=jnp.float32)                  # [Bp, 4H] f32
            sig = 0.5 * jnp.tanh(0.5 * gates[:, :3 * H]) + 0.5       # i | f | o
            i_g = sig[:, 0 * H:1 * H]
            f_g = sig[:, 1 * H:2 * H]
            o_g = sig[:, 2 * H:3 * H]
            g_g = jnp.tanh(gates[:, 3 * H:4 * H])
            c = f_g * c + i_g * g_g
            h = o_g * jnp.tanh(c)

        # Fused mu/logvar projection -> one MXU push, one full-width store.
        out_ref[...] = (jnp.dot(h.astype(jnp.bfloat16), wproj_ref[...],
                                preferred_element_type=jnp.float32)
                        + bproj_ref[...])

    return kernel


# ---------------------------------------------------------------------------
# One-time weight packing (runs once, outside the per-call path).
# ---------------------------------------------------------------------------
def prepare_packed_params(params):
    H = params["w_hh_t"].shape[0]
    E = params["w_ih_t"].shape[0]
    L = params["w_mu_t"].shape[1]
    Ep = ((E + 127) // 128) * 128
    P = ((2 * L + 127) // 128) * 128

    def reorder(w):  # gate columns (i, f, g, o) -> (i, f, o, g)
        return jnp.concatenate(
            [w[:, 0:2 * H], w[:, 3 * H:4 * H], w[:, 2 * H:3 * H]], axis=1)

    wih = jnp.pad(reorder(params["w_ih_t"]), ((0, Ep - E), (0, 0)))       # [Ep, 4H]
    whh = reorder(params["w_hh_t"])                                       # [H, 4H]
    b = reorder(params["b_gates"])                                        # [1, 4H]
    wproj = jnp.pad(jnp.concatenate([params["w_mu_t"], params["w_lv_t"]], axis=1),
                    ((0, 0), (0, P - 2 * L)))                             # [H, P]
    bproj = jnp.pad(jnp.concatenate([params["b_mu"], params["b_lv"]], axis=1),
                    ((0, 0), (0, P - 2 * L)))                             # [1, P]

    return {
        "emb": params["embedding"].astype(jnp.bfloat16),
        "wih": wih.astype(jnp.bfloat16),
        "whh": whh.astype(jnp.bfloat16),
        "b": b.astype(jnp.float32),
        "wproj": wproj.astype(jnp.bfloat16),
        "bproj": bproj.astype(jnp.float32),
    }


# ---------------------------------------------------------------------------
# Forward wrapper (per-call path: gather glue + one pallas_call).
# ---------------------------------------------------------------------------
@functools.partial(jax.jit, static_argnames=("latent_dim",))
def encoder_forward(seq, packed, *, latent_dim):
    """seq: int32 [B, T] token ids. Returns (mu, logvar), each [B, latent_dim]."""
    emb = packed["emb"]
    wih, whh, b = packed["wih"], packed["whh"], packed["b"]
    wproj, bproj = packed["wproj"], packed["bproj"]

    B, T = seq.shape
    E = emb.shape[1]
    Ep = wih.shape[0]
    H = whh.shape[0]
    P = wproj.shape[1]
    L = latent_dim
    Bp = max(8, ((B + 7) // 8) * 8)          # full sublane tile

    # Glue: embedding gather (bf16), time-major, pad batch->Bp and E->Ep, flatten.
    # TODO(synk): could fuse the gather into the kernel via scalar-prefetch row gather.
    x = jnp.take(emb, seq, axis=0)                                   # [B, T, E] bf16
    x = jnp.transpose(x, (1, 0, 2))                                  # [T, B, E]
    x = jnp.pad(x, ((0, 0), (0, Bp - B), (0, Ep - E)))               # [T, Bp, Ep]
    x_flat = x.reshape(T * Bp, Ep)                                   # [T*Bp, Ep]

    vmem = pl.BlockSpec(memory_space=pltpu.MemorySpace.VMEM)
    out = pl.pallas_call(
        _make_encoder_kernel(T, Bp, H),
        out_shape=jax.ShapeDtypeStruct((Bp, P), jnp.float32),
        in_specs=[vmem,                                   # x_flat
                  vmem,                                   # W_ih
                  pl.BlockSpec(memory_space=pl.ANY),      # W_hh: manual DMA overlap
                  vmem,                                   # bias
                  vmem,                                   # W_proj
                  vmem],                                  # b_proj
        out_specs=vmem,
        scratch_shapes=[
            pltpu.VMEM((T * Bp, 4 * H), jnp.float32),     # gates_x scratch
            pltpu.VMEM((H, 4 * H), jnp.bfloat16),         # W_hh VMEM landing buffer
            pltpu.SemaphoreType.DMA(()),                  # W_hh copy semaphore
        ],
    )(x_flat, wih, whh, b, wproj, bproj)

    mu = out[:B, 0:L]
    logvar = out[:B, L:2 * L]
    return mu, logvar


# ---------------------------------------------------------------------------
# Pure-JAX f32 reference (mirrors PyTorch nn.LSTM / nn.Linear semantics,
# standard (i, f, g, o) gate order).
# ---------------------------------------------------------------------------
def encoder_reference(seq, params):
    emb = jnp.take(params["embedding"], seq, axis=0).astype(jnp.float32)  # [B, T, E]
    B, T, _ = emb.shape
    H = params["w_hh_t"].shape[0]
    h = jnp.zeros((B, H), jnp.float32)
    c = jnp.zeros((B, H), jnp.float32)
    for t in range(T):
        gates = emb[:, t, :] @ params["w_ih_t"] + h @ params["w_hh_t"] + params["b_gates"]
        i_g = jax.nn.sigmoid(gates[:, 0 * H:1 * H])
        f_g = jax.nn.sigmoid(gates[:, 1 * H:2 * H])
        g_g = jnp.tanh(gates[:, 2 * H:3 * H])
        o_g = jax.nn.sigmoid(gates[:, 3 * H:4 * H])
        c = f_g * c + i_g * g_g
        h = o_g * jnp.tanh(c)
    mu = h @ params["w_mu_t"] + params["b_mu"]
    logvar = h @ params["w_lv_t"] + params["b_lv"]
    return mu, logvar


def init_params(key, vocab_size, embedding_dim, hidden_dim, latent_dim):
    ks = jax.random.split(key, 9)
    s = 0.1
    return {
        "embedding": s * jax.random.normal(ks[0], (vocab_size, embedding_dim), jnp.float32),
        # LSTM weights stored pre-transposed: y = x @ W^T  (gate order i, f, g, o)
        "w_ih_t": s * jax.random.normal(ks[1], (embedding_dim, 4 * hidden_dim), jnp.float32),
        "w_hh_t": s * jax.random.normal(ks[2], (hidden_dim, 4 * hidden_dim), jnp.float32),
        "b_gates": (s * jax.random.normal(ks[3], (1, 4 * hidden_dim), jnp.float32)
                    + s * jax.random.normal(ks[4], (1, 4 * hidden_dim), jnp.float32)),  # b_ih + b_hh
        "w_mu_t": s * jax.random.normal(ks[5], (hidden_dim, latent_dim), jnp.float32),
        "b_mu": s * jax.random.normal(ks[6], (1, latent_dim), jnp.float32),
        "w_lv_t": s * jax.random.normal(ks[7], (hidden_dim, latent_dim), jnp.float32),
        "b_lv": s * jax.random.normal(ks[8], (1, latent_dim), jnp.float32),
    }


if __name__ == "__main__":
    # Module-consistent dims: H=256 keeps every gate slice 128-lane aligned.
    vocab_size, embedding_dim, hidden_dim, latent_dim = 10000, 100, 256, 50
    batch, seq_len = 2, 8

    key = jax.random.PRNGKey(0)
    k_param, k_seq = jax.random.split(key)
    params = init_params(k_param, vocab_size, embedding_dim, hidden_dim, latent_dim)
    seq = jax.random.randint(k_seq, (batch, seq_len), 0, vocab_size, dtype=jnp.int32)

    packed = prepare_packed_params(params)          # one-time weight packing
    jax.block_until_ready(packed)

    mu, logvar = encoder_forward(seq, packed, latent_dim=latent_dim)
    jax.block_until_ready((mu, logvar))

    mu_ref, logvar_ref = encoder_reference(seq, params)
    assert mu.shape == (batch, latent_dim) and logvar.shape == (batch, latent_dim)
    # bf16 weights/activations on the MXU path (f32 accumulation) -> slightly
    # looser tolerance than the pure-f32 reference.
    assert jnp.allclose(mu, mu_ref, atol=5e-3, rtol=5e-3)
    assert jnp.allclose(logvar, logvar_ref, atol=5e-3, rtol=5e-3)

    print("KERNEL_OK")
</pallas_src>

<mosaic_0001>
module attributes {stable_mosaic.version = 11 : i64} {
  func.func @kernel(%arg0: memref<64x128xbf16, #tpu.memory_space<vmem>>, %arg1: memref<128x1024xbf16, #tpu.memory_space<vmem>>, %arg2: memref<256x1024xbf16, #tpu.memory_space<any>>, %arg3: memref<1x1024xf32, #tpu.memory_space<vmem>>, %arg4: memref<256x128xbf16, #tpu.memory_space<vmem>>, %arg5: memref<1x128xf32, #tpu.memory_space<vmem>>, %arg6: memref<8x128xf32, #tpu.memory_space<vmem>>, %arg7: memref<64x1024xf32, #tpu.memory_space<vmem>>, %arg8: memref<256x1024xbf16, #tpu.memory_space<vmem>>, %arg9: memref<!tpu.dma_semaphore, #tpu.memory_space<semaphore_mem>>) attributes {dimension_semantics = [], scalar_prefetch = 0 : i64, scratch_operands = 3 : i64, tpu.core_type = #tpu.core_type<tc>} {
    tpu.enqueue_dma source(%arg2 : memref<256x1024xbf16, #tpu.memory_space<any>>) target(%arg8 : memref<256x1024xbf16, #tpu.memory_space<vmem>>) target_semaphore(%arg9 : memref<!tpu.dma_semaphore, #tpu.memory_space<semaphore_mem>>)
    %c0 = arith.constant 0 : index
    %c0_0 = arith.constant 0 : index
    %0 = vector.load %arg0[%c0, %c0_0] : memref<64x128xbf16, #tpu.memory_space<vmem>>, vector<64x128xbf16>
    %c0_1 = arith.constant 0 : index
    %c0_2 = arith.constant 0 : index
    %1 = vector.load %arg1[%c0_1, %c0_2] : memref<128x1024xbf16, #tpu.memory_space<vmem>>, vector<128x1024xbf16>
    %cst = arith.constant dense<0.000000e+00> : vector<64x1024xf32>
    %2 = tpu.matmul %0, %1, %cst {dimension_numbers = #tpu.dot_dimension_numbers<[1], [0], [0], [1], [0, 0, 1, 1], [], []>} : vector<64x128xbf16>, vector<128x1024xbf16>, vector<64x1024xf32> -> vector<64x1024xf32>
    %c0_3 = arith.constant 0 : index
    %c0_4 = arith.constant 0 : index
    %3 = vector.load %arg3[%c0_3, %c0_4] : memref<1x1024xf32, #tpu.memory_space<vmem>>, vector<1x1024xf32>
    %4 = vector.broadcast %3 : vector<1x1024xf32> to vector<64x1024xf32>
    %5 = arith.addf %2, %4 : vector<64x1024xf32>
    %c0_5 = arith.constant 0 : index
    %c0_6 = arith.constant 0 : index
    %6 = vector.load %arg7[%c0_5, %c0_6] : memref<64x1024xf32, #tpu.memory_space<vmem>>, vector<64x1024xf32>
    tpu.vector_store %arg7[%c0_5, %c0_6], %5 {strides = array<i32>} : memref<64x1024xf32, #tpu.memory_space<vmem>>, vector<64x1024xf32>,
    tpu.wait_dma2 semaphore(%arg9 : memref<!tpu.dma_semaphore, #tpu.memory_space<semaphore_mem>>) src(%arg2 : memref<256x1024xbf16, #tpu.memory_space<any>>) dst(%arg8 : memref<256x1024xbf16, #tpu.memory_space<vmem>>)
    %c0_7 = arith.constant 0 : index
    %c0_8 = arith.constant 0 : index
    %7 = vector.load %arg8[%c0_7, %c0_8] : memref<256x1024xbf16, #tpu.memory_space<vmem>>, vector<256x1024xbf16>
    %cst_9 = arith.constant 0.000000e+00 : f32
    %8 = vector.broadcast %cst_9 : f32 to vector<8x256xf32>
    %cst_10 = arith.constant 0.000000e+00 : f32
    %9 = vector.broadcast %cst_10 : f32 to vector<8x256xf32>
    %c0_11 = arith.constant 0 : index
    %c0_12 = arith.constant 0 : index
    %10 = vector.load %arg7[%c0_11, %c0_12] : memref<64x1024xf32, #tpu.memory_space<vmem>>, vector<8x1024xf32>
    %11 = arith.truncf %8 : vector<8x256xf32> to vector<8x256xbf16>
    %cst_13 = arith.constant dense<0.000000e+00> : vector<8x1024xf32>
    %12 = tpu.matmul %11, %7, %cst_13 {dimension_numbers = #tpu.dot_dimension_numbers<[1], [0], [0], [1], [0, 0, 1, 1], [], []>} : vector<8x256xbf16>, vector<256x1024xbf16>, vector<8x1024xf32> -> vector<8x1024xf32>
    %13 = arith.addf %10, %12 : vector<8x1024xf32>
    %14 = vector.extract_strided_slice %13 {offsets = [0, 0], sizes = [8, 768], strides = [1, 1]} : vector<8x1024xf32> to vector<8x768xf32>
    %cst_14 = arith.constant 5.000000e-01 : f32
    %15 = vector.broadcast %cst_14 : f32 to vector<8x768xf32>
    %16 = arith.mulf %15, %14 : vector<8x768xf32>
    %17 = math.tanh %16 : vector<8x768xf32>
    %cst_15 = arith.constant 5.000000e-01 : f32
    %18 = vector.broadcast %cst_15 : f32 to vector<8x768xf32>
    %19 = arith.mulf %18, %17 : vector<8x768xf32>
    %cst_16 = arith.constant 5.000000e-01 : f32
    %20 = vector.broadcast %cst_16 : f32 to vector<8x768xf32>
    %21 = arith.addf %19, %20 : vector<8x768xf32>
    %22 = vector.extract_strided_slice %21 {offsets = [0, 0], sizes = [8, 256], strides = [1, 1]} : vector<8x768xf32> to vector<8x256xf32>
    %23 = vector.extract_strided_slice %21 {offsets = [0, 256], sizes = [8, 256], strides = [1, 1]} : vector<8x768xf32> to vector<8x256xf32>
    %24 = vector.extract_strided_slice %21 {offsets = [0, 512], sizes = [8, 256], strides = [1, 1]} : vector<8x768xf32> to vector<8x256xf32>
    %25 = vector.extract_strided_slice %13 {offsets = [0, 768], sizes = [8, 256], strides = [1, 1]} : vector<8x1024xf32> to vector<8x256xf32>
    %26 = math.tanh %25 : vector<8x256xf32>
    %27 = arith.mulf %23, %9 : vector<8x256xf32>
    %28 = arith.mulf %22, %26 : vector<8x256xf32>
    %29 = arith.addf %27, %28 : vector<8x256xf32>
    %30 = math.tanh %29 : vector<8x256xf32>
    %31 = arith.mulf %24, %30 : vector<8x256xf32>
    %c8 = arith.constant 8 : index
    %c0_17 = arith.constant 0 : index
    %32 = vector.load %arg7[%c8, %c0_17] : memref<64x1024xf32, #tpu.memory_space<vmem>>, vector<8x1024xf32>
    %33 = arith.truncf %31 : vector<8x256xf32> to vector<8x256xbf16>
    %cst_18 = arith.constant dense<0.000000e+00> : vector<8x1024xf32>
    %34 = tpu.matmul %33, %7, %cst_18 {dimension_numbers = #tpu.dot_dimension_numbers<[1], [0], [0], [1], [0, 0, 1, 1], [], []>} : vector<8x256xbf16>, vector<256x1024xbf16>, vector<8x1024xf32> -> vector<8x1024xf32>
    %35 = arith.addf %32, %34 : vector<8x1024xf32>
    %36 = vector.extract_strided_slice %35 {offsets = [0, 0], sizes = [8, 768], strides = [1, 1]} : vector<8x1024xf32> to vector<8x768xf32>
    %cst_19 = arith.constant 5.000000e-01 : f32
    %37 = vector.broadcast %cst_19 : f32 to vector<8x768xf32>
    %38 = arith.mulf %37, %36 : vector<8x768xf32>
    %39 = math.tanh %38 : vector<8x768xf32>
    %cst_20 = arith.constant 5.000000e-01 : f32
    %40 = vector.broadcast %cst_20 : f32 to vector<8x768xf32>
    %41 = arith.mulf %40, %39 : vector<8x768xf32>
    %cst_21 = arith.constant 5.000000e-01 : f32
    %42 = vector.broadcast %cst_21 : f32 to vector<8x768xf32>
    %43 = arith.addf %41, %42 : vector<8x768xf32>
    %44 = vector.extract_strided_slice %43 {offsets = [0, 0], sizes = [8, 256], strides = [1, 1]} : vector<8x768xf32> to vector<8x256xf32>
    %45 = vector.extract_strided_slice %43 {offsets = [0, 256], sizes = [8, 256], strides = [1, 1]} : vector<8x768xf32> to vector<8x256xf32>
    %46 = vector.extract_strided_slice %43 {offsets = [0, 512], sizes = [8, 256], strides = [1, 1]} : vector<8x768xf32> to vector<8x256xf32>
    %47 = vector.extract_strided_slice %35 {offsets = [0, 768], sizes = [8, 256], strides = [1, 1]} : vector<8x1024xf32> to vector<8x256xf32>
    %48 = math.tanh %47 : vector<8x256xf32>
    %49 = arith.mulf %45, %29 : vector<8x256xf32>
    %50 = arith.mulf %44, %48 : vector<8x256xf32>
    %51 = arith.addf %49, %50 : vector<8x256xf32>
    %52 = math.tanh %51 : vector<8x256xf32>
    %53 = arith.mulf %46, %52 : vector<8x256xf32>
    %c16 = arith.constant 16 : index
    %c0_22 = arith.constant 0 : index
    %54 = vector.load %arg7[%c16, %c0_22] : memref<64x1024xf32, #tpu.memory_space<vmem>>, vector<8x1024xf32>
    %55 = arith.truncf %53 : vector<8x256xf32> to vector<8x256xbf16>
    %cst_23 = arith.constant dense<0.000000e+00> : vector<8x1024xf32>
    %56 = tpu.matmul %55, %7, %cst_23 {dimension_numbers = #tpu.dot_dimension_numbers<[1], [0], [0], [1], [0, 0, 1, 1], [], []>} : vector<8x256xbf16>, vector<256x1024xbf16>, vector<8x1024xf32> -> vector<8x1024xf32>
    %57 = arith.addf %54, %56 : vector<8x1024xf32>
    %58 = vector.extract_strided_slice %57 {offsets = [0, 0], sizes = [8, 768], strides = [1, 1]} : vector<8x1024xf32> to vector<8x768xf32>
    %cst_24 = arith.constant 5.000000e-01 : f32
    %59 = vector.broadcast %cst_24 : f32 to vector<8x768xf32>
    %60 = arith.mulf %59, %58 : vector<8x768xf32>
    %61 = math.tanh %60 : vector<8x768xf32>
    %cst_25 = arith.constant 5.000000e-01 : f32
    %62 = vector.broadcast %cst_25 : f32 to vector<8x768xf32>
    %63 = arith.mulf %62, %61 : vector<8x768xf32>
    %cst_26 = arith.constant 5.000000e-01 : f32
    %64 = vector.broadcast %cst_26 : f32 to vector<8x768xf32>
    %65 = arith.addf %63, %64 : vector<8x768xf32>
    %66 = vector.extract_strided_slice %65 {offsets = [0, 0], sizes = [8, 256], strides = [1, 1]} : vector<8x768xf32> to vector<8x256xf32>
    %67 = vector.extract_strided_slice %65 {offsets = [0, 256], sizes = [8, 256], strides = [1, 1]} : vector<8x768xf32> to vector<8x256xf32>
    %68 = vector.extract_strided_slice %65 {offsets = [0, 512], sizes = [8, 256], strides = [1, 1]} : vector<8x768xf32> to vector<8x256xf32>
    %69 = vector.extract_strided_slice %57 {offsets = [0, 768], sizes = [8, 256], strides = [1, 1]} : vector<8x1024xf32> to vector<8x256xf32>
    %70 = math.tanh %69 : vector<8x256xf32>
    %71 = arith.mulf %67, %51 : vector<8x256xf32>
    %72 = arith.mulf %66, %70 : vector<8x256xf32>
    %73 = arith.addf %71, %72 : vector<8x256xf32>
    %74 = math.tanh %73 : vector<8x256xf32>
    %75 = arith.mulf %68, %74 : vector<8x256xf32>
    %c24 = arith.constant 24 : index
    %c0_27 = arith.constant 0 : index
    %76 = vector.load %arg7[%c24, %c0_27] : memref<64x1024xf32, #tpu.memory_space<vmem>>, vector<8x1024xf32>
    %77 = arith.truncf %75 : vector<8x256xf32> to vector<8x256xbf16>
    %cst_28 = arith.constant dense<0.000000e+00> : vector<8x1024xf32>
    %78 = tpu.matmul %77, %7, %cst_28 {dimension_numbers = #tpu.dot_dimension_numbers<[1], [0], [0], [1], [0, 0, 1, 1], [], []>} : vector<8x256xbf16>, vector<256x1024xbf16>, vector<8x1024xf32> -> vector<8x1024xf32>
    %79 = arith.addf %76, %78 : vector<8x1024xf32>
    %80 = vector.extract_strided_slice %79 {offsets = [0, 0], sizes = [8, 768], strides = [1, 1]} : vector<8x1024xf32> to vector<8x768xf32>
    %cst_29 = arith.constant 5.000000e-01 : f32
    %81 = vector.broadcast %cst_29 : f32 to vector<8x768xf32>
    %82 = arith.mulf %81, %80 : vector<8x768xf32>
    %83 = math.tanh %82 : vector<8x768xf32>
    %cst_30 = arith.constant 5.000000e-01 : f32
    %84 = vector.broadcast %cst_30 : f32 to vector<8x768xf32>
    %85 = arith.mulf %84, %83 : vector<8x768xf32>
    %cst_31 = arith.constant 5.000000e-01 : f32
    %86 = vector.broadcast %cst_31 : f32 to vector<8x768xf32>
    %87 = arith.addf %85, %86 : vector<8x768xf32>
    %88 = vector.extract_strided_slice %87 {offsets = [0, 0], sizes = [8, 256], strides = [1, 1]} : vector<8x768xf32> to vector<8x256xf32>
    %89 = vector.extract_strided_slice %87 {offsets = [0, 256], sizes = [8, 256], strides = [1, 1]} : vector<8x768xf32> to vector<8x256xf32>
    %90 = vector.extract_strided_slice %87 {offsets = [0, 512], sizes = [8, 256], strides = [1, 1]} : vector<8x768xf32> to vector<8x256xf32>
    %91 = vector.extract_strided_slice %79 {offsets = [0, 768], sizes = [8, 256], strides = [1, 1]} : vector<8x1024xf32> to vector<8x256xf32>
    %92 = math.tanh %91 : vector<8x256xf32>
    %93 = arith.mulf %89, %73 : vector<8x256xf32>
    %94 = arith.mulf %88, %92 : vector<8x256xf32>
    %95 = arith.addf %93, %94 : vector<8x256xf32>
    %96 = math.tanh %95 : vector<8x256xf32>
    %97 = arith.mulf %90, %96 : vector<8x256xf32>
    %c32 = arith.constant 32 : index
    %c0_32 = arith.constant 0 : index
    %98 = vector.load %arg7[%c32, %c0_32] : memref<64x1024xf32, #tpu.memory_space<vmem>>, vector<8x1024xf32>
    %99 = arith.truncf %97 : vector<8x256xf32> to vector<8x256xbf16>
    %cst_33 = arith.constant dense<0.000000e+00> : vector<8x1024xf32>
    %100 = tpu.matmul %99, %7, %cst_33 {dimension_numbers = #tpu.dot_dimension_numbers<[1], [0], [0], [1], [0, 0, 1, 1], [], []>} : vector<8x256xbf16>, vector<256x1024xbf16>, vector<8x1024xf32> -> vector<8x1024xf32>
    %101 = arith.addf %98, %100 : vector<8x1024xf32>
    %102 = vector.extract_strided_slice %101 {offsets = [0, 0], sizes = [8, 768], strides = [1, 1]} : vector<8x1024xf32> to vector<8x768xf32>
    %cst_34 = arith.constant 5.000000e-01 : f32
    %103 = vector.broadcast %cst_34 : f32 to vector<8x768xf32>
    %104 = arith.mulf %103, %102 : vector<8x768xf32>
    %105 = math.tanh %104 : vector<8x768xf32>
    %cst_35 = arith.constant 5.000000e-01 : f32
    %106 = vector.broadcast %cst_35 : f32 to vector<8x768xf32>
    %107 = arith.mulf %106, %105 : vector<8x768xf32>
    %cst_36 = arith.constant 5.000000e-01 : f32
    %108 = vector.broadcast %cst_36 : f32 to vector<8x768xf32>
    %109 = arith.addf %107, %108 : vector<8x768xf32>
    %110 = vector.extract_strided_slice %109 {offsets = [0, 0], sizes = [8, 256], strides = [1, 1]} : vector<8x768xf32> to vector<8x256xf32>
    %111 = vector.extract_strided_slice %109 {offsets = [0, 256], sizes = [8, 256], strides = [1, 1]} : vector<8x768xf32> to vector<8x256xf32>
    %112 = vector.extract_strided_slice %109 {offsets = [0, 512], sizes = [8, 256], strides = [1, 1]} : vector<8x768xf32> to vector<8x256xf32>
    %113 = vector.extract_strided_slice %101 {offsets = [0, 768], sizes = [8, 256], strides = [1, 1]} : vector<8x1024xf32> to vector<8x256xf32>
    %114 = math.tanh %113 : vector<8x256xf32>
    %115 = arith.mulf %111, %95 : vector<8x256xf32>
    %116 = arith.mulf %110, %114 : vector<8x256xf32>
    %117 = arith.addf %115, %116 : vector<8x256xf32>
    %118 = math.tanh %117 : vector<8x256xf32>
    %119 = arith.mulf %112, %118 : vector<8x256xf32>
    %c40 = arith.constant 40 : index
    %c0_37 = arith.constant 0 : index
    %120 = vector.load %arg7[%c40, %c0_37] : memref<64x1024xf32, #tpu.memory_space<vmem>>, vector<8x1024xf32>
    %121 = arith.truncf %119 : vector<8x256xf32> to vector<8x256xbf16>
    %cst_38 = arith.constant dense<0.000000e+00> : vector<8x1024xf32>
    %122 = tpu.matmul %121, %7, %cst_38 {dimension_numbers = #tpu.dot_dimension_numbers<[1], [0], [0], [1], [0, 0, 1, 1], [], []>} : vector<8x256xbf16>, vector<256x1024xbf16>, vector<8x1024xf32> -> vector<8x1024xf32>
    %123 = arith.addf %120, %122 : vector<8x1024xf32>
    %124 = vector.extract_strided_slice %123 {offsets = [0, 0], sizes = [8, 768], strides = [1, 1]} : vector<8x1024xf32> to vector<8x768xf32>
    %cst_39 = arith.constant 5.000000e-01 : f32
    %125 = vector.broadcast %cst_39 : f32 to vector<8x768xf32>
    %126 = arith.mulf %125, %124 : vector<8x768xf32>
    %127 = math.tanh %126 : vector<8x768xf32>
    %cst_40 = arith.constant 5.000000e-01 : f32
    %128 = vector.broadcast %cst_40 : f32 to vector<8x768xf32>
    %129 = arith.mulf %128, %127 : vector<8x768xf32>
    %cst_41 = arith.constant 5.000000e-01 : f32
    %130 = vector.broadcast %cst_41 : f32 to vector<8x768xf32>
    %131 = arith.addf %129, %130 : vector<8x768xf32>
    %132 = vector.extract_strided_slice %131 {offsets = [0, 0], sizes = [8, 256], strides = [1, 1]} : vector<8x768xf32> to vector<8x256xf32>
    %133 = vector.extract_strided_slice %131 {offsets = [0, 256], sizes = [8, 256], strides = [1, 1]} : vector<8x768xf32> to vector<8x256xf32>
    %134 = vector.extract_strided_slice %131 {offsets = [0, 512], sizes = [8, 256], strides = [1, 1]} : vector<8x768xf32> to vector<8x256xf32>
    %135 = vector.extract_strided_slice %123 {offsets = [0, 768], sizes = [8, 256], strides = [1, 1]} : vector<8x1024xf32> to vector<8x256xf32>
    %136 = math.tanh %135 : vector<8x256xf32>
    %137 = arith.mulf %133, %117 : vector<8x256xf32>
    %138 = arith.mulf %132, %136 : vector<8x256xf32>
    %139 = arith.addf %137, %138 : vector<8x256xf32>
    %140 = math.tanh %139 : vector<8x256xf32>
    %141 = arith.mulf %134, %140 : vector<8x256xf32>
    %c48 = arith.constant 48 : index
    %c0_42 = arith.constant 0 : index
    %142 = vector.load %arg7[%c48, %c0_42] : memref<64x1024xf32, #tpu.memory_space<vmem>>, vector<8x1024xf32>
    %143 = arith.truncf %141 : vector<8x256xf32> to vector<8x256xbf16>
    %cst_43 = arith.constant dense<0.000000e+00> : vector<8x1024xf32>
    %144 = tpu.matmul %143, %7, %cst_43 {dimension_numbers = #tpu.dot_dimension_numbers<[1], [0], [0], [1], [0, 0, 1, 1], [], []>} : vector<8x256xbf16>, vector<256x1024xbf16>, vector<8x1024xf32> -> vector<8x1024xf32>
    %145 = arith.addf %142, %144 : vector<8x1024xf32>
    %146 = vector.extract_strided_slice %145 {offsets = [0, 0], sizes = [8, 768], strides = [1, 1]} : vector<8x1024xf32> to vector<8x768xf32>
    %cst_44 = arith.constant 5.000000e-01 : f32
    %147 = vector.broadcast %cst_44 : f32 to vector<8x768xf32>
    %148 = arith.mulf %147, %146 : vector<8x768xf32>
    %149 = math.tanh %148 : vector<8x768xf32>
    %cst_45 = arith.constant 5.000000e-01 : f32
    %150 = vector.broadcast %cst_45 : f32 to vector<8x768xf32>
    %151 = arith.mulf %150, %149 : vector<8x768xf32>
    %cst_46 = arith.constant 5.000000e-01 : f32
    %152 = vector.broadcast %cst_46 : f32 to vector<8x768xf32>
    %153 = arith.addf %151, %152 : vector<8x768xf32>
    %154 = vector.extract_strided_slice %153 {offsets = [0, 0], sizes = [8, 256], strides = [1, 1]} : vector<8x768xf32> to vector<8x256xf32>
    %155 = vector.extract_strided_slice %153 {offsets = [0, 256], sizes = [8, 256], strides = [1, 1]} : vector<8x768xf32> to vector<8x256xf32>
    %156 = vector.extract_strided_slice %153 {offsets = [0, 512], sizes = [8, 256], strides = [1, 1]} : vector<8x768xf32> to vector<8x256xf32>
    %157 = vector.extract_strided_slice %145 {offsets = [0, 768], sizes = [8, 256], strides = [1, 1]} : vector<8x1024xf32> to vector<8x256xf32>
    %158 = math.tanh %157 : vector<8x256xf32>
    %159 = arith.mulf %155, %139 : vector<8x256xf32>
    %160 = arith.mulf %154, %158 : vector<8x256xf32>
    %161 = arith.addf %159, %160 : vector<8x256xf32>
    %162 = math.tanh %161 : vector<8x256xf32>
    %163 = arith.mulf %156, %162 : vector<8x256xf32>
    %c56 = arith.constant 56 : index
    %c0_47 = arith.constant 0 : index
    %164 = vector.load %arg7[%c56, %c0_47] : memref<64x1024xf32, #tpu.memory_space<vmem>>, vector<8x1024xf32>
    %165 = arith.truncf %163 : vector<8x256xf32> to vector<8x256xbf16>
    %cst_48 = arith.constant dense<0.000000e+00> : vector<8x1024xf32>
    %166 = tpu.matmul %165, %7, %cst_48 {dimension_numbers = #tpu.dot_dimension_numbers<[1], [0], [0], [1], [0, 0, 1, 1], [], []>} : vector<8x256xbf16>, vector<256x1024xbf16>, vector<8x1024xf32> -> vector<8x1024xf32>
    %167 = arith.addf %164, %166 : vector<8x1024xf32>
    %168 = vector.extract_strided_slice %167 {offsets = [0, 0], sizes = [8, 768], strides = [1, 1]} : vector<8x1024xf32> to vector<8x768xf32>
    %cst_49 = arith.constant 5.000000e-01 : f32
    %169 = vector.broadcast %cst_49 : f32 to vector<8x768xf32>
    %170 = arith.mulf %169, %168 : vector<8x768xf32>
    %171 = math.tanh %170 : vector<8x768xf32>
    %cst_50 = arith.constant 5.000000e-01 : f32
    %172 = vector.broadcast %cst_50 : f32 to vector<8x768xf32>
    %173 = arith.mulf %172, %171 : vector<8x768xf32>
    %cst_51 = arith.constant 5.000000e-01 : f32
    %174 = vector.broadcast %cst_51 : f32 to vector<8x768xf32>
    %175 = arith.addf %173, %174 : vector<8x768xf32>
    %176 = vector.extract_strided_slice %175 {offsets = [0, 0], sizes = [8, 256], strides = [1, 1]} : vector<8x768xf32> to vector<8x256xf32>
    %177 = vector.extract_strided_slice %175 {offsets = [0, 256], sizes = [8, 256], strides = [1, 1]} : vector<8x768xf32> to vector<8x256xf32>
    %178 = vector.extract_strided_slice %175 {offsets = [0, 512], sizes = [8, 256], strides = [1, 1]} : vector<8x768xf32> to vector<8x256xf32>
    %179 = vector.extract_strided_slice %167 {offsets = [0, 768], sizes = [8, 256], strides = [1, 1]} : vector<8x1024xf32> to vector<8x256xf32>
    %180 = math.tanh %179 : vector<8x256xf32>
    %181 = arith.mulf %177, %161 : vector<8x256xf32>
    %182 = arith.mulf %176, %180 : vector<8x256xf32>
    %183 = arith.addf %181, %182 : vector<8x256xf32>
    %184 = math.tanh %183 : vector<8x256xf32>
    %185 = arith.mulf %178, %184 : vector<8x256xf32>
    %186 = arith.truncf %185 : vector<8x256xf32> to vector<8x256xbf16>
    %c0_52 = arith.constant 0 : index
    %c0_53 = arith.constant 0 : index
    %187 = vector.load %arg4[%c0_52, %c0_53] : memref<256x128xbf16, #tpu.memory_space<vmem>>, vector<256x128xbf16>
    %cst_54 = arith.constant dense<0.000000e+00> : vector<8x128xf32>
    %188 = tpu.matmul %186, %187, %cst_54 {dimension_numbers = #tpu.dot_dimension_numbers<[1], [0], [0], [1], [0, 0, 1, 1], [], []>} : vector<8x256xbf16>, vector<256x128xbf16>, vector<8x128xf32> -> vector<8x128xf32>
    %c0_55 = arith.constant 0 : index
    %c0_56 = arith.constant 0 : index
    %189 = vector.load %arg5[%c0_55, %c0_56] : memref<1x128xf32, #tpu.memory_space<vmem>>, vector<1x128xf32>
    %190 = vector.broadcast %189 : vector<1x128xf32> to vector<8x128xf32>
    %191 = arith.addf %188, %190 : vector<8x128xf32>
    %c0_57 = arith.constant 0 : index
    %c0_58 = arith.constant 0 : index
    %192 = vector.load %arg6[%c0_57, %c0_58] : memref<8x128xf32, #tpu.memory_space<vmem>>, vector<8x128xf32>
    tpu.vector_store %arg6[%c0_57, %c0_58], %191 {strides = array<i32>} : memref<8x128xf32, #tpu.memory_space<vmem>>, vector<8x128xf32>,
    return
  }
}

</mosaic_0001>

<bundles_post_ra>
// kernel: encoder_forward.1
= control target key start
LH: loop header
LB: loop body
LE: loop exit
PB: predicated region body
PF: predicated region fallthrough
CT: control target
= control target key end

     0   :  { %s7759_s0 = inlined_call_operand.vmem [shape: bf16[64,128], index: 0, kind: input, shape index: {}]   ;;  %s7760_s1 = inlined_call_operand.vmem [shape: bf16[128,1024], index: 1, kind: input, shape index: {}]   ;;  %s7761_s2 = inlined_call_operand.vmem [shape: bf16[256,1024], index: 2, kind: input, shape index: {}]   ;;  %s7762_s3 = inlined_call_operand.vmem [shape: f32[1,1024], index: 3, kind: input, shape index: {}]   ;;  %s7763_s4 = inlined_call_operand.vmem [shape: bf16[256,128], index: 4, kind: input, shape index: {}]   ;;  %s7764_s5 = inlined_call_operand.vmem [shape: f32[1,128], index: 5, kind: input, shape index: {}]   ;;  %s7765_s6 = inlined_call_operand.vmem [shape: f32[8,128], index: 6, kind: output, shape index: {}]  }
   0x1   :  { %v39_v0 = vld [vmem:[%s7761_s2] sm:$0xf]  ;;  %v43_v2 = vld [vmem:[%s7761_s2 + $0x4] sm:$0xf]  ;;  %v47_v4 = vld [vmem:[%s7761_s2 + $0x8] sm:$0xf] }
   0x2   :  { %v41_v1 = vld [vmem:[%s7761_s2 + $0x20] sm:$0xf]  ;;  %40 = vst [vmem:[#allocation3] sm:$0xf] %v39_v0  ;;  %44 = vst [vmem:[#allocation3 + $0x8] sm:$0xf] %v43_v2 }
   0x3   :  { %42 = vst [vmem:[#allocation3 + $0x4] sm:$0xf] %v41_v1  ;;  %v45_v3 = vld [vmem:[%s7761_s2 + $0x24] sm:$0xf]  ;;  %v49_v5 = vld [vmem:[%s7761_s2 + $0x28] sm:$0xf] }
   0x4   :  { %46 = vst [vmem:[#allocation3 + $0xc] sm:$0xf] %v45_v3  ;;  %48 = vst [vmem:[#allocation3 + $0x10] sm:$0xf] %v47_v4  ;;  %v51_v6 = vld [vmem:[%s7761_s2 + $0xc] sm:$0xf] }
   0x5   :  { %50 = vst [vmem:[#allocation3 + $0x14] sm:$0xf] %v49_v5  ;;  %v53_v7 = vld [vmem:[%s7761_s2 + $0x2c] sm:$0xf]  ;;  %v55_v8 = vld [vmem:[%s7761_s2 + $0x10] sm:$0xf] }
   0x6   :  { %52 = vst [vmem:[#allocation3 + $0x18] sm:$0xf] %v51_v6  ;;  %54 = vst [vmem:[#allocation3 + $0x1c] sm:$0xf] %v53_v7  ;;  %v57_v9 = vld [vmem:[%s7761_s2 + $0x30] sm:$0xf] }
   0x7   :  { %56 = vst [vmem:[#allocation3 + $0x20] sm:$0xf] %v55_v8  ;;  %v59_v10 = vld [vmem:[%s7761_s2 + $0x14] sm:$0xf]  ;;  %58 = vst [vmem:[#allocation3 + $0x24] sm:$0xf] %v57_v9 }
   0x8   :  { %v61_v11 = vld [vmem:[%s7761_s2 + $0x34] sm:$0xf]  ;;  %60 = vst [vmem:[#allocation3 + $0x28] sm:$0xf] %v59_v10  ;;  %v63_v12 = vld [vmem:[%s7761_s2 + $0x18] sm:$0xf] }
   0x9   :  { %62 = vst [vmem:[#allocation3 + $0x2c] sm:$0xf] %v61_v11  ;;  %v65_v13 = vld [vmem:[%s7761_s2 + $0x38] sm:$0xf]  ;;  %v67_v14 = vld [vmem:[%s7761_s2 + $0x1c] sm:$0xf] }
   0xa   :  { %64 = vst [vmem:[#allocation3 + $0x30] sm:$0xf] %v63_v12  ;;  %66 = vst [vmem:[#allocation3 + $0x34] sm:$0xf] %v65_v13  ;;  %v69_v15 = vld [vmem:[%s7761_s2 + $0x3c] sm:$0xff]  }
   0xb   :  { %68 = vst [vmem:[#allocation3 + $0x38] sm:$0xf] %v67_v14  ;;  %v73_v16 = vld [vmem:[%s7761_s2 + $0x60] sm:$0xf]  ;;  %v75_v17 = vld [vmem:[%s7761_s2 + $0x44] sm:$0xf] }
   0xc   :  { %70 = vst [vmem:[#allocation3 + $0x3c] sm:$0xff] %v69_v15   ;;  %74 = vst [vmem:[#allocation3 + $0x44] sm:$0xf] %v73_v16  ;;  %v77_v18 = vld [vmem:[%s7761_s2 + $0x64] sm:$0xf]  ;;  %v101_v30 = vld [vmem:[%s7761_s2 + $0x7c] sm:$0xff]  }
   0xd   :  { %76 = vst [vmem:[#allocation3 + $0x48] sm:$0xf] %v75_v17  ;;  %v79_v19 = vld [vmem:[%s7761_s2 + $0x48] sm:$0xf]  ;;  %78 = vst [vmem:[#allocation3 + $0x4c] sm:$0xf] %v77_v18 }
   0xe   :  { %v81_v20 = vld [vmem:[%s7761_s2 + $0x68] sm:$0xf]  ;;  %80 = vst [vmem:[#allocation3 + $0x50] sm:$0xf] %v79_v19  ;;  %v83_v21 = vld [vmem:[%s7761_s2 + $0x4c] sm:$0xf] }
   0xf   :  { %82 = vst [vmem:[#allocation3 + $0x54] sm:$0xf] %v81_v20  ;;  %v85_v22 = vld [vmem:[%s7761_s2 + $0x6c] sm:$0xf]  ;;  %v87_v23 = vld [vmem:[%s7761_s2 + $0x50] sm:$0xf] }
  0x10   :  { %84 = vst [vmem:[#allocation3 + $0x58] sm:$0xf] %v83_v21  ;;  %86 = vst [vmem:[#allocation3 + $0x5c] sm:$0xf] %v85_v22  ;;  %v89_v24 = vld [vmem:[%s7761_s2 + $0x70] sm:$0xf] }
  0x11   :  { %88 = vst [vmem:[#allocation3 + $0x60] sm:$0xf] %v87_v23  ;;  %v91_v25 = vld [vmem:[%s7761_s2 + $0x54] sm:$0xf]  ;;  %90 = vst [vmem:[#allocation3 + $0x64] sm:$0xf] %v89_v24 }
  0x12   :  { %v93_v26 = vld [vmem:[%s7761_s2 + $0x74] sm:$0xf]  ;;  %92 = vst [vmem:[#allocation3 + $0x68] sm:$0xf] %v91_v25  ;;  %v95_v27 = vld [vmem:[%s7761_s2 + $0x58] sm:$0xf] }
  0x13   :  { %94 = vst [vmem:[#allocation3 + $0x6c] sm:$0xf] %v93_v26  ;;  %v97_v28 = vld [vmem:[%s7761_s2 + $0x78] sm:$0xf]  ;;  %v99_v29 = vld [vmem:[%s7761_s2 + $0x5c] sm:$0xf] }
  0x14   :  { %96 = vst [vmem:[#allocation3 + $0x70] sm:$0xf] %v95_v27  ;;  %98 = vst [vmem:[#allocation3 + $0x74] sm:$0xf] %v97_v28  ;;  %v105_v31 = vld [vmem:[%s7761_s2 + $0xa0] sm:$0xf] }
  0x15   :  { %100 = vst [vmem:[#allocation3 + $0x78] sm:$0xf] %v99_v29  ;;  %v107_v32 = vld [vmem:[%s7761_s2 + $0x84] sm:$0xf]  ;;  %102 = vst [vmem:[#allocation3 + $0x7c] sm:$0xff] %v101_v30   ;;  %v133_v45 = vld [vmem:[%s7761_s2 + $0xbc] sm:$0xff]  }
  0x16   :  { %106 = vst [vmem:[#allocation3 + $0x84] sm:$0xf] %v105_v31  ;;  %108 = vst [vmem:[#allocation3 + $0x88] sm:$0xf] %v107_v32  ;;  %v109_v33 = vld [vmem:[%s7761_s2 + $0xa4] sm:$0xf] }
  0x17   :  { %v111_v34 = vld [vmem:[%s7761_s2 + $0x88] sm:$0xf]  ;;  %110 = vst [vmem:[#allocation3 + $0x8c] sm:$0xf] %v109_v33  ;;  %v115_v36 = vld [vmem:[%s7761_s2 + $0x8c] sm:$0xf] }
  0x18   :  { %v113_v35 = vld [vmem:[%s7761_s2 + $0xa8] sm:$0xf]  ;;  %112 = vst [vmem:[#allocation3 + $0x90] sm:$0xf] %v111_v34  ;;  %v117_v37 = vld [vmem:[%s7761_s2 + $0xac] sm:$0xf] }
  0x19   :  { %114 = vst [vmem:[#allocation3 + $0x94] sm:$0xf] %v113_v35  ;;  %v119_v38 = vld [vmem:[%s7761_s2 + $0x90] sm:$0xf]  ;;  %116 = vst [vmem:[#allocation3 + $0x98] sm:$0xf] %v115_v36 }
  0x1a   :  { %118 = vst [vmem:[#allocation3 + $0x9c] sm:$0xf] %v117_v37  ;;  %120 = vst [vmem:[#allocation3 + $0xa0] sm:$0xf] %v119_v38  ;;  %v121_v39 = vld [vmem:[%s7761_s2 + $0xb0] sm:$0xf] }
  0x1b   :  { %v123_v40 = vld [vmem:[%s7761_s2 + $0x94] sm:$0xf]  ;;  %122 = vst [vmem:[#allocation3 + $0xa4] sm:$0xf] %v121_v39  ;;  %v127_v42 = vld [vmem:[%s7761_s2 + $0x98] sm:$0xf] }
  0x1c   :  { %v125_v41 = vld [vmem:[%s7761_s2 + $0xb4] sm:$0xf]  ;;  %124 = vst [vmem:[#allocation3 + $0xa8] sm:$0xf] %v123_v40  ;;  %v129_v43 = vld [vmem:[%s7761_s2 + $0xb8] sm:$0xf] }
  0x1d   :  { %126 = vst [vmem:[#allocation3 + $0xac] sm:$0xf] %v125_v41  ;;  %v131_v44 = vld [vmem:[%s7761_s2 + $0x9c] sm:$0xf]  ;;  %128 = vst [vmem:[#allocation3 + $0xb0] sm:$0xf] %v127_v42 }
  0x1e   :  { %130 = vst [vmem:[#allocation3 + $0xb4] sm:$0xf] %v129_v43  ;;  %132 = vst [vmem:[#allocation3 + $0xb8] sm:$0xf] %v131_v44  ;;  %v137_v46 = vld [vmem:[%s7761_s2 + $0xe0] sm:$0xf] }
  0x1f   :  { %v139_v47 = vld [vmem:[%s7761_s2 + $0xc4] sm:$0xf]  ;;  %134 = vst [vmem:[#allocation3 + $0xbc] sm:$0xff] %v133_v45   ;;  %138 = vst [vmem:[#allocation3 + $0xc4] sm:$0xf] %v137_v46  ;;  %v165_v60 = vld [vmem:[%s7761_s2 + $0xfc] sm:$0xff]  }
  0x20   :  { %140 = vst [vmem:[#allocation3 + $0xc8] sm:$0xf] %v139_v47  ;;  %v141_v48 = vld [vmem:[%s7761_s2 + $0xe4] sm:$0xf]  ;;  %v143_v49 = vld [vmem:[%s7761_s2 + $0xc8] sm:$0xf] }
  0x21   :  { %v145_v50 = vld [vmem:[%s7761_s2 + $0xe8] sm:$0xf]  ;;  %142 = vst [vmem:[#allocation3 + $0xcc] sm:$0xf] %v141_v48  ;;  %144 = vst [vmem:[#allocation3 + $0xd0] sm:$0xf] %v143_v49 }
  0x22   :  { %146 = vst [vmem:[#allocation3 + $0xd4] sm:$0xf] %v145_v50  ;;  %v147_v51 = vld [vmem:[%s7761_s2 + $0xcc] sm:$0xf]  ;;  %v151_v53 = vld [vmem:[%s7761_s2 + $0xd0] sm:$0xf] }
  0x23   :  { %v149_v52 = vld [vmem:[%s7761_s2 + $0xec] sm:$0xf]  ;;  %148 = vst [vmem:[#allocation3 + $0xd8] sm:$0xf] %v147_v51  ;;  %152 = vst [vmem:[#allocation3 + $0xe0] sm:$0xf] %v151_v53 }
  0x24   :  { %150 = vst [vmem:[#allocation3 + $0xdc] sm:$0xf] %v149_v52  ;;  %v153_v54 = vld [vmem:[%s7761_s2 + $0xf0] sm:$0xf]  ;;  %v155_v55 = vld [vmem:[%s7761_s2 + $0xd4] sm:$0xf] }
  0x25   :  { %v157_v56 = vld [vmem:[%s7761_s2 + $0xf4] sm:$0xf]  ;;  %154 = vst [vmem:[#allocation3 + $0xe4] sm:$0xf] %v153_v54  ;;  %156 = vst [vmem:[#allocation3 + $0xe8] sm:$0xf] %v155_v55 }
  0x26   :  { %158 = vst [vmem:[#allocation3 + $0xec] sm:$0xf] %v157_v56  ;;  %v159_v57 = vld [vmem:[%s7761_s2 + $0xd8] sm:$0xf]  ;;  %v163_v59 = vld [vmem:[%s7761_s2 + $0xdc] sm:$0xf] }
  0x27   :  { %v161_v58 = vld [vmem:[%s7761_s2 + $0xf8] sm:$0xf]  ;;  %160 = vst [vmem:[#allocation3 + $0xf0] sm:$0xf] %v159_v57  ;;  %164 = vst [vmem:[#allocation3 + $0xf8] sm:$0xf] %v163_v59 }
  0x28   :  { %162 = vst [vmem:[#allocation3 + $0xf4] sm:$0xf] %v161_v58  ;;  %v169_v61 = vld [vmem:[%s7761_s2 + $0x120] sm:$0xf]  ;;  %v171_v62 = vld [vmem:[%s7761_s2 + $0x104] sm:$0xf] }
  0x29   :  { %166 = vst [vmem:[#allocation3 + $0xfc] sm:$0xff] %v165_v60   ;;  %170 = vst [vmem:[#allocation3 + $0x104] sm:$0xf] %v169_v61  ;;  %v173_v63 = vld [vmem:[%s7761_s2 + $0x124] sm:$0xf]  ;;  %v197_v11 = vld [vmem:[%s7761_s2 + $0x13c] sm:$0xff]  }
  0x2a   :  { %172 = vst [vmem:[#allocation3 + $0x108] sm:$0xf] %v171_v62  ;;  %v175_v0 = vld [vmem:[%s7761_s2 + $0x108] sm:$0xf]  ;;  %174 = vst [vmem:[#allocation3 + $0x10c] sm:$0xf] %v173_v63 }
  0x2b   :  { %v177_v1 = vld [vmem:[%s7761_s2 + $0x128] sm:$0xf]  ;;  %176 = vst [vmem:[#allocation3 + $0x110] sm:$0xf] %v175_v0  ;;  %v179_v2 = vld [vmem:[%s7761_s2 + $0x10c] sm:$0xf] }
  0x2c   :  { %178 = vst [vmem:[#allocation3 + $0x114] sm:$0xf] %v177_v1  ;;  %v181_v3 = vld [vmem:[%s7761_s2 + $0x12c] sm:$0xf]  ;;  %v183_v4 = vld [vmem:[%s7761_s2 + $0x110] sm:$0xf] }
  0x2d   :  { %180 = vst [vmem:[#allocation3 + $0x118] sm:$0xf] %v179_v2  ;;  %182 = vst [vmem:[#allocation3 + $0x11c] sm:$0xf] %v181_v3  ;;  %v185_v5 = vld [vmem:[%s7761_s2 + $0x130] sm:$0xf] }
  0x2e   :  { %184 = vst [vmem:[#allocation3 + $0x120] sm:$0xf] %v183_v4  ;;  %v187_v6 = vld [vmem:[%s7761_s2 + $0x114] sm:$0xf]  ;;  %186 = vst [vmem:[#allocation3 + $0x124] sm:$0xf] %v185_v5 }
  0x2f   :  { %v189_v7 = vld [vmem:[%s7761_s2 + $0x134] sm:$0xf]  ;;  %188 = vst [vmem:[#allocation3 + $0x128] sm:$0xf] %v187_v6  ;;  %v191_v8 = vld [vmem:[%s7761_s2 + $0x118] sm:$0xf] }
  0x30   :  { %190 = vst [vmem:[#allocation3 + $0x12c] sm:$0xf] %v189_v7  ;;  %v193_v9 = vld [vmem:[%s7761_s2 + $0x138] sm:$0xf]  ;;  %v195_v10 = vld [vmem:[%s7761_s2 + $0x11c] sm:$0xf] }
  0x31   :  { %192 = vst [vmem:[#allocation3 + $0x130] sm:$0xf] %v191_v8  ;;  %194 = vst [vmem:[#allocation3 + $0x134] sm:$0xf] %v193_v9  ;;  %v201_v12 = vld [vmem:[%s7761_s2 + $0x160] sm:$0xf] }
  0x32   :  { %196 = vst [vmem:[#allocation3 + $0x138] sm:$0xf] %v195_v10  ;;  %v203_v13 = vld [vmem:[%s7761_s2 + $0x144] sm:$0xf]  ;;  %198 = vst [vmem:[#allocation3 + $0x13c] sm:$0xff] %v197_v11   ;;  %v229_v26 = vld [vmem:[%s7761_s2 + $0x17c] sm:$0xff]  }
  0x33   :  { %202 = vst [vmem:[#allocation3 + $0x144] sm:$0xf] %v201_v12  ;;  %204 = vst [vmem:[#allocation3 + $0x148] sm:$0xf] %v203_v13  ;;  %v205_v14 = vld [vmem:[%s7761_s2 + $0x164] sm:$0xf] }
  0x34   :  { %v207_v15 = vld [vmem:[%s7761_s2 + $0x148] sm:$0xf]  ;;  %206 = vst [vmem:[#allocation3 + $0x14c] sm:$0xf] %v205_v14  ;;  %v211_v17 = vld [vmem:[%s7761_s2 + $0x14c] sm:$0xf] }
  0x35   :  { %v209_v16 = vld [vmem:[%s7761_s2 + $0x168] sm:$0xf]  ;;  %208 = vst [vmem:[#allocation3 + $0x150] sm:$0xf] %v207_v15  ;;  %v213_v18 = vld [vmem:[%s7761_s2 + $0x16c] sm:$0xf] }
  0x36   :  { %210 = vst [vmem:[#allocation3 + $0x154] sm:$0xf] %v209_v16  ;;  %v215_v19 = vld [vmem:[%s7761_s2 + $0x150] sm:$0xf]  ;;  %212 = vst [vmem:[#allocation3 + $0x158] sm:$0xf] %v211_v17 }
  0x37   :  { %214 = vst [vmem:[#allocation3 + $0x15c] sm:$0xf] %v213_v18  ;;  %216 = vst [vmem:[#allocation3 + $0x160] sm:$0xf] %v215_v19  ;;  %v217_v20 = vld [vmem:[%s7761_s2 + $0x170] sm:$0xf] }
  0x38   :  { %v219_v21 = vld [vmem:[%s7761_s2 + $0x154] sm:$0xf]  ;;  %218 = vst [vmem:[#allocation3 + $0x164] sm:$0xf] %v217_v20  ;;  %v223_v23 = vld [vmem:[%s7761_s2 + $0x158] sm:$0xf] }
  0x39   :  { %v221_v22 = vld [vmem:[%s7761_s2 + $0x174] sm:$0xf]  ;;  %220 = vst [vmem:[#allocation3 + $0x168] sm:$0xf] %v219_v21  ;;  %v225_v24 = vld [vmem:[%s7761_s2 + $0x178] sm:$0xf] }
  0x3a   :  { %222 = vst [vmem:[#allocation3 + $0x16c] sm:$0xf] %v221_v22  ;;  %v227_v25 = vld [vmem:[%s7761_s2 + $0x15c] sm:$0xf]  ;;  %224 = vst [vmem:[#allocation3 + $0x170] sm:$0xf] %v223_v23 }
  0x3b   :  { %226 = vst [vmem:[#allocation3 + $0x174] sm:$0xf] %v225_v24  ;;  %228 = vst [vmem:[#allocation3 + $0x178] sm:$0xf] %v227_v25  ;;  %v233_v27 = vld [vmem:[%s7761_s2 + $0x1a0] sm:$0xf] }
  0x3c   :  { %v235_v28 = vld [vmem:[%s7761_s2 + $0x184] sm:$0xf]  ;;  %230 = vst [vmem:[#allocation3 + $0x17c] sm:$0xff] %v229_v26   ;;  %234 = vst [vmem:[#allocation3 + $0x184] sm:$0xf] %v233_v27  ;;  %v261_v41 = vld [vmem:[%s7761_s2 + $0x1bc] sm:$0xff]  }
  0x3d   :  { %236 = vst [vmem:[#allocation3 + $0x188] sm:$0xf] %v235_v28  ;;  %v237_v29 = vld [vmem:[%s7761_s2 + $0x1a4] sm:$0xf]  ;;  %v239_v30 = vld [vmem:[%s7761_s2 + $0x188] sm:$0xf] }
  0x3e   :  { %v241_v31 = vld [vmem:[%s7761_s2 + $0x1a8] sm:$0xf]  ;;  %238 = vst [vmem:[#allocation3 + $0x18c] sm:$0xf] %v237_v29  ;;  %240 = vst [vmem:[#allocation3 + $0x190] sm:$0xf] %v239_v30 }
  0x3f   :  { %242 = vst [vmem:[#allocation3 + $0x194] sm:$0xf] %v241_v31  ;;  %v243_v32 = vld [vmem:[%s7761_s2 + $0x18c] sm:$0xf]  ;;  %v247_v34 = vld [vmem:[%s7761_s2 + $0x190] sm:$0xf] }
  0x40   :  { %v245_v33 = vld [vmem:[%s7761_s2 + $0x1ac] sm:$0xf]  ;;  %244 = vst [vmem:[#allocation3 + $0x198] sm:$0xf] %v243_v32  ;;  %248 = vst [vmem:[#allocation3 + $0x1a0] sm:$0xf] %v247_v34 }
  0x41   :  { %246 = vst [vmem:[#allocation3 + $0x19c] sm:$0xf] %v245_v33  ;;  %v249_v35 = vld [vmem:[%s7761_s2 + $0x1b0] sm:$0xf]  ;;  %v251_v36 = vld [vmem:[%s7761_s2 + $0x194] sm:$0xf] }
  0x42   :  { %v253_v37 = vld [vmem:[%s7761_s2 + $0x1b4] sm:$0xf]  ;;  %250 = vst [vmem:[#allocation3 + $0x1a4] sm:$0xf] %v249_v35  ;;  %252 = vst [vmem:[#allocation3 + $0x1a8] sm:$0xf] %v251_v36 }
  0x43   :  { %254 = vst [vmem:[#allocation3 + $0x1ac] sm:$0xf] %v253_v37  ;;  %v255_v38 = vld [vmem:[%s7761_s2 + $0x198] sm:$0xf]  ;;  %v259_v40 = vld [vmem:[%s7761_s2 + $0x19c] sm:$0xf] }
  0x44   :  { %v257_v39 = vld [vmem:[%s7761_s2 + $0x1b8] sm:$0xf]  ;;  %256 = vst [vmem:[#allocation3 + $0x1b0] sm:$0xf] %v255_v38  ;;  %260 = vst [vmem:[#allocation3 + $0x1b8] sm:$0xf] %v259_v40 }
  0x45   :  { %258 = vst [vmem:[#allocation3 + $0x1b4] sm:$0xf] %v257_v39  ;;  %v265_v42 = vld [vmem:[%s7761_s2 + $0x1e0] sm:$0xf]  ;;  %v267_v43 = vld [vmem:[%s7761_s2 + $0x1c4] sm:$0xf] }
  0x46   :  { %262 = vst [vmem:[#allocation3 + $0x1bc] sm:$0xff] %v261_v41   ;;  %266 = vst [vmem:[#allocation3 + $0x1c4] sm:$0xf] %v265_v42  ;;  %v269_v44 = vld [vmem:[%s7761_s2 + $0x1e4] sm:$0xf]  ;;  %v293_v56 = vld [vmem:[%s7761_s2 + $0x1fc] sm:$0xff]  }
  0x47   :  { %268 = vst [vmem:[#allocation3 + $0x1c8] sm:$0xf] %v267_v43  ;;  %v271_v45 = vld [vmem:[%s7761_s2 + $0x1c8] sm:$0xf]  ;;  %270 = vst [vmem:[#allocation3 + $0x1cc] sm:$0xf] %v269_v44 }
  0x48   :  { %v273_v46 = vld [vmem:[%s7761_s2 + $0x1e8] sm:$0xf]  ;;  %272 = vst [vmem:[#allocation3 + $0x1d0] sm:$0xf] %v271_v45  ;;  %v275_v47 = vld [vmem:[%s7761_s2 + $0x1cc] sm:$0xf] }
  0x49   :  { %274 = vst [vmem:[#allocation3 + $0x1d4] sm:$0xf] %v273_v46  ;;  %v277_v48 = vld [vmem:[%s7761_s2 + $0x1ec] sm:$0xf]  ;;  %v279_v49 = vld [vmem:[%s7761_s2 + $0x1d0] sm:$0xf] }
  0x4a   :  { %276 = vst [vmem:[#allocation3 + $0x1d8] sm:$0xf] %v275_v47  ;;  %278 = vst [vmem:[#allocation3 + $0x1dc] sm:$0xf] %v277_v48  ;;  %v281_v50 = vld [vmem:[%s7761_s2 + $0x1f0] sm:$0xf] }
  0x4b   :  { %280 = vst [vmem:[#allocation3 + $0x1e0] sm:$0xf] %v279_v49  ;;  %v283_v51 = vld [vmem:[%s7761_s2 + $0x1d4] sm:$0xf]  ;;  %282 = vst [vmem:[#allocation3 + $0x1e4] sm:$0xf] %v281_v50 }
  0x4c   :  { %v285_v52 = vld [vmem:[%s7761_s2 + $0x1f4] sm:$0xf]  ;;  %284 = vst [vmem:[#allocation3 + $0x1e8] sm:$0xf] %v283_v51  ;;  %v287_v53 = vld [vmem:[%s7761_s2 + $0x1d8] sm:$0xf] }
  0x4d   :  { %286 = vst [vmem:[#allocation3 + $0x1ec] sm:$0xf] %v285_v52  ;;  %v289_v54 = vld [vmem:[%s7761_s2 + $0x1f8] sm:$0xf]  ;;  %v291_v55 = vld [vmem:[%s7761_s2 + $0x1dc] sm:$0xf] }
  0x4e   :  { %288 = vst [vmem:[#allocation3 + $0x1f0] sm:$0xf] %v287_v53  ;;  %290 = vst [vmem:[#allocation3 + $0x1f4] sm:$0xf] %v289_v54  ;;  %v297_v57 = vld [vmem:[%s7761_s2 + $0x220] sm:$0xf] }
  0x4f   :  { %292 = vst [vmem:[#allocation3 + $0x1f8] sm:$0xf] %v291_v55  ;;  %v299_v58 = vld [vmem:[%s7761_s2 + $0x204] sm:$0xf]  ;;  %294 = vst [vmem:[#allocation3 + $0x1fc] sm:$0xff] %v293_v56   ;;  %v325_v7 = vld [vmem:[%s7761_s2 + $0x23c] sm:$0xff]  }
  0x50   :  { %298 = vst [vmem:[#allocation3 + $0x204] sm:$0xf] %v297_v57  ;;  %300 = vst [vmem:[#allocation3 + $0x208] sm:$0xf] %v299_v58  ;;  %v301_v59 = vld [vmem:[%s7761_s2 + $0x224] sm:$0xf] }
  0x51   :  { %v303_v60 = vld [vmem:[%s7761_s2 + $0x208] sm:$0xf]  ;;  %302 = vst [vmem:[#allocation3 + $0x20c] sm:$0xf] %v301_v59  ;;  %v307_v62 = vld [vmem:[%s7761_s2 + $0x20c] sm:$0xf] }
  0x52   :  { %v305_v61 = vld [vmem:[%s7761_s2 + $0x228] sm:$0xf]  ;;  %304 = vst [vmem:[#allocation3 + $0x210] sm:$0xf] %v303_v60  ;;  %v309_v63 = vld [vmem:[%s7761_s2 + $0x22c] sm:$0xf] }
  0x53   :  { %306 = vst [vmem:[#allocation3 + $0x214] sm:$0xf] %v305_v61  ;;  %v311_v0 = vld [vmem:[%s7761_s2 + $0x210] sm:$0xf]  ;;  %308 = vst [vmem:[#allocation3 + $0x218] sm:$0xf] %v307_v62 }
  0x54   :  { %310 = vst [vmem:[#allocation3 + $0x21c] sm:$0xf] %v309_v63  ;;  %312 = vst [vmem:[#allocation3 + $0x220] sm:$0xf] %v311_v0  ;;  %v313_v1 = vld [vmem:[%s7761_s2 + $0x230] sm:$0xf] }
  0x55   :  { %v315_v2 = vld [vmem:[%s7761_s2 + $0x214] sm:$0xf]  ;;  %314 = vst [vmem:[#allocation3 + $0x224] sm:$0xf] %v313_v1  ;;  %v319_v4 = vld [vmem:[%s7761_s2 + $0x218] sm:$0xf] }
  0x56   :  { %v317_v3 = vld [vmem:[%s7761_s2 + $0x234] sm:$0xf]  ;;  %316 = vst [vmem:[#allocation3 + $0x228] sm:$0xf] %v315_v2  ;;  %v321_v5 = vld [vmem:[%s7761_s2 + $0x238] sm:$0xf] }
  0x57   :  { %318 = vst [vmem:[#allocation3 + $0x22c] sm:$0xf] %v317_v3  ;;  %v323_v6 = vld [vmem:[%s7761_s2 + $0x21c] sm:$0xf]  ;;  %320 = vst [vmem:[#allocation3 + $0x230] sm:$0xf] %v319_v4 }
  0x58   :  { %322 = vst [vmem:[#allocation3 + $0x234] sm:$0xf] %v321_v5  ;;  %324 = vst [vmem:[#allocation3 + $0x238] sm:$0xf] %v323_v6  ;;  %v329_v8 = vld [vmem:[%s7761_s2 + $0x260] sm:$0xf] }
  0x59   :  { %v331_v9 = vld [vmem:[%s7761_s2 + $0x244] sm:$0xf]  ;;  %326 = vst [vmem:[#allocation3 + $0x23c] sm:$0xff] %v325_v7   ;;  %330 = vst [vmem:[#allocation3 + $0x244] sm:$0xf] %v329_v8  ;;  %v357_v22 = vld [vmem:[%s7761_s2 + $0x27c] sm:$0xff]  }
  0x5a   :  { %332 = vst [vmem:[#allocation3 + $0x248] sm:$0xf] %v331_v9  ;;  %v333_v10 = vld [vmem:[%s7761_s2 + $0x264] sm:$0xf]  ;;  %v335_v11 = vld [vmem:[%s7761_s2 + $0x248] sm:$0xf] }
  0x5b   :  { %v337_v12 = vld [vmem:[%s7761_s2 + $0x268] sm:$0xf]  ;;  %334 = vst [vmem:[#allocation3 + $0x24c] sm:$0xf] %v333_v10  ;;  %336 = vst [vmem:[#allocation3 + $0x250] sm:$0xf] %v335_v11 }
  0x5c   :  { %338 = vst [vmem:[#allocation3 + $0x254] sm:$0xf] %v337_v12  ;;  %v339_v13 = vld [vmem:[%s7761_s2 + $0x24c] sm:$0xf]  ;;  %v343_v15 = vld [vmem:[%s7761_s2 + $0x250] sm:$0xf] }
  0x5d   :  { %v341_v14 = vld [vmem:[%s7761_s2 + $0x26c] sm:$0xf]  ;;  %340 = vst [vmem:[#allocation3 + $0x258] sm:$0xf] %v339_v13  ;;  %344 = vst [vmem:[#allocation3 + $0x260] sm:$0xf] %v343_v15 }
  0x5e   :  { %342 = vst [vmem:[#allocation3 + $0x25c] sm:$0xf] %v341_v14  ;;  %v345_v16 = vld [vmem:[%s7761_s2 + $0x270] sm:$0xf]  ;;  %v347_v17 = vld [vmem:[%s7761_s2 + $0x254] sm:$0xf] }
  0x5f   :  { %v349_v18 = vld [vmem:[%s7761_s2 + $0x274] sm:$0xf]  ;;  %346 = vst [vmem:[#allocation3 + $0x264] sm:$0xf] %v345_v16  ;;  %348 = vst [vmem:[#allocation3 + $0x268] sm:$0xf] %v347_v17 }
  0x60   :  { %350 = vst [vmem:[#allocation3 + $0x26c] sm:$0xf] %v349_v18  ;;  %v351_v19 = vld [vmem:[%s7761_s2 + $0x258] sm:$0xf]  ;;  %v355_v21 = vld [vmem:[%s7761_s2 + $0x25c] sm:$0xf] }
  0x61   :  { %v353_v20 = vld [vmem:[%s7761_s2 + $0x278] sm:$0xf]  ;;  %352 = vst [vmem:[#allocation3 + $0x270] sm:$0xf] %v351_v19  ;;  %356 = vst [vmem:[#allocation3 + $0x278] sm:$0xf] %v355_v21 }
  0x62   :  { %354 = vst [vmem:[#allocation3 + $0x274] sm:$0xf] %v353_v20  ;;  %v361_v23 = vld [vmem:[%s7761_s2 + $0x2a0] sm:$0xf]  ;;  %v363_v24 = vld [vmem:[%s7761_s2 + $0x284] sm:$0xf] }
  0x63   :  { %358 = vst [vmem:[#allocation3 + $0x27c] sm:$0xff] %v357_v22   ;;  %362 = vst [vmem:[#allocation3 + $0x284] sm:$0xf] %v361_v23  ;;  %v365_v25 = vld [vmem:[%s7761_s2 + $0x2a4] sm:$0xf]  ;;  %v389_v37 = vld [vmem:[%s7761_s2 + $0x2bc] sm:$0xff]  }
  0x64   :  { %364 = vst [vmem:[#allocation3 + $0x288] sm:$0xf] %v363_v24  ;;  %v367_v26 = vld [vmem:[%s7761_s2 + $0x288] sm:$0xf]  ;;  %366 = vst [vmem:[#allocation3 + $0x28c] sm:$0xf] %v365_v25 }
  0x65   :  { %v369_v27 = vld [vmem:[%s7761_s2 + $0x2a8] sm:$0xf]  ;;  %368 = vst [vmem:[#allocation3 + $0x290] sm:$0xf] %v367_v26  ;;  %v371_v28 = vld [vmem:[%s7761_s2 + $0x28c] sm:$0xf] }
  0x66   :  { %370 = vst [vmem:[#allocation3 + $0x294] sm:$0xf] %v369_v27  ;;  %v373_v29 = vld [vmem:[%s7761_s2 + $0x2ac] sm:$0xf]  ;;  %v375_v30 = vld [vmem:[%s7761_s2 + $0x290] sm:$0xf] }
  0x67   :  { %372 = vst [vmem:[#allocation3 + $0x298] sm:$0xf] %v371_v28  ;;  %374 = vst [vmem:[#allocation3 + $0x29c] sm:$0xf] %v373_v29  ;;  %v377_v31 = vld [vmem:[%s7761_s2 + $0x2b0] sm:$0xf] }
  0x68   :  { %376 = vst [vmem:[#allocation3 + $0x2a0] sm:$0xf] %v375_v30  ;;  %v379_v32 = vld [vmem:[%s7761_s2 + $0x294] sm:$0xf]  ;;  %378 = vst [vmem:[#allocation3 + $0x2a4] sm:$0xf] %v377_v31 }
  0x69   :  { %v381_v33 = vld [vmem:[%s7761_s2 + $0x2b4] sm:$0xf]  ;;  %380 = vst [vmem:[#allocation3 + $0x2a8] sm:$0xf] %v379_v32  ;;  %v383_v34 = vld [vmem:[%s7761_s2 + $0x298] sm:$0xf] }
  0x6a   :  { %382 = vst [vmem:[#allocation3 + $0x2ac] sm:$0xf] %v381_v33  ;;  %v385_v35 = vld [vmem:[%s7761_s2 + $0x2b8] sm:$0xf]  ;;  %v387_v36 = vld [vmem:[%s7761_s2 + $0x29c] sm:$0xf] }
  0x6b   :  { %384 = vst [vmem:[#allocation3 + $0x2b0] sm:$0xf] %v383_v34  ;;  %386 = vst [vmem:[#allocation3 + $0x2b4] sm:$0xf] %v385_v35  ;;  %v393_v38 = vld [vmem:[%s7761_s2 + $0x2e0] sm:$0xf] }
  0x6c   :  { %388 = vst [vmem:[#allocation3 + $0x2b8] sm:$0xf] %v387_v36  ;;  %v395_v39 = vld [vmem:[%s7761_s2 + $0x2c4] sm:$0xf]  ;;  %390 = vst [vmem:[#allocation3 + $0x2bc] sm:$0xff] %v389_v37   ;;  %v421_v52 = vld [vmem:[%s7761_s2 + $0x2fc] sm:$0xff]  }
  0x6d   :  { %394 = vst [vmem:[#allocation3 + $0x2c4] sm:$0xf] %v393_v38  ;;  %396 = vst [vmem:[#allocation3 + $0x2c8] sm:$0xf] %v395_v39  ;;  %v397_v40 = vld [vmem:[%s7761_s2 + $0x2e4] sm:$0xf] }
  0x6e   :  { %v399_v41 = vld [vmem:[%s7761_s2 + $0x2c8] sm:$0xf]  ;;  %398 = vst [vmem:[#allocation3 + $0x2cc] sm:$0xf] %v397_v40  ;;  %v403_v43 = vld [vmem:[%s7761_s2 + $0x2cc] sm:$0xf] }
  0x6f   :  { %v401_v42 = vld [vmem:[%s7761_s2 + $0x2e8] sm:$0xf]  ;;  %400 = vst [vmem:[#allocation3 + $0x2d0] sm:$0xf] %v399_v41  ;;  %v405_v44 = vld [vmem:[%s7761_s2 + $0x2ec] sm:$0xf] }
  0x70   :  { %402 = vst [vmem:[#allocation3 + $0x2d4] sm:$0xf] %v401_v42  ;;  %v407_v45 = vld [vmem:[%s7761_s2 + $0x2d0] sm:$0xf]  ;;  %404 = vst [vmem:[#allocation3 + $0x2d8] sm:$0xf] %v403_v43 }
  0x71   :  { %406 = vst [vmem:[#allocation3 + $0x2dc] sm:$0xf] %v405_v44  ;;  %408 = vst [vmem:[#allocation3 + $0x2e0] sm:$0xf] %v407_v45  ;;  %v409_v46 = vld [vmem:[%s7761_s2 + $0x2f0] sm:$0xf] }
  0x72   :  { %v411_v47 = vld [vmem:[%s7761_s2 + $0x2d4] sm:$0xf]  ;;  %410 = vst [vmem:[#allocation3 + $0x2e4] sm:$0xf] %v409_v46  ;;  %v415_v49 = vld [vmem:[%s7761_s2 + $0x2d8] sm:$0xf] }
  0x73   :  { %v413_v48 = vld [vmem:[%s7761_s2 + $0x2f4] sm:$0xf]  ;;  %412 = vst [vmem:[#allocation3 + $0x2e8] sm:$0xf] %v411_v47  ;;  %v417_v50 = vld [vmem:[%s7761_s2 + $0x2f8] sm:$0xf] }
  0x74   :  { %414 = vst [vmem:[#allocation3 + $0x2ec] sm:$0xf] %v413_v48  ;;  %v419_v51 = vld [vmem:[%s7761_s2 + $0x2dc] sm:$0xf]  ;;  %416 = vst [vmem:[#allocation3 + $0x2f0] sm:$0xf] %v415_v49 }
  0x75   :  { %418 = vst [vmem:[#allocation3 + $0x2f4] sm:$0xf] %v417_v50  ;;  %420 = vst [vmem:[#allocation3 + $0x2f8] sm:$0xf] %v419_v51  ;;  %v425_v53 = vld [vmem:[%s7761_s2 + $0x320] sm:$0xf] }
  0x76   :  { %v427_v54 = vld [vmem:[%s7761_s2 + $0x304] sm:$0xf]  ;;  %422 = vst [vmem:[#allocation3 + $0x2fc] sm:$0xff] %v421_v52   ;;  %426 = vst [vmem:[#allocation3 + $0x304] sm:$0xf] %v425_v53  ;;  %v453_v3 = vld [vmem:[%s7761_s2 + $0x33c] sm:$0xff]  }
  0x77   :  { %428 = vst [vmem:[#allocation3 + $0x308] sm:$0xf] %v427_v54  ;;  %v429_v55 = vld [vmem:[%s7761_s2 + $0x324] sm:$0xf]  ;;  %v431_v56 = vld [vmem:[%s7761_s2 + $0x308] sm:$0xf] }
  0x78   :  { %v433_v57 = vld [vmem:[%s7761_s2 + $0x328] sm:$0xf]  ;;  %430 = vst [vmem:[#allocation3 + $0x30c] sm:$0xf] %v429_v55  ;;  %432 = vst [vmem:[#allocation3 + $0x310] sm:$0xf] %v431_v56 }
  0x79   :  { %434 = vst [vmem:[#allocation3 + $0x314] sm:$0xf] %v433_v57  ;;  %v435_v58 = vld [vmem:[%s7761_s2 + $0x30c] sm:$0xf]  ;;  %v439_v60 = vld [vmem:[%s7761_s2 + $0x310] sm:$0xf] }
  0x7a   :  { %v437_v59 = vld [vmem:[%s7761_s2 + $0x32c] sm:$0xf]  ;;  %436 = vst [vmem:[#allocation3 + $0x318] sm:$0xf] %v435_v58  ;;  %440 = vst [vmem:[#allocation3 + $0x320] sm:$0xf] %v439_v60 }
  0x7b   :  { %438 = vst [vmem:[#allocation3 + $0x31c] sm:$0xf] %v437_v59  ;;  %v441_v61 = vld [vmem:[%s7761_s2 + $0x330] sm:$0xf]  ;;  %v443_v62 = vld [vmem:[%s7761_s2 + $0x314] sm:$0xf] }
  0x7c   :  { %v445_v63 = vld [vmem:[%s7761_s2 + $0x334] sm:$0xf]  ;;  %442 = vst [vmem:[#allocation3 + $0x324] sm:$0xf] %v441_v61  ;;  %444 = vst [vmem:[#allocation3 + $0x328] sm:$0xf] %v443_v62 }
  0x7d   :  { %446 = vst [vmem:[#allocation3 + $0x32c] sm:$0xf] %v445_v63  ;;  %v447_v0 = vld [vmem:[%s7761_s2 + $0x318] sm:$0xf]  ;;  %v451_v2 = vld [vmem:[%s7761_s2 + $0x31c] sm:$0xf] }
  0x7e   :  { %v449_v1 = vld [vmem:[%s7761_s2 + $0x338] sm:$0xf]  ;;  %448 = vst [vmem:[#allocation3 + $0x330] sm:$0xf] %v447_v0  ;;  %452 = vst [vmem:[#allocation3 + $0x338] sm:$0xf] %v451_v2 }
  0x7f   :  { %450 = vst [vmem:[#allocation3 + $0x334] sm:$0xf] %v449_v1  ;;  %v457_v4 = vld [vmem:[%s7761_s2 + $0x360] sm:$0xf]  ;;  %v459_v5 = vld [vmem:[%s7761_s2 + $0x344] sm:$0xf] }
  0x80   :  { %454 = vst [vmem:[#allocation3 + $0x33c] sm:$0xff] %v453_v3   ;;  %458 = vst [vmem:[#allocation3 + $0x344] sm:$0xf] %v457_v4  ;;  %v461_v6 = vld [vmem:[%s7761_s2 + $0x364] sm:$0xf]  ;;  %v485_v18 = vld [vmem:[%s7761_s2 + $0x37c] sm:$0xff]  }
  0x81   :  { %460 = vst [vmem:[#allocation3 + $0x348] sm:$0xf] %v459_v5  ;;  %v463_v7 = vld [vmem:[%s7761_s2 + $0x348] sm:$0xf]  ;;  %462 = vst [vmem:[#allocation3 + $0x34c] sm:$0xf] %v461_v6 }
  0x82   :  { %v465_v8 = vld [vmem:[%s7761_s2 + $0x368] sm:$0xf]  ;;  %464 = vst [vmem:[#allocation3 + $0x350] sm:$0xf] %v463_v7  ;;  %v467_v9 = vld [vmem:[%s7761_s2 + $0x34c] sm:$0xf] }
  0x83   :  { %466 = vst [vmem:[#allocation3 + $0x354] sm:$0xf] %v465_v8  ;;  %v469_v10 = vld [vmem:[%s7761_s2 + $0x36c] sm:$0xf]  ;;  %v471_v11 = vld [vmem:[%s7761_s2 + $0x350] sm:$0xf] }
  0x84   :  { %468 = vst [vmem:[#allocation3 + $0x358] sm:$0xf] %v467_v9  ;;  %470 = vst [vmem:[#allocation3 + $0x35c] sm:$0xf] %v469_v10  ;;  %v473_v12 = vld [vmem:[%s7761_s2 + $0x370] sm:$0xf] }
  0x85   :  { %472 = vst [vmem:[#allocation3 + $0x360] sm:$0xf] %v471_v11  ;;  %v475_v13 = vld [vmem:[%s7761_s2 + $0x354] sm:$0xf]  ;;  %474 = vst [vmem:[#allocation3 + $0x364] sm:$0xf] %v473_v12 }
  0x86   :  { %v477_v14 = vld [vmem:[%s7761_s2 + $0x374] sm:$0xf]  ;;  %476 = vst [vmem:[#allocation3 + $0x368] sm:$0xf] %v475_v13  ;;  %v479_v15 = vld [vmem:[%s7761_s2 + $0x358] sm:$0xf] }
  0x87   :  { %478 = vst [vmem:[#allocation3 + $0x36c] sm:$0xf] %v477_v14  ;;  %v481_v16 = vld [vmem:[%s7761_s2 + $0x378] sm:$0xf]  ;;  %v483_v17 = vld [vmem:[%s7761_s2 + $0x35c] sm:$0xf] }
  0x88   :  { %480 = vst [vmem:[#allocation3 + $0x370] sm:$0xf] %v479_v15  ;;  %482 = vst [vmem:[#allocation3 + $0x374] sm:$0xf] %v481_v16  ;;  %v489_v19 = vld [vmem:[%s7761_s2 + $0x3a0] sm:$0xf] }
  0x89   :  { %484 = vst [vmem:[#allocation3 + $0x378] sm:$0xf] %v483_v17  ;;  %v491_v20 = vld [vmem:[%s7761_s2 + $0x384] sm:$0xf]  ;;  %486 = vst [vmem:[#allocation3 + $0x37c] sm:$0xff] %v485_v18   ;;  %v517_v33 = vld [vmem:[%s7761_s2 + $0x3bc] sm:$0xff]  }
  0x8a   :  { %490 = vst [vmem:[#allocation3 + $0x384] sm:$0xf] %v489_v19  ;;  %492 = vst [vmem:[#allocation3 + $0x388] sm:$0xf] %v491_v20  ;;  %v493_v21 = vld [vmem:[%s7761_s2 + $0x3a4] sm:$0xf] }
  0x8b   :  { %v495_v22 = vld [vmem:[%s7761_s2 + $0x388] sm:$0xf]  ;;  %494 = vst [vmem:[#allocation3 + $0x38c] sm:$0xf] %v493_v21  ;;  %v499_v24 = vld [vmem:[%s7761_s2 + $0x38c] sm:$0xf] }
  0x8c   :  { %v497_v23 = vld [vmem:[%s7761_s2 + $0x3a8] sm:$0xf]  ;;  %496 = vst [vmem:[#allocation3 + $0x390] sm:$0xf] %v495_v22  ;;  %v501_v25 = vld [vmem:[%s7761_s2 + $0x3ac] sm:$0xf] }
  0x8d   :  { %498 = vst [vmem:[#allocation3 + $0x394] sm:$0xf] %v497_v23  ;;  %v503_v26 = vld [vmem:[%s7761_s2 + $0x390] sm:$0xf]  ;;  %500 = vst [vmem:[#allocation3 + $0x398] sm:$0xf] %v499_v24 }
  0x8e   :  { %502 = vst [vmem:[#allocation3 + $0x39c] sm:$0xf] %v501_v25  ;;  %504 = vst [vmem:[#allocation3 + $0x3a0] sm:$0xf] %v503_v26  ;;  %v505_v27 = vld [vmem:[%s7761_s2 + $0x3b0] sm:$0xf] }
  0x8f   :  { %v507_v28 = vld [vmem:[%s7761_s2 + $0x394] sm:$0xf]  ;;  %506 = vst [vmem:[#allocation3 + $0x3a4] sm:$0xf] %v505_v27  ;;  %v511_v30 = vld [vmem:[%s7761_s2 + $0x398] sm:$0xf] }
  0x90   :  { %v509_v29 = vld [vmem:[%s7761_s2 + $0x3b4] sm:$0xf]  ;;  %508 = vst [vmem:[#allocation3 + $0x3a8] sm:$0xf] %v507_v28  ;;  %v513_v31 = vld [vmem:[%s7761_s2 + $0x3b8] sm:$0xf] }
  0x91   :  { %510 = vst [vmem:[#allocation3 + $0x3ac] sm:$0xf] %v509_v29  ;;  %v515_v32 = vld [vmem:[%s7761_s2 + $0x39c] sm:$0xf]  ;;  %512 = vst [vmem:[#allocation3 + $0x3b0] sm:$0xf] %v511_v30 }
  0x92   :  { %514 = vst [vmem:[#allocation3 + $0x3b4] sm:$0xf] %v513_v31  ;;  %516 = vst [vmem:[#allocation3 + $0x3b8] sm:$0xf] %v515_v32  ;;  %v521_v34 = vld [vmem:[%s7761_s2 + $0x3e0] sm:$0xf] }
  0x93   :  { %v523_v35 = vld [vmem:[%s7761_s2 + $0x3c4] sm:$0xf]  ;;  %518 = vst [vmem:[#allocation3 + $0x3bc] sm:$0xff] %v517_v33   ;;  %522 = vst [vmem:[#allocation3 + $0x3c4] sm:$0xf] %v521_v34 }
  0x94   :  { %524 = vst [vmem:[#allocation3 + $0x3c8] sm:$0xf] %v523_v35  ;;  %v525_v36 = vld [vmem:[%s7761_s2 + $0x3e4] sm:$0xf]  ;;  %v527_v37 = vld [vmem:[%s7761_s2 + $0x3c8] sm:$0xf] }
  0x95   :  { %v529_v38 = vld [vmem:[%s7761_s2 + $0x3e8] sm:$0xf]  ;;  %526 = vst [vmem:[#allocation3 + $0x3cc] sm:$0xf] %v525_v36  ;;  %528 = vst [vmem:[#allocation3 + $0x3d0] sm:$0xf] %v527_v37 }
  0x96   :  { %530 = vst [vmem:[#allocation3 + $0x3d4] sm:$0xf] %v529_v38  ;;  %v531_v39 = vld [vmem:[%s7761_s2 + $0x3cc] sm:$0xf]  ;;  %v535_v41 = vld [vmem:[%s7761_s2 + $0x3d0] sm:$0xf] }
  0x97   :  { %v533_v40 = vld [vmem:[%s7761_s2 + $0x3ec] sm:$0xf]  ;;  %532 = vst [vmem:[#allocation3 + $0x3d8] sm:$0xf] %v531_v39  ;;  %536 = vst [vmem:[#allocation3 + $0x3e0] sm:$0xf] %v535_v41 }
  0x98   :  { %534 = vst [vmem:[#allocation3 + $0x3dc] sm:$0xf] %v533_v40  ;;  %v537_v42 = vld [vmem:[%s7761_s2 + $0x3f0] sm:$0xf]  ;;  %v539_v43 = vld [vmem:[%s7761_s2 + $0x3d4] sm:$0xf] }
  0x99   :  { %v541_v44 = vld [vmem:[%s7761_s2 + $0x3f4] sm:$0xf]  ;;  %538 = vst [vmem:[#allocation3 + $0x3e4] sm:$0xf] %v537_v42  ;;  %540 = vst [vmem:[#allocation3 + $0x3e8] sm:$0xf] %v539_v43 }
  0x9a   :  { %542 = vst [vmem:[#allocation3 + $0x3ec] sm:$0xf] %v541_v44  ;;  %v543_v45 = vld [vmem:[%s7761_s2 + $0x3d8] sm:$0xf]  ;;  %v547_v47 = vld [vmem:[%s7761_s2 + $0x3dc] sm:$0xf] }
  0x9b   :  { %v545_v46 = vld [vmem:[%s7761_s2 + $0x3f8] sm:$0xf]  ;;  %544 = vst [vmem:[#allocation3 + $0x3f0] sm:$0xf] %v543_v45  ;;  %548 = vst [vmem:[#allocation3 + $0x3f8] sm:$0xf] %v547_v47 }
  0x9c   :  { %546 = vst [vmem:[#allocation3 + $0x3f4] sm:$0xf] %v545_v46  ;;  %v549_v48 = vld [vmem:[%s7761_s2 + $0x3fc] sm:$0xf] }
  0x9d   :  { %550 = vst [vmem:[#allocation3 + $0x3fc] sm:$0xf] %v549_v48 }
  0x9e   :  { %1093 = vsyncadd [#allocation4], 16384  ;;  %v1102_v49 = vld [vmem:[%s7760_s1] sm:$0xff]  ;;  %v1103_v52 = vld [vmem:[%s7760_s1 + $0x8] sm:$0xff]  ;;  %v7766_v56 = vmov 0  }
  0x9f   :  { %v1106_v50 = vld [vmem:[%s7760_s1 + $0x20] sm:$0xff]  ;;  %v1107_v53 = vld [vmem:[%s7760_s1 + $0x28] sm:$0xff]  ;;  %1584 = vmatprep.mubr.bf16.mxu0 %v7766_v56  ;;  %1657 = vmatprep.mubr.bf16.mxu1 %v7766_v56  ;;  %v1104_v48 = vld [vmem:[%s7760_s1 + $0x10] sm:$0xff] }
  0xa0   :  { %v3989_v51 = vcombine.high %v1102_v49, %v1106_v50  ;;  %v3988_v54 = vcombine.low %v1102_v49, %v1106_v50  ;;  %v1110_v55 = vld [vmem:[%s7760_s1 + $0x40] sm:$0xff]  ;;  %v3991_v57 = vcombine.high %v1103_v52, %v1107_v53  ;;  %v3990_v58 = vcombine.low %v1103_v52, %v1107_v53  ;;  %v1111_v60 = vld [vmem:[%s7760_s1 + $0x48] sm:$0xff]  ;;  %v1108_v49 = vld [vmem:[%s7760_s1 + $0x30] sm:$0xff] }
  0xa1   :  { %v1114_v59 = vld [vmem:[%s7760_s1 + $0x60] sm:$0xff]  ;;  %v1115_v61 = vld [vmem:[%s7760_s1 + $0x68] sm:$0xff]  ;;  %v1105_v50 = vld [vmem:[%s7760_s1 + $0x18] sm:$0xff] }
  0xa2   :  { %1552 = vmatprep.subr.bf16.mxu0 %v3989_v51  ;;  %v3997_v62 = vcombine.high %v1110_v55, %v1114_v59  ;;  %v3999_v63 = vcombine.high %v1111_v60, %v1115_v61  ;;  %v1118_v0 = vld [vmem:[%s7760_s1 + $0x80] sm:$0xff]  ;;  %v1119_v2 = vld [vmem:[%s7760_s1 + $0x88] sm:$0xff]  ;;  %1625 = vmatprep.subr.bf16.mxu1 %v3991_v57  ;;  %v3996_v3 = vcombine.low %v1110_v55, %v1114_v59  ;;  %v1109_v51 = vld [vmem:[%s7760_s1 + $0x38] sm:$0xff] }
  0xa3   :  { %v1122_v1 = vld [vmem:[%s7760_s1 + $0xa0] sm:$0xff]  ;;  %1553 = vmatpush1.bf16.msra.mxu0 %v3988_v54  ;;  %v1123_v4 = vld [vmem:[%s7760_s1 + $0xa8] sm:$0xff]  ;;  %1626 = vmatpush1.bf16.msra.mxu1 %v3990_v58  ;;  %v3998_v5 = vcombine.low %v1111_v60, %v1115_v61  ;;  %v3993_v54 = vcombine.high %v1104_v48, %v1108_v49  ;;  %v3995_v55 = vcombine.high %v1105_v50, %v1109_v51  ;;  %v1112_v57 = vld [vmem:[%s7760_s1 + $0x50] sm:$0xff] }
  0xa4   :  { %1554 = vmatprep.subr.bf16.mxu0 %v3997_v62  ;;  %v4005_v6 = vcombine.high %v1118_v0, %v1122_v1  ;;  %1627 = vmatprep.subr.bf16.mxu1 %v3999_v63  ;;  %v4007_v7 = vcombine.high %v1119_v2, %v1123_v4  ;;  %v1126_v8 = vld [vmem:[%s7760_s1 + $0xc0] sm:$0xff]  ;;  %v1127_v10 = vld [vmem:[%s7760_s1 + $0xc8] sm:$0xff]  ;;  %v4004_v12 = vcombine.low %v1118_v0, %v1122_v1  ;;  %v1116_v58 = vld [vmem:[%s7760_s1 + $0x70] sm:$0xff] }
  0xa5   :  { %v1130_v9 = vld [vmem:[%s7760_s1 + $0xe0] sm:$0xff]  ;;  %v1131_v11 = vld [vmem:[%s7760_s1 + $0xe8] sm:$0xff]  ;;  %v4006_v13 = vcombine.low %v1119_v2, %v1123_v4  ;;  %v1113_v60 = vld [vmem:[%s7760_s1 + $0x58] sm:$0xff]  ;;  %v3992_v62 = vcombine.low %v1104_v48, %v1108_v49  ;;  %v3994_v63 = vcombine.low %v1105_v50, %v1109_v51  ;;  %v4001_v0 = vcombine.high %v1112_v57, %v1116_v58 }
  0xa6   :  { %v4013_v14 = vcombine.high %v1126_v8, %v1130_v9  ;;  %v4015_v15 = vcombine.high %v1127_v10, %v1131_v11  ;;  %v1134_v16 = vld [vmem:[%s7760_s1 + $0x100] sm:$0xff]  ;;  %v1135_v18 = vld [vmem:[%s7760_s1 + $0x108] sm:$0xff]  ;;  %v4012_v20 = vcombine.low %v1126_v8, %v1130_v9  ;;  %v4014_v21 = vcombine.low %v1127_v10, %v1131_v11  ;;  %v1117_v61 = vld [vmem:[%s7760_s1 + $0x78] sm:$0xff] }
  0xa7   :  { %1555 = vmatpush1.bf16.msra.mxu0 %v3996_v3  ;;  %1628 = vmatpush1.bf16.msra.mxu1 %v3998_v5  ;;  %v1138_v17 = vld [vmem:[%s7760_s1 + $0x120] sm:$0xff]  ;;  %v1139_v19 = vld [vmem:[%s7760_s1 + $0x128] sm:$0xff]  ;;  %v4003_v1 = vcombine.high %v1113_v60, %v1117_v61  ;;  %v1120_v2 = vld [vmem:[%s7760_s1 + $0x90] sm:$0xff] }
  0xa8   :  { %1556 = vmatprep.subr.bf16.mxu0 %v4005_v6  ;;  %1629 = vmatprep.subr.bf16.mxu1 %v4007_v7  ;;  %v4021_v22 = vcombine.high %v1134_v16, %v1138_v17  ;;  %v4023_v23 = vcombine.high %v1135_v18, %v1139_v19  ;;  %v1142_v24 = vld [vmem:[%s7760_s1 + $0x140] sm:$0xff]  ;;  %v1143_v26 = vld [vmem:[%s7760_s1 + $0x148] sm:$0xff]  ;;  %v4020_v28 = vcombine.low %v1134_v16, %v1138_v17  ;;  %v1124_v3 = vld [vmem:[%s7760_s1 + $0xb0] sm:$0xff] }
  0xa9   :  { %v1146_v25 = vld [vmem:[%s7760_s1 + $0x160] sm:$0xff]  ;;  %v1147_v27 = vld [vmem:[%s7760_s1 + $0x168] sm:$0xff]  ;;  %v4022_v29 = vcombine.low %v1135_v18, %v1139_v19  ;;  %v1121_v4 = vld [vmem:[%s7760_s1 + $0x98] sm:$0xff]  ;;  %v4000_v6 = vcombine.low %v1112_v57, %v1116_v58  ;;  %v4002_v7 = vcombine.low %v1113_v60, %v1117_v61  ;;  %v4009_v8 = vcombine.high %v1120_v2, %v1124_v3 }
  0xaa   :  { %v4029_v30 = vcombine.high %v1142_v24, %v1146_v25  ;;  %v1150_v31 = vld [vmem:[%s7760_s1 + $0x180] sm:$0xff]  ;;  %v4031_v32 = vcombine.high %v1143_v26, %v1147_v27  ;;  %v1151_v34 = vld [vmem:[%s7760_s1 + $0x188] sm:$0xff]  ;;  %v4028_v36 = vcombine.low %v1142_v24, %v1146_v25  ;;  %v4030_v37 = vcombine.low %v1143_v26, %v1147_v27  ;;  %v1125_v5 = vld [vmem:[%s7760_s1 + $0xb8] sm:$0xff] }
  0xab   :  { %1557 = vmatpush1.bf16.msra.mxu0 %v4004_v12  ;;  %1630 = vmatpush1.bf16.msra.mxu1 %v4006_v13  ;;  %v1154_v33 = vld [vmem:[%s7760_s1 + $0x1a0] sm:$0xff]  ;;  %v1155_v35 = vld [vmem:[%s7760_s1 + $0x1a8] sm:$0xff]  ;;  %v4011_v9 = vcombine.high %v1121_v4, %v1125_v5  ;;  %v1128_v10 = vld [vmem:[%s7760_s1 + $0xd0] sm:$0xff]  ;;  %v4010_v16 = vcombine.low %v1121_v4, %v1125_v5 }
  0xac   :  { %1558 = vmatprep.subr.bf16.mxu0 %v4013_v14  ;;  %1631 = vmatprep.subr.bf16.mxu1 %v4015_v15  ;;  %v4037_v38 = vcombine.high %v1150_v31, %v1154_v33  ;;  %v1158_v39 = vld [vmem:[%s7760_s1 + $0x1c0] sm:$0xff]  ;;  %v4039_v40 = vcombine.high %v1151_v34, %v1155_v35  ;;  %v1159_v42 = vld [vmem:[%s7760_s1 + $0x1c8] sm:$0xff]  ;;  %v4036_v44 = vcombine.low %v1150_v31, %v1154_v33  ;;  %v1132_v11 = vld [vmem:[%s7760_s1 + $0xf0] sm:$0xff] }
  0xad   :  { %v1162_v41 = vld [vmem:[%s7760_s1 + $0x1e0] sm:$0xff]  ;;  %v1163_v43 = vld [vmem:[%s7760_s1 + $0x1e8] sm:$0xff]  ;;  %v4038_v45 = vcombine.low %v1151_v34, %v1155_v35  ;;  %v1129_v13 = vld [vmem:[%s7760_s1 + $0xd8] sm:$0xff]  ;;  %v4008_v15 = vcombine.low %v1120_v2, %v1124_v3  ;;  %v4017_v17 = vcombine.high %v1128_v10, %v1132_v11 }
  0xae   :  { %v4045_v46 = vcombine.high %v1158_v39, %v1162_v41  ;;  %v4047_v47 = vcombine.high %v1159_v42, %v1163_v43  ;;  %v4044_v52 = vcombine.low %v1158_v39, %v1162_v41  ;;  %v4046_v53 = vcombine.low %v1159_v42, %v1163_v43  ;;  %v5409_v59 = vld [vmem:[%s7759_s0] sm:$0xff]   ;;  %v5442_v12 = vld [vmem:[%s7759_s0 + $0x8] sm:$0xff]   ;;  %v1133_v14 = vld [vmem:[%s7760_s1 + $0xf8] sm:$0xff] }
  0xaf   :  { %1559 = vmatpush1.bf16.msra.mxu0 %v4012_v20  ;;  %1632 = vmatpush1.bf16.msra.mxu1 %v4014_v21  ;;  %v4019_v18 = vcombine.high %v1129_v13, %v1133_v14  ;;  %v1136_v19 = vld [vmem:[%s7760_s1 + $0x110] sm:$0xff]  ;;  %v1137_v21 = vld [vmem:[%s7760_s1 + $0x118] sm:$0xff]  ;;  %v4018_v24 = vcombine.low %v1129_v13, %v1133_v14 }
  0xb0   :  { %1560 = vmatprep.subr.bf16.mxu0 %v4021_v22  ;;  %1633 = vmatprep.subr.bf16.mxu1 %v4023_v23  ;;  %v1140_v20 = vld [vmem:[%s7760_s1 + $0x130] sm:$0xff]  ;;  %v1141_v22 = vld [vmem:[%s7760_s1 + $0x138] sm:$0xff]  ;;  %v4016_v23 = vcombine.low %v1128_v10, %v1132_v11 }
  0xb1   :  { %v4025_v25 = vcombine.high %v1136_v19, %v1140_v20  ;;  %v4027_v26 = vcombine.high %v1137_v21, %v1141_v22  ;;  %v1144_v27 = vld [vmem:[%s7760_s1 + $0x150] sm:$0xff]  ;;  %v1149_v31 = vld [vmem:[%s7760_s1 + $0x178] sm:$0xff]  ;;  %v4026_v33 = vcombine.low %v1137_v21, %v1141_v22 }
  0xb2   :  { %v1157_v39 = vld [vmem:[%s7760_s1 + $0x1b8] sm:$0xff] }
  0xb3   :  { %1561 = vmatpush1.bf16.msra.mxu0 %v4020_v28  ;;  %1634 = vmatpush1.bf16.msra.mxu1 %v4022_v29  ;;  %v1148_v28 = vld [vmem:[%s7760_s1 + $0x170] sm:$0xff]  ;;  %v1165_v48 = vld [vmem:[%s7760_s1 + $0x1f8] sm:$0xff] }
  0xb4   :  { %1562 = vmatprep.subr.bf16.mxu0 %v4029_v30  ;;  %1635 = vmatprep.subr.bf16.mxu1 %v4031_v32  ;;  %v4095_v29 = vld [vmem:[%s7759_s0 + $0x10] sm:$0xff]   ;;  %v1145_v30 = vld [vmem:[%s7760_s1 + $0x158] sm:$0xff]  ;;  %v4024_v32 = vcombine.low %v1136_v19, %v1140_v20  ;;  %v4033_v34 = vcombine.high %v1144_v27, %v1148_v28 }
  0xb5   :  { %v4035_v35 = vcombine.high %v1145_v30, %v1149_v31  ;;  %v4034_v41 = vcombine.low %v1145_v30, %v1149_v31 }
  0xb7   :  { %1563 = vmatpush1.bf16.msra.mxu0 %v4028_v36  ;;  %1636 = vmatpush1.bf16.msra.mxu1 %v4030_v37  ;;  %v1152_v36 = vld [vmem:[%s7760_s1 + $0x190] sm:$0xff] }
  0xb8   :  { %1564 = vmatprep.subr.bf16.mxu0 %v4037_v38  ;;  %1637 = vmatprep.subr.bf16.mxu1 %v4039_v40  ;;  %v1156_v37 = vld [vmem:[%s7760_s1 + $0x1b0] sm:$0xff]  ;;  %v1153_v38 = vld [vmem:[%s7760_s1 + $0x198] sm:$0xff]  ;;  %v4032_v40 = vcombine.low %v1144_v27, %v1148_v28 }
  0xb9   :  { %v4041_v42 = vcombine.high %v1152_v36, %v1156_v37  ;;  %v4043_v43 = vcombine.high %v1153_v38, %v1157_v39  ;;  %v4040_v49 = vcombine.low %v1152_v36, %v1156_v37  ;;  %v4042_v50 = vcombine.low %v1153_v38, %v1157_v39 }
  0xbb   :  { %1565 = vmatpush1.bf16.msra.mxu0 %v4036_v44  ;;  %1638 = vmatpush1.bf16.msra.mxu1 %v4038_v45  ;;  %v1160_v44 = vld [vmem:[%s7760_s1 + $0x1d0] sm:$0xff] }
  0xbc   :  { %1566 = vmatprep.subr.bf16.mxu0 %v4045_v46  ;;  %1639 = vmatprep.subr.bf16.mxu1 %v4047_v47  ;;  %v1164_v45 = vld [vmem:[%s7760_s1 + $0x1f0] sm:$0xff]  ;;  %v4096_v46 = vld [vmem:[%s7759_s0 + $0x18] sm:$0xff]  }
  0xbd   :  { %v1161_v47 = vld [vmem:[%s7760_s1 + $0x1d8] sm:$0xff]  ;;  %v4049_v51 = vcombine.high %v1160_v44, %v1164_v45 }
  0xbf   :  { %1567 = vmatpush1.bf16.msra.mxu0 %v4044_v52  ;;  %1640 = vmatpush1.bf16.msra.mxu1 %v4046_v53  ;;  %v4051_v52 = vcombine.high %v1161_v47, %v1165_v48  ;;  %v4048_v53 = vcombine.low %v1160_v44, %v1164_v45 }
  0xc0   :  { %1698 = vmatprep.subr.bf16.mxu0 %v3993_v54  ;;  %1771 = vmatprep.subr.bf16.mxu1 %v3995_v55  ;;  %v4050_v54 = vcombine.low %v1161_v47, %v1165_v48  ;;  %v1168_v55 = vlaneseq }
  0xc2   :  { %1585 = vmatmul.mubr.bf16.vlgmr.msra.gmra.mrb[0].mxu0 %v5409_v59  ;;  %1658 = vmatmul.mubr.bf16.vlgmr.msra.gmra.mrb[0].mxu1 %v5409_v59  ;;  %v5522_v57 = vshrl.u32 %v1168_v55, 7 }
  0xc3   :  { %1699 = vmatpush1.bf16.msra.mxu0 %v3992_v62  ;;  %1772 = vmatpush1.bf16.msra.mxu1 %v3994_v63 }
  0xc4   :  { %1700 = vmatprep.subr.bf16.mxu0 %v4001_v0  ;;  %1773 = vmatprep.subr.bf16.mxu1 %v4003_v1  ;;  %v1170_v58 = vsub.s32 0, %v5522_v57  ;;  %v1178_v60 = vsub.s32 2, %v5522_v57  ;;  %v1174_v61 = vsub.s32 1, %v5522_v57  ;;  %v1182_v62 = vsub.s32 3, %v5522_v57 }
  0xc5   :  { %1594 = vmatprep.mubr.bf16.mxu0 %v7766_v56  ;;  %1667 = vmatprep.mubr.bf16.mxu1 %v7766_v56  ;;  %v1186_v55 = vsub.s32 4, %v5522_v57 }
  0xc7   :  { %1701 = vmatpush1.bf16.msra.mxu0 %v4000_v6  ;;  %1774 = vmatpush1.bf16.msra.mxu1 %v4002_v7 }
  0xc8   :  { %1702 = vmatprep.subr.bf16.mxu0 %v4009_v8  ;;  %1775 = vmatprep.subr.bf16.mxu1 %v4011_v9 }
  0xca   :  { %1595 = vmatmul.mubr.bf16.gmra.mrb[4].mxu0 %v5442_v12  ;;  %1668 = vmatmul.mubr.bf16.gmra.mrb[4].mxu1 %v5442_v12 }
  0xcb   :  { %1703 = vmatpush1.bf16.msra.mxu0 %v4008_v15  ;;  %1776 = vmatpush1.bf16.msra.mxu1 %v4010_v16 }
  0xcc   :  { %1704 = vmatprep.subr.bf16.mxu0 %v4017_v17  ;;  %1777 = vmatprep.subr.bf16.mxu1 %v4019_v18 }
  0xcd   :  { %1604 = vmatprep.mubr.bf16.mxu0 %v7766_v56  ;;  %1677 = vmatprep.mubr.bf16.mxu1 %v7766_v56 }
  0xcf   :  { %1705 = vmatpush1.bf16.msra.mxu0 %v4016_v23  ;;  %1778 = vmatpush1.bf16.msra.mxu1 %v4018_v24 }
  0xd0   :  { %1706 = vmatprep.subr.bf16.mxu0 %v4025_v25  ;;  %1779 = vmatprep.subr.bf16.mxu1 %v4027_v26 }
  0xd2   :  { %1605 = vmatmul.mubr.bf16.gmra.mrb[8].mxu0 %v4095_v29  ;;  %1678 = vmatmul.mubr.bf16.gmra.mrb[8].mxu1 %v4095_v29 }
  0xd3   :  { %1707 = vmatpush1.bf16.msra.mxu0 %v4024_v32  ;;  %1780 = vmatpush1.bf16.msra.mxu1 %v4026_v33 }
  0xd4   :  { %1708 = vmatprep.subr.bf16.mxu0 %v4033_v34  ;;  %1781 = vmatprep.subr.bf16.mxu1 %v4035_v35 }
  0xd5   :  { %1614 = vmatprep.mubr.bf16.mxu0 %v7766_v56  ;;  %1687 = vmatprep.mubr.bf16.mxu1 %v7766_v56 }
  0xd7   :  { %1709 = vmatpush1.bf16.msra.mxu0 %v4032_v40  ;;  %1782 = vmatpush1.bf16.msra.mxu1 %v4034_v41 }
  0xd8   :  { %1710 = vmatprep.subr.bf16.mxu0 %v4041_v42  ;;  %1783 = vmatprep.subr.bf16.mxu1 %v4043_v43 }
  0xda   :  { %1615 = vmatmul.mubr.bf16.gmra.mrb[12].mxu0 %v4096_v46  ;;  %1688 = vmatmul.mubr.bf16.gmra.mrb[12].mxu1 %v4096_v46 }
  0xdb   :  { %1711 = vmatpush1.bf16.msra.mxu0 %v4040_v49  ;;  %1784 = vmatpush1.bf16.msra.mxu1 %v4042_v50 }
  0xdc   :  { %1712 = vmatprep.subr.bf16.mxu0 %v4049_v51  ;;  %1785 = vmatprep.subr.bf16.mxu1 %v4051_v52 }
  0xdd   :  { %1730 = vmatprep.mubr.bf16.mxu0 %v7766_v56  ;;  %1803 = vmatprep.mubr.bf16.mxu1 %v7766_v56 }
  0xdf   :  { %1713 = vmatpush1.bf16.msra.mxu0 %v4048_v53  ;;  %1786 = vmatpush1.bf16.msra.mxu1 %v4050_v54 }
  0xe2   :  { %1731 = vmatmul.mubr.bf16.vlgmr.msra.gmra.mrb[16].mxu0 %v5409_v59  ;;  %1804 = vmatmul.mubr.bf16.vlgmr.msra.gmra.mrb[16].mxu1 %v5409_v59  ;;  %v5528_v59 = vld [vmem:[%s7762_s3] sm:$0xff] }
  0xe3   :  { %1740 = vmatprep.mubr.bf16.mxu0 %v7766_v56  ;;  %1813 = vmatprep.mubr.bf16.mxu1 %v7766_v56  ;;  %v5534_v63 = vrot.slane %v5528_v59, %v1170_v58  ;;  %v5537_v0 = vrot.slane %v5528_v59, %v1178_v60  ;;  %v5540_v1 = vrot.slane %v5528_v59, %v1174_v61 }
  0xe4   :  { %v5543_v2 = vrot.slane %v5528_v59, %v1182_v62 }
  0xea   :  { %1741 = vmatmul.mubr.bf16.gmra.mrb[20].mxu0 %v5442_v12  ;;  %1814 = vmatmul.mubr.bf16.gmra.mrb[20].mxu1 %v5442_v12 }
  0xeb   :  { %1750 = vmatprep.mubr.bf16.mxu0 %v7766_v56  ;;  %1823 = vmatprep.mubr.bf16.mxu1 %v7766_v56 }
  0xf2   :  { %1751 = vmatmul.mubr.bf16.gmra.mrb[24].mxu0 %v4095_v29  ;;  %1824 = vmatmul.mubr.bf16.gmra.mrb[24].mxu1 %v4095_v29 }
  0xf3   :  { %1760 = vmatprep.mubr.bf16.mxu0 %v7766_v56  ;;  %1833 = vmatprep.mubr.bf16.mxu1 %v7766_v56 }
  0xfa   :  { %1761 = vmatmul.mubr.bf16.gmra.mrb[28].mxu0 %v4096_v46  ;;  %1834 = vmatmul.mubr.bf16.gmra.mrb[28].mxu1 %v4096_v46 }
 0x195   :  { %v1586_v3 = vpop.f32.mrb[0].mxu0  ;;  %v1659_v5 = vpop.f32.mrb[0].mxu1 }
 0x196   :  { %v5546_v4 = vadd.f32 %v1586_v3, %v5534_v63  ;;  %v1588_v6 = vpop.f32.mrb[1].mxu0  ;;  %v5549_v7 = vadd.f32 %v1659_v5, %v5537_v0  ;;  %v1661_v9 = vpop.f32.mrb[1].mxu1  ;;  %v1194_v3 = vsub.s32 6, %v5522_v57  ;;  %v1190_v5 = vsub.s32 5, %v5522_v57 }
 0x197   :  { %v5552_v8 = vadd.f32 %v1588_v6, %v5540_v1  ;;  %v1590_v10 = vpop.f32.mrb[2].mxu0  ;;  %v5555_v11 = vadd.f32 %v1661_v9, %v5543_v2  ;;  %v1663_v13 = vpop.f32.mrb[2].mxu1 }
 0x198   :  { %8147 = vst [vmem:[#allocation7_spill] sm:$0xff] %v5546_v4  ;;  %8148 = vst [vmem:[#allocation8_spill] sm:$0xff] %v5549_v7  ;;  %v5558_v12 = vadd.f32 %v1590_v10, %v5534_v63  ;;  %v1592_v14 = vpop.f32.mrb[3].mxu0  ;;  %v5561_v15 = vadd.f32 %v1663_v13, %v5537_v0  ;;  %v1665_v17 = vpop.f32.mrb[3].mxu1 }
 0x199   :  { %8149 = vst [vmem:[#allocation9_spill] sm:$0xff] %v5552_v8  ;;  %8150 = vst [vmem:[#allocation10_spill] sm:$0xff] %v5555_v11  ;;  %v5564_v16 = vadd.f32 %v1592_v14, %v5540_v1  ;;  %v5567_v18 = vadd.f32 %v1665_v17, %v5543_v2  ;;  %v1198_v14 = vsub.s32 7, %v5522_v57 }
 0x19a   :  { %8151 = vst [vmem:[#allocation11_spill] sm:$0xff] %v5558_v12  ;;  %8152 = vst [vmem:[#allocation12_spill] sm:$0xff] %v5561_v15 }
 0x19b   :  { %8153 = vst [vmem:[#allocation13_spill] sm:$0xff] %v5564_v16  ;;  %8154 = vst [vmem:[#allocation14_spill] sm:$0xff] %v5567_v18  ;;  %v5653_v57 = vrot.slane %v5528_v59, %v1198_v14 }
 0x19d   :  { %v1596_v19 = vpop.f32.mrb[4].mxu0  ;;  %v1669_v21 = vpop.f32.mrb[4].mxu1 }
 0x19e   :  { %v5570_v20 = vadd.f32 %v1596_v19, %v5534_v63  ;;  %v1598_v22 = vpop.f32.mrb[5].mxu0  ;;  %v5573_v23 = vadd.f32 %v1669_v21, %v5537_v0  ;;  %v1671_v25 = vpop.f32.mrb[5].mxu1 }
 0x19f   :  { %v5576_v24 = vadd.f32 %v1598_v22, %v5540_v1  ;;  %v1600_v26 = vpop.f32.mrb[6].mxu0  ;;  %v5579_v27 = vadd.f32 %v1671_v25, %v5543_v2  ;;  %v1673_v29 = vpop.f32.mrb[6].mxu1  ;;  %v1187_v25 = vrot.slane %v5528_v59, %v1186_v55 }
 0x1a0   :  { %8155 = vst [vmem:[#allocation15_spill] sm:$0xff] %v5570_v20  ;;  %8156 = vst [vmem:[#allocation16_spill] sm:$0xff] %v5573_v23  ;;  %v5582_v28 = vadd.f32 %v1600_v26, %v5534_v63  ;;  %v1602_v30 = vpop.f32.mrb[7].mxu0  ;;  %v5585_v31 = vadd.f32 %v1673_v29, %v5537_v0  ;;  %v1675_v33 = vpop.f32.mrb[7].mxu1  ;;  %v5647_v26 = vrot.slane %v5528_v59, %v1194_v3 }
 0x1a1   :  { %8157 = vst [vmem:[#allocation17_spill] sm:$0xff] %v5576_v24  ;;  %8158 = vst [vmem:[#allocation18_spill] sm:$0xff] %v5579_v27  ;;  %v5588_v32 = vadd.f32 %v1602_v30, %v5540_v1  ;;  %v5591_v34 = vadd.f32 %v1675_v33, %v5543_v2 }
 0x1a2   :  { %8159 = vst [vmem:[#allocation19_spill] sm:$0xff] %v5582_v28  ;;  %8160 = vst [vmem:[#allocation20_spill] sm:$0xff] %v5585_v31 }
 0x1a3   :  { %8161 = vst [vmem:[#allocation21_spill] sm:$0xff] %v5588_v32  ;;  %8162 = vst [vmem:[#allocation22_spill] sm:$0xff] %v5591_v34 }
 0x1a5   :  { %v1606_v35 = vpop.f32.mrb[8].mxu0  ;;  %v1679_v37 = vpop.f32.mrb[8].mxu1 }
 0x1a6   :  { %v5594_v36 = vadd.f32 %v1606_v35, %v5534_v63  ;;  %v1608_v38 = vpop.f32.mrb[9].mxu0  ;;  %v5597_v39 = vadd.f32 %v1679_v37, %v5537_v0  ;;  %v1681_v41 = vpop.f32.mrb[9].mxu1 }
 0x1a7   :  { %v5600_v40 = vadd.f32 %v1608_v38, %v5540_v1  ;;  %v1610_v42 = vpop.f32.mrb[10].mxu0  ;;  %v5603_v43 = vadd.f32 %v1681_v41, %v5543_v2  ;;  %v1683_v45 = vpop.f32.mrb[10].mxu1 }
 0x1a8   :  { %8163 = vst [vmem:[#allocation23_spill] sm:$0xff] %v5594_v36  ;;  %8164 = vst [vmem:[#allocation24_spill] sm:$0xff] %v5597_v39  ;;  %v5606_v44 = vadd.f32 %v1610_v42, %v5534_v63  ;;  %v1612_v46 = vpop.f32.mrb[11].mxu0  ;;  %v5609_v47 = vadd.f32 %v1683_v45, %v5537_v0  ;;  %v1685_v49 = vpop.f32.mrb[11].mxu1 }
 0x1a9   :  { %8165 = vst [vmem:[#allocation25_spill] sm:$0xff] %v5600_v40  ;;  %8166 = vst [vmem:[#allocation26_spill] sm:$0xff] %v5603_v43  ;;  %v5612_v48 = vadd.f32 %v1612_v46, %v5540_v1  ;;  %v5615_v50 = vadd.f32 %v1685_v49, %v5543_v2 }
 0x1aa   :  { %8167 = vst [vmem:[#allocation27_spill] sm:$0xff] %v5606_v44  ;;  %8168 = vst [vmem:[#allocation28_spill] sm:$0xff] %v5609_v47 }
 0x1ab   :  { %8169 = vst [vmem:[#allocation29_spill] sm:$0xff] %v5612_v48  ;;  %8170 = vst [vmem:[#allocation30_spill] sm:$0xff] %v5615_v50 }
 0x1ad   :  { %v1616_v51 = vpop.f32.mrb[12].mxu0  ;;  %v1689_v53 = vpop.f32.mrb[12].mxu1 }
 0x1ae   :  { %v5618_v52 = vadd.f32 %v1616_v51, %v5534_v63  ;;  %v1618_v54 = vpop.f32.mrb[13].mxu0  ;;  %v5622_v58 = vadd.f32 %v1689_v53, %v5537_v0  ;;  %v1691_v61 = vpop.f32.mrb[13].mxu1 }
 0x1af   :  { %v5625_v60 = vadd.f32 %v1618_v54, %v5540_v1  ;;  %v1620_v62 = vpop.f32.mrb[14].mxu0  ;;  %v5630_v6 = vadd.f32 %v1691_v61, %v5543_v2  ;;  %v1693_v10 = vpop.f32.mrb[14].mxu1 }
 0x1b0   :  { %8171 = vst [vmem:[#allocation31_spill] sm:$0xff] %v5618_v52  ;;  %8172 = vst [vmem:[#allocation32_spill] sm:$0xff] %v5622_v58  ;;  %v5633_v9 = vadd.f32 %v1620_v62, %v5534_v63  ;;  %v1622_v13 = vpop.f32.mrb[15].mxu0  ;;  %v5637_v17 = vadd.f32 %v1693_v10, %v5537_v0  ;;  %v1695_v21 = vpop.f32.mrb[15].mxu1  ;;  %v5650_v63 = vrot.slane %v5528_v59, %v1190_v5 }
 0x1b1   :  { %8173 = vst [vmem:[#allocation33_spill] sm:$0xff] %v5625_v60  ;;  %8174 = vst [vmem:[#allocation34_spill] sm:$0xff] %v5630_v6  ;;  %v5640_v19 = vadd.f32 %v1622_v13, %v5540_v1  ;;  %v5643_v22 = vadd.f32 %v1695_v21, %v5543_v2 }
 0x1b2   :  { %8175 = vst [vmem:[#allocation35_spill] sm:$0xff] %v5633_v9  ;;  %8176 = vst [vmem:[#allocation36_spill] sm:$0xff] %v5637_v17 }
 0x1b3   :  { %8177 = vst [vmem:[#allocation37_spill] sm:$0xff] %v5640_v19  ;;  %8178 = vst [vmem:[#allocation38_spill] sm:$0xff] %v5643_v22 }
 0x1b5   :  { %v1732_v0 = vpop.f32.mrb[16].mxu0  ;;  %v1805_v1 = vpop.f32.mrb[16].mxu1 }
 0x1b6   :  { %v5655_v29 = vadd.f32 %v1732_v0, %v1187_v25  ;;  %v1734_v30 = vpop.f32.mrb[17].mxu0  ;;  %v5658_v33 = vadd.f32 %v1805_v1, %v5647_v26  ;;  %v1807_v35 = vpop.f32.mrb[17].mxu1 }
 0x1b7   :  { %v5661_v2 = vadd.f32 %v1734_v30, %v5650_v63  ;;  %v1736_v37 = vpop.f32.mrb[18].mxu0  ;;  %v5664_v38 = vadd.f32 %v1807_v35, %v5653_v57  ;;  %v1809_v59 = vpop.f32.mrb[18].mxu1 }
 0x1b8   :  { %8179 = vst [vmem:[#allocation39_spill] sm:$0xff] %v5655_v29  ;;  %8180 = vst [vmem:[#allocation40_spill] sm:$0xff] %v5658_v33  ;;  %v5666_v41 = vadd.f32 %v1736_v37, %v1187_v25  ;;  %v1738_v42 = vpop.f32.mrb[19].mxu0  ;;  %v5669_v45 = vadd.f32 %v1809_v59, %v5647_v26  ;;  %v1811_v49 = vpop.f32.mrb[19].mxu1 }
 0x1b9   :  { %8181 = vst [vmem:[#allocation41_spill] sm:$0xff] %v5661_v2  ;;  %8182 = vst [vmem:[#allocation42_spill] sm:$0xff] %v5664_v38  ;;  %v5672_v46 = vadd.f32 %v1738_v42, %v5650_v63  ;;  %v5675_v51 = vadd.f32 %v1811_v49, %v5653_v57 }
 0x1ba   :  { %8183 = vst [vmem:[#allocation43_spill] sm:$0xff] %v5666_v41  ;;  %8184 = vst [vmem:[#allocation44_spill] sm:$0xff] %v5669_v45 }
 0x1bb   :  { %8185 = vst [vmem:[#allocation45_spill] sm:$0xff] %v5672_v46  ;;  %8186 = vst [vmem:[#allocation46_spill] sm:$0xff] %v5675_v51 }
 0x1bd   :  { %v1742_v53 = vpop.f32.mrb[20].mxu0  ;;  %v1815_v55 = vpop.f32.mrb[20].mxu1 }
 0x1be   :  { %v5677_v54 = vadd.f32 %v1742_v53, %v1187_v25  ;;  %v1744_v61 = vpop.f32.mrb[21].mxu0  ;;  %v5680_v62 = vadd.f32 %v1815_v55, %v5647_v26  ;;  %v1817_v5 = vpop.f32.mrb[21].mxu1 }
 0x1bf   :  { %v5683_v3 = vadd.f32 %v1744_v61, %v5650_v63  ;;  %v1746_v10 = vpop.f32.mrb[22].mxu0  ;;  %v5686_v13 = vadd.f32 %v1817_v5, %v5653_v57  ;;  %v1819_v21 = vpop.f32.mrb[22].mxu1 }
 0x1c0   :  { %8187 = vst [vmem:[#allocation47_spill] sm:$0xff] %v5677_v54  ;;  %8188 = vst [vmem:[#allocation48_spill] sm:$0xff] %v5680_v62  ;;  %v5688_v14 = vadd.f32 %v1746_v10, %v1187_v25  ;;  %v1748_v0 = vpop.f32.mrb[23].mxu0  ;;  %v5691_v1 = vadd.f32 %v1819_v21, %v5647_v26  ;;  %v1821_v35 = vpop.f32.mrb[23].mxu1 }
 0x1c1   :  { %8189 = vst [vmem:[#allocation49_spill] sm:$0xff] %v5683_v3  ;;  %8190 = vst [vmem:[#allocation50_spill] sm:$0xff] %v5686_v13  ;;  %v5694_v30 = vadd.f32 %v1748_v0, %v5650_v63  ;;  %v5697_v37 = vadd.f32 %v1821_v35, %v5653_v57 }
 0x1c2   :  { %8191 = vst [vmem:[#allocation51_spill] sm:$0xff] %v5688_v14  ;;  %8192 = vst [vmem:[#allocation52_spill] sm:$0xff] %v5691_v1 }
 0x1c3   :  { %8193 = vst [vmem:[#allocation53_spill] sm:$0xff] %v5694_v30  ;;  %8194 = vst [vmem:[#allocation54_spill] sm:$0xff] %v5697_v37 }
 0x1c5   :  { %v1752_v59 = vpop.f32.mrb[24].mxu0  ;;  %v1825_v49 = vpop.f32.mrb[24].mxu1 }
 0x1c6   :  { %v5699_v42 = vadd.f32 %v1752_v59, %v1187_v25  ;;  %v1754_v53 = vpop.f32.mrb[25].mxu0  ;;  %v5702_v55 = vadd.f32 %v1825_v49, %v5647_v26  ;;  %v1827_v5 = vpop.f32.mrb[25].mxu1 }
 0x1c7   :  { %v5705_v61 = vadd.f32 %v1754_v53, %v5650_v63  ;;  %v1756_v10 = vpop.f32.mrb[26].mxu0  ;;  %v5708_v21 = vadd.f32 %v1827_v5, %v5653_v57  ;;  %v1829_v35 = vpop.f32.mrb[26].mxu1 }
 0x1c8   :  { %8195 = vst [vmem:[#allocation55_spill] sm:$0xff] %v5699_v42  ;;  %8196 = vst [vmem:[#allocation56_spill] sm:$0xff] %v5702_v55  ;;  %v5710_v0 = vadd.f32 %v1756_v10, %v1187_v25  ;;  %v1758_v56 = vpop.f32.mrb[27].mxu0  ;;  %v5713_v59 = vadd.f32 %v1829_v35, %v5647_v26  ;;  %v1831_v49 = vpop.f32.mrb[27].mxu1 }
 0x1c9   :  { %8197 = vst [vmem:[#allocation57_spill] sm:$0xff] %v5705_v61  ;;  %8198 = vst [vmem:[#allocation58_spill] sm:$0xff] %v5708_v21  ;;  %v5716_v19 = vadd.f32 %v1758_v56, %v5650_v63  ;;  %v5719_v9 = vadd.f32 %v1831_v49, %v5653_v57 }
 0x1ca   :  { %8199 = vst [vmem:[#allocation59_spill] sm:$0xff] %v5710_v0  ;;  %8200 = vst [vmem:[#allocation60_spill] sm:$0xff] %v5713_v59 }
 0x1cb   :  { %8201 = vst [vmem:[#allocation61_spill] sm:$0xff] %v5716_v19  ;;  %8202 = vst [vmem:[#allocation62_spill] sm:$0xff] %v5719_v9 }
 0x1cd   :  { %v1762_v53 = vpop.f32.mrb[28].mxu0  ;;  %v1835_v17 = vpop.f32.mrb[28].mxu1 }
 0x1ce   :  { %v5721_v22 = vadd.f32 %v1762_v53, %v1187_v25  ;;  %v1764_v5 = vpop.f32.mrb[29].mxu0  ;;  %v5724_v10 = vadd.f32 %v1835_v17, %v5647_v26  ;;  %v1837_v35 = vpop.f32.mrb[29].mxu1 }
 0x1cf   :  { %v5727_v60 = vadd.f32 %v1764_v5, %v5650_v63  ;;  %v1766_v52 = vpop.f32.mrb[30].mxu0  ;;  %v5730_v56 = vadd.f32 %v1837_v35, %v5653_v57  ;;  %v1839_v49 = vpop.f32.mrb[30].mxu1 }
 0x1d0   :  { %8203 = vst [vmem:[#allocation63_spill] sm:$0xff] %v5721_v22  ;;  %8204 = vst [vmem:[#allocation64_spill] sm:$0xff] %v5724_v10  ;;  %v5732_v6 = vadd.f32 %v1766_v52, %v1187_v25  ;;  %v1768_v58 = vpop.f32.mrb[31].mxu0  ;;  %v5735_v53 = vadd.f32 %v1839_v49, %v5647_v26  ;;  %v1841_v17 = vpop.f32.mrb[31].mxu1 }
 0x1d1   :  { %8205 = vst [vmem:[#allocation65_spill] sm:$0xff] %v5727_v60  ;;  %8206 = vst [vmem:[#allocation66_spill] sm:$0xff] %v5730_v56  ;;  %v5738_v22 = vadd.f32 %v1768_v58, %v5650_v63  ;;  %v5741_v10 = vadd.f32 %v1841_v17, %v5653_v57 }
 0x1d2   :  { %8207 = vst [vmem:[#allocation67_spill] sm:$0xff] %v5732_v6  ;;  %8208 = vst [vmem:[#allocation68_spill] sm:$0xff] %v5735_v53 }
 0x1d3   :  { %8209 = vst [vmem:[#allocation69_spill] sm:$0xff] %v5738_v22  ;;  %8210 = vst [vmem:[#allocation70_spill] sm:$0xff] %v5741_v10 }
 0x1d4   :  { %4529 = dma.done.wait [#allocation4], 16384 }
 0x1d5   :  { %4530 = vsyncadd [#allocation4], 4294950912  ;;  %v8211_v5 = vmov 0   ;;  %v5745_v52 = vld [vmem:[#allocation3 + $0x18] sm:$0xff]  ;;  %v5747_v25 = vld [vmem:[#allocation3 + $0x10] sm:$0xff] }
 0x1d6   :  { %2121 = vmatprep.mubr.bf16.mxu1 %v8211_v5  ;;  %2080 = vmatprep.mubr.bf16.mxu0 %v8211_v5  ;;  %v5749_v35 = vld [vmem:[#allocation3 + $0x58] sm:$0xff]  ;;  %v5752_v58 = vld [vmem:[#allocation3 + $0x8] sm:$0xff]  ;;  %v5754_v26 = vld [vmem:[#allocation3] sm:$0xff] }
 0x1d7   :  { %2089 = vmatprep.subr.bf16.mxu1 %v5745_v52  ;;  %2048 = vmatprep.subr.bf16.mxu0 %v5752_v58  ;;  %v5758_v63 = vld [vmem:[#allocation3 + $0x48] sm:$0xff]  ;;  %v5761_v57 = vld [vmem:[#allocation3 + $0x50] sm:$0xff]  ;;  %v5764_v49 = vld [vmem:[#allocation3 + $0x98] sm:$0xff] }
 0x1d8   :  { %2090 = vmatpush1.bf16.msra.mxu1 %v5747_v25  ;;  %2049 = vmatpush1.bf16.msra.mxu0 %v5754_v26  ;;  %v5767_v17 = vld [vmem:[#allocation3 + $0x40] sm:$0xff]  ;;  %v5769_v22 = vld [vmem:[#allocation3 + $0x88] sm:$0xff]  ;;  %v5773_v10 = vld [vmem:[#allocation3 + $0x90] sm:$0xff] }
 0x1d9   :  { %2091 = vmatprep.subr.bf16.mxu1 %v5749_v35  ;;  %2050 = vmatprep.subr.bf16.mxu0 %v5758_v63  ;;  %v5776_v6 = vld [vmem:[#allocation3 + $0xd8] sm:$0xff]  ;;  %v5779_v53 = vld [vmem:[#allocation3 + $0x80] sm:$0xff]  ;;  %v5781_v60 = vld [vmem:[#allocation3 + $0xc8] sm:$0xff] }
 0x1da   :  { %v5785_v56 = vld [vmem:[#allocation3 + $0xd0] sm:$0xff]  ;;  %v5788_v19 = vld [vmem:[#allocation3 + $0x118] sm:$0xff]  ;;  %v5791_v9 = vld [vmem:[#allocation3 + $0xc0] sm:$0xff] }
 0x1db   :  { %v5793_v0 = vld [vmem:[#allocation3 + $0x108] sm:$0xff]  ;;  %v5797_v59 = vld [vmem:[#allocation3 + $0x110] sm:$0xff]  ;;  %v5800_v48 = vld [vmem:[#allocation3 + $0x158] sm:$0xff] }
 0x1dc   :  { %2092 = vmatpush1.bf16.msra.mxu1 %v5761_v57  ;;  %2051 = vmatpush1.bf16.msra.mxu0 %v5767_v17  ;;  %v5803_v44 = vld [vmem:[#allocation3 + $0x100] sm:$0xff]  ;;  %v5805_v50 = vld [vmem:[#allocation3 + $0x148] sm:$0xff]  ;;  %v5809_v47 = vld [vmem:[#allocation3 + $0x150] sm:$0xff] }
 0x1dd   :  { %2093 = vmatprep.subr.bf16.mxu1 %v5764_v49  ;;  %2052 = vmatprep.subr.bf16.mxu0 %v5769_v22  ;;  %v5812_v61 = vld [vmem:[#allocation3 + $0x198] sm:$0xff]  ;;  %v5815_v21 = vld [vmem:[#allocation3 + $0x140] sm:$0xff]  ;;  %v5817_v42 = vld [vmem:[#allocation3 + $0x188] sm:$0xff] }
 0x1de   :  { %v5821_v55 = vld [vmem:[#allocation3 + $0x190] sm:$0xff]  ;;  %v5824_v40 = vld [vmem:[#allocation3 + $0x1d8] sm:$0xff]  ;;  %v5827_v36 = vld [vmem:[#allocation3 + $0x180] sm:$0xff] }
 0x1df   :  { %v5829_v43 = vld [vmem:[#allocation3 + $0x1c8] sm:$0xff]  ;;  %v5833_v39 = vld [vmem:[#allocation3 + $0x1d0] sm:$0xff]  ;;  %v5836_v30 = vld [vmem:[#allocation3 + $0x218] sm:$0xff] }
 0x1e0   :  { %2094 = vmatpush1.bf16.msra.mxu1 %v5773_v10  ;;  %2053 = vmatpush1.bf16.msra.mxu0 %v5779_v53  ;;  %8212 = vst [vmem:[#allocation71_spill] sm:$0xff] %v5836_v30  ;;  %v5839_v37 = vld [vmem:[#allocation3 + $0x1c0] sm:$0xff]  ;;  %v5841_v14 = vld [vmem:[#allocation3 + $0x208] sm:$0xff]  ;;  %v5845_v1 = vld [vmem:[#allocation3 + $0x210] sm:$0xff] }
 0x1e1   :  { %2095 = vmatprep.subr.bf16.mxu1 %v5776_v6  ;;  %2054 = vmatprep.subr.bf16.mxu0 %v5781_v60  ;;  %8213 = vst [vmem:[#allocation72_spill] sm:$0xff] %v5845_v1  ;;  %v5848_v32 = vld [vmem:[#allocation3 + $0x258] sm:$0xff]  ;;  %v5851_v28 = vld [vmem:[#allocation3 + $0x200] sm:$0xff]  ;;  %v5853_v34 = vld [vmem:[#allocation3 + $0x248] sm:$0xff] }
 0x1e2   :  { %8214 = vst [vmem:[#allocation73_spill] sm:$0xff] %v5848_v32  ;;  %8215 = vst [vmem:[#allocation74_spill] sm:$0xff] %v5851_v28  ;;  %v5857_v31 = vld [vmem:[#allocation3 + $0x250] sm:$0xff]  ;;  %v5860_v3 = vld [vmem:[#allocation3 + $0x298] sm:$0xff] }
 0x1e3   :  { %8216 = vst [vmem:[#allocation75_spill] sm:$0xff] %v5853_v34  ;;  %8217 = vst [vmem:[#allocation76_spill] sm:$0xff] %v5857_v31  ;;  %v5863_v13 = vld [vmem:[#allocation3 + $0x240] sm:$0xff]  ;;  %v5865_v54 = vld [vmem:[#allocation3 + $0x288] sm:$0xff] }
 0x1e4   :  { %2096 = vmatpush1.bf16.msra.mxu1 %v5785_v56  ;;  %2055 = vmatpush1.bf16.msra.mxu0 %v5791_v9  ;;  %8218 = vst [vmem:[#allocation77_spill] sm:$0xff] %v5860_v3  ;;  %8219 = vst [vmem:[#allocation78_spill] sm:$0xff] %v5863_v13  ;;  %v5869_v62 = vld [vmem:[#allocation3 + $0x290] sm:$0xff]  ;;  %v5872_v24 = vld [vmem:[#allocation3 + $0x2d8] sm:$0xff] }
 0x1e5   :  { %2097 = vmatprep.subr.bf16.mxu1 %v5788_v19  ;;  %2056 = vmatprep.subr.bf16.mxu0 %v5793_v0  ;;  %8220 = vst [vmem:[#allocation79_spill] sm:$0xff] %v5865_v54  ;;  %8221 = vst [vmem:[#allocation80_spill] sm:$0xff] %v5869_v62  ;;  %v5875_v20 = vld [vmem:[#allocation3 + $0x280] sm:$0xff]  ;;  %v5877_v27 = vld [vmem:[#allocation3 + $0x2d0] sm:$0xff] }
 0x1e6   :  { %8222 = vst [vmem:[#allocation81_spill] sm:$0xff] %v5872_v24  ;;  %8223 = vst [vmem:[#allocation82_spill] sm:$0xff] %v5875_v20  ;;  %v5879_v23 = vld [vmem:[#allocation3 + $0x2c8] sm:$0xff]  ;;  %v5882_v46 = vld [vmem:[#allocation3 + $0x318] sm:$0xff] }
 0x1e7   :  { %8224 = vst [vmem:[#allocation83_spill] sm:$0xff] %v5877_v27  ;;  %8225 = vst [vmem:[#allocation84_spill] sm:$0xff] %v5879_v23  ;;  %v5884_v51 = vld [vmem:[#allocation3 + $0x2c0] sm:$0xff]  ;;  %v5888_v41 = vld [vmem:[#allocation3 + $0x308] sm:$0xff] }
 0x1e8   :  { %2098 = vmatpush1.bf16.msra.mxu1 %v5797_v59  ;;  %2057 = vmatpush1.bf16.msra.mxu0 %v5803_v44  ;;  %8226 = vst [vmem:[#allocation85_spill] sm:$0xff] %v5882_v46  ;;  %8227 = vst [vmem:[#allocation86_spill] sm:$0xff] %v5884_v51  ;;  %v5891_v45 = vld [vmem:[#allocation3 + $0x310] sm:$0xff]  ;;  %v5894_v16 = vld [vmem:[#allocation3 + $0x358] sm:$0xff] }
 0x1e9   :  { %2099 = vmatprep.subr.bf16.mxu1 %v5800_v48  ;;  %2058 = vmatprep.subr.bf16.mxu0 %v5805_v50  ;;  %8228 = vst [vmem:[#allocation87_spill] sm:$0xff] %v5888_v41  ;;  %8229 = vst [vmem:[#allocation88_spill] sm:$0xff] %v5891_v45  ;;  %v5896_v12 = vld [vmem:[#allocation3 + $0x300] sm:$0xff]  ;;  %v5900_v18 = vld [vmem:[#allocation3 + $0x348] sm:$0xff] }
 0x1ea   :  { %8230 = vst [vmem:[#allocation89_spill] sm:$0xff] %v5894_v16  ;;  %8231 = vst [vmem:[#allocation90_spill] sm:$0xff] %v5896_v12  ;;  %v5903_v15 = vld [vmem:[#allocation3 + $0x350] sm:$0xff]  ;;  %v5906_v2 = vld [vmem:[#allocation3 + $0x398] sm:$0xff] }
 0x1eb   :  { %8232 = vst [vmem:[#allocation91_spill] sm:$0xff] %v5900_v18  ;;  %8233 = vst [vmem:[#allocation92_spill] sm:$0xff] %v5903_v15  ;;  %v5908_v29 = vld [vmem:[#allocation3 + $0x340] sm:$0xff]  ;;  %v5913_v38 = vld [vmem:[#allocation3 + $0x388] sm:$0xff] }
 0x1ec   :  { %2100 = vmatpush1.bf16.msra.mxu1 %v5809_v47  ;;  %2059 = vmatpush1.bf16.msra.mxu0 %v5815_v21  ;;  %8234 = vst [vmem:[#allocation93_spill] sm:$0xff] %v5906_v2  ;;  %8235 = vst [vmem:[#allocation94_spill] sm:$0xff] %v5908_v29  ;;  %v5917_v33 = vld [vmem:[#allocation3 + $0x390] sm:$0xff]  ;;  %v5920_v8 = vld [vmem:[#allocation3 + $0x3d8] sm:$0xff] }
 0x1ed   :  { %2101 = vmatprep.subr.bf16.mxu1 %v5812_v61  ;;  %2060 = vmatprep.subr.bf16.mxu0 %v5817_v42  ;;  %8236 = vst [vmem:[#allocation95_spill] sm:$0xff] %v5913_v38  ;;  %8237 = vst [vmem:[#allocation96_spill] sm:$0xff] %v5917_v33  ;;  %v5923_v4 = vld [vmem:[#allocation3 + $0x380] sm:$0xff]  ;;  %v5925_v11 = vld [vmem:[#allocation3 + $0x3c8] sm:$0xff] }
 0x1ee   :  { %8238 = vst [vmem:[#allocation97_spill] sm:$0xff] %v5920_v8  ;;  %8239 = vst [vmem:[#allocation98_spill] sm:$0xff] %v5923_v4  ;;  %v5929_v7 = vld [vmem:[#allocation3 + $0x3d0] sm:$0xff] }
 0x1ef   :  { %8240 = vst [vmem:[#allocation99_spill] sm:$0xff] %v5925_v11  ;;  %8241 = vst [vmem:[#allocation100_spill] sm:$0xff] %v5929_v7 }
 0x1f0   :  { %2102 = vmatpush1.bf16.msra.mxu1 %v5821_v55  ;;  %2061 = vmatpush1.bf16.msra.mxu0 %v5827_v36 }
 0x1f1   :  { %2103 = vmatprep.subr.bf16.mxu1 %v5824_v40  ;;  %2062 = vmatprep.subr.bf16.mxu0 %v5829_v43 }
 0x1f4   :  { %2104 = vmatpush1.bf16.msra.mxu1 %v5833_v39  ;;  %2063 = vmatpush1.bf16.msra.mxu0 %v5839_v37 }
 0x1f5   :  { %2105 = vmatprep.subr.bf16.mxu1 %v5836_v30  ;;  %2064 = vmatprep.subr.bf16.mxu0 %v5841_v14 }
 0x1f8   :  { %2106 = vmatpush1.bf16.msra.mxu1 %v5845_v1  ;;  %2065 = vmatpush1.bf16.msra.mxu0 %v5851_v28 }
 0x1f9   :  { %2107 = vmatprep.subr.bf16.mxu1 %v5848_v32  ;;  %2066 = vmatprep.subr.bf16.mxu0 %v5853_v34 }
 0x1fc   :  { %2108 = vmatpush1.bf16.msra.mxu1 %v5857_v31  ;;  %2067 = vmatpush1.bf16.msra.mxu0 %v5863_v13 }
 0x1fd   :  { %2109 = vmatprep.subr.bf16.mxu1 %v5860_v3  ;;  %2068 = vmatprep.subr.bf16.mxu0 %v5865_v54 }
 0x200   :  { %2110 = vmatpush1.bf16.msra.mxu1 %v5869_v62  ;;  %2069 = vmatpush1.bf16.msra.mxu0 %v5875_v20 }
 0x201   :  { %2111 = vmatprep.subr.bf16.mxu1 %v5872_v24  ;;  %2070 = vmatprep.subr.bf16.mxu0 %v5879_v23 }
 0x204   :  { %2112 = vmatpush1.bf16.msra.mxu1 %v5877_v27  ;;  %2071 = vmatpush1.bf16.msra.mxu0 %v5884_v51 }
 0x205   :  { %2113 = vmatprep.subr.bf16.mxu1 %v5882_v46  ;;  %2072 = vmatprep.subr.bf16.mxu0 %v5888_v41 }
 0x208   :  { %2114 = vmatpush1.bf16.msra.mxu1 %v5891_v45  ;;  %2073 = vmatpush1.bf16.msra.mxu0 %v5896_v12 }
 0x209   :  { %2115 = vmatprep.subr.bf16.mxu1 %v5894_v16  ;;  %2074 = vmatprep.subr.bf16.mxu0 %v5900_v18 }
 0x20c   :  { %2116 = vmatpush1.bf16.msra.mxu1 %v5903_v15  ;;  %2075 = vmatpush1.bf16.msra.mxu0 %v5908_v29  ;;  %v5935_v29 = vld [vmem:[#allocation3 + $0x3c0] sm:$0xff]  ;;  %v5937_v15 = vld [vmem:[#allocation3 + $0x28] sm:$0xff] }
 0x20d   :  { %2117 = vmatprep.subr.bf16.mxu1 %v5906_v2  ;;  %2076 = vmatprep.subr.bf16.mxu0 %v5913_v38  ;;  %v5932_v2 = vld [vmem:[#allocation3 + $0x38] sm:$0xff]  ;;  %8243 = vst [vmem:[#allocation102_spill] sm:$0xff] %v5935_v29  ;;  %8244 = vst [vmem:[#allocation103_spill] sm:$0xff] %v5937_v15  ;;  %v5941_v38 = vld [vmem:[#allocation3 + $0x30] sm:$0xff] }
 0x20e   :  { %8242 = vst [vmem:[#allocation101_spill] sm:$0xff] %v5932_v2  ;;  %8245 = vst [vmem:[#allocation104_spill] sm:$0xff] %v5941_v38 }
 0x210   :  { %2118 = vmatpush1.bf16.msra.mxu1 %v5917_v33  ;;  %2077 = vmatpush1.bf16.msra.mxu0 %v5923_v4  ;;  %v5947_v4 = vld [vmem:[#allocation3 + $0x20] sm:$0xff]  ;;  %v5981_v33 = vld [vmem:[#allocation3 + $0xf0] sm:$0xff] }
 0x211   :  { %2119 = vmatprep.subr.bf16.mxu1 %v5920_v8  ;;  %2078 = vmatprep.subr.bf16.mxu0 %v5925_v11  ;;  %v5944_v8 = vld [vmem:[#allocation3 + $0x78] sm:$0xff]  ;;  %8247 = vst [vmem:[#allocation106_spill] sm:$0xff] %v5947_v4  ;;  %v5950_v11 = vld [vmem:[#allocation3 + $0x68] sm:$0xff]  ;;  %8257 = vst [vmem:[#allocation116_spill] sm:$0xff] %v5981_v33 }
 0x212   :  { %8246 = vst [vmem:[#allocation105_spill] sm:$0xff] %v5944_v8  ;;  %8248 = vst [vmem:[#allocation107_spill] sm:$0xff] %v5950_v11 }
 0x214   :  { %2120 = vmatpush1.bf16.msra.mxu1 %v5929_v7  ;;  %2079 = vmatpush1.bf16.msra.mxu0 %v5935_v29  ;;  %v5958_v29 = vld [vmem:[#allocation3 + $0xb8] sm:$0xff]  ;;  %v5964_v7 = vld [vmem:[#allocation3 + $0xa8] sm:$0xff] }
 0x215   :  { %2171 = vmatprep.subr.bf16.mxu1 %v5932_v2  ;;  %2130 = vmatprep.subr.bf16.mxu0 %v5937_v15  ;;  %v5955_v2 = vld [vmem:[#allocation3 + $0x70] sm:$0xff]  ;;  %8250 = vst [vmem:[#allocation109_spill] sm:$0xff] %v5958_v29  ;;  %v5961_v15 = vld [vmem:[#allocation3 + $0x60] sm:$0xff]  ;;  %8252 = vst [vmem:[#allocation111_spill] sm:$0xff] %v5964_v7 }
 0x216   :  { %8249 = vst [vmem:[#allocation108_spill] sm:$0xff] %v5955_v2  ;;  %8251 = vst [vmem:[#allocation110_spill] sm:$0xff] %v5961_v15 }
 0x217   :  { %2122 = vmatmul.mubr.bf16.vlgmr.msra.gmra.mrb[32].mxu1 %v8211_v5  ;;  %2081 = vmatmul.mubr.bf16.vlgmr.msra.gmra.mrb[32].mxu0 %v8211_v5 }
 0x218   :  { %2172 = vmatpush1.bf16.msra.mxu1 %v5941_v38  ;;  %2131 = vmatpush1.bf16.msra.mxu0 %v5947_v4  ;;  %v5972_v38 = vld [vmem:[#allocation3 + $0xf8] sm:$0xff]  ;;  %v5977_v4 = vld [vmem:[#allocation3 + $0xe8] sm:$0xff] }
 0x219   :  { %2173 = vmatprep.subr.bf16.mxu1 %v5944_v8  ;;  %2132 = vmatprep.subr.bf16.mxu0 %v5950_v11  ;;  %v5969_v8 = vld [vmem:[#allocation3 + $0xb0] sm:$0xff]  ;;  %8254 = vst [vmem:[#allocation113_spill] sm:$0xff] %v5972_v38  ;;  %v5975_v11 = vld [vmem:[#allocation3 + $0xa0] sm:$0xff]  ;;  %8256 = vst [vmem:[#allocation115_spill] sm:$0xff] %v5977_v4 }
 0x21a   :  { %2203 = vmatprep.mubr.bf16.mxu1 %v8211_v5  ;;  %2162 = vmatprep.mubr.bf16.mxu0 %v8211_v5  ;;  %8253 = vst [vmem:[#allocation112_spill] sm:$0xff] %v5969_v8  ;;  %8255 = vst [vmem:[#allocation114_spill] sm:$0xff] %v5975_v11 }
 0x21c   :  { %2174 = vmatpush1.bf16.msra.mxu1 %v5955_v2  ;;  %2133 = vmatpush1.bf16.msra.mxu0 %v5961_v15  ;;  %v5987_v2 = vld [vmem:[#allocation3 + $0xe0] sm:$0xff]  ;;  %v5989_v15 = vld [vmem:[#allocation3 + $0x128] sm:$0xff] }
 0x21d   :  { %2175 = vmatprep.subr.bf16.mxu1 %v5958_v29  ;;  %2134 = vmatprep.subr.bf16.mxu0 %v5964_v7  ;;  %v5984_v29 = vld [vmem:[#allocation3 + $0x138] sm:$0xff]  ;;  %8259 = vst [vmem:[#allocation118_spill] sm:$0xff] %v5987_v2  ;;  %8260 = vst [vmem:[#allocation119_spill] sm:$0xff] %v5989_v15  ;;  %v5993_v7 = vld [vmem:[#allocation3 + $0x130] sm:$0xff] }
 0x21e   :  { %8258 = vst [vmem:[#allocation117_spill] sm:$0xff] %v5984_v29  ;;  %8261 = vst [vmem:[#allocation120_spill] sm:$0xff] %v5993_v7 }
 0x220   :  { %2176 = vmatpush1.bf16.msra.mxu1 %v5969_v8  ;;  %2135 = vmatpush1.bf16.msra.mxu0 %v5975_v11  ;;  %v5999_v8 = vld [vmem:[#allocation3 + $0x120] sm:$0xff]  ;;  %v6001_v11 = vld [vmem:[#allocation3 + $0x168] sm:$0xff] }
 0x221   :  { %2177 = vmatprep.subr.bf16.mxu1 %v5972_v38  ;;  %2136 = vmatprep.subr.bf16.mxu0 %v5977_v4  ;;  %v5996_v38 = vld [vmem:[#allocation3 + $0x178] sm:$0xff]  ;;  %8263 = vst [vmem:[#allocation122_spill] sm:$0xff] %v5999_v8  ;;  %8264 = vst [vmem:[#allocation123_spill] sm:$0xff] %v6001_v11  ;;  %v6005_v4 = vld [vmem:[#allocation3 + $0x170] sm:$0xff] }
 0x222   :  { %8262 = vst [vmem:[#allocation121_spill] sm:$0xff] %v5996_v38  ;;  %8265 = vst [vmem:[#allocation124_spill] sm:$0xff] %v6005_v4 }
 0x224   :  { %2178 = vmatpush1.bf16.msra.mxu1 %v5981_v33  ;;  %2137 = vmatpush1.bf16.msra.mxu0 %v5987_v2  ;;  %v6011_v33 = vld [vmem:[#allocation3 + $0x160] sm:$0xff]  ;;  %v6013_v2 = vld [vmem:[#allocation3 + $0x1a8] sm:$0xff] }
 0x225   :  { %2179 = vmatprep.subr.bf16.mxu1 %v5984_v29  ;;  %2138 = vmatprep.subr.bf16.mxu0 %v5989_v15  ;;  %v6008_v29 = vld [vmem:[#allocation3 + $0x1b8] sm:$0xff]  ;;  %8267 = vst [vmem:[#allocation126_spill] sm:$0xff] %v6011_v33  ;;  %8268 = vst [vmem:[#allocation127_spill] sm:$0xff] %v6013_v2  ;;  %v6017_v15 = vld [vmem:[#allocation3 + $0x1b0] sm:$0xff] }
 0x226   :  { %8266 = vst [vmem:[#allocation125_spill] sm:$0xff] %v6008_v29  ;;  %8269 = vst [vmem:[#allocation128_spill] sm:$0xff] %v6017_v15 }
 0x228   :  { %2180 = vmatpush1.bf16.msra.mxu1 %v5993_v7  ;;  %2139 = vmatpush1.bf16.msra.mxu0 %v5999_v8  ;;  %v6023_v7 = vld [vmem:[#allocation3 + $0x1a0] sm:$0xff]  ;;  %v6025_v8 = vld [vmem:[#allocation3 + $0x1e8] sm:$0xff] }
 0x229   :  { %2181 = vmatprep.subr.bf16.mxu1 %v5996_v38  ;;  %2140 = vmatprep.subr.bf16.mxu0 %v6001_v11  ;;  %v6020_v38 = vld [vmem:[#allocation3 + $0x1f8] sm:$0xff]  ;;  %8271 = vst [vmem:[#allocation130_spill] sm:$0xff] %v6023_v7  ;;  %8272 = vst [vmem:[#allocation131_spill] sm:$0xff] %v6025_v8  ;;  %v6029_v11 = vld [vmem:[#allocation3 + $0x1f0] sm:$0xff] }
 0x22a   :  { %8270 = vst [vmem:[#allocation129_spill] sm:$0xff] %v6020_v38  ;;  %8273 = vst [vmem:[#allocation132_spill] sm:$0xff] %v6029_v11 }
 0x22c   :  { %2182 = vmatpush1.bf16.msra.mxu1 %v6005_v4  ;;  %2141 = vmatpush1.bf16.msra.mxu0 %v6011_v33  ;;  %v6035_v4 = vld [vmem:[#allocation3 + $0x1e0] sm:$0xff]  ;;  %v6037_v33 = vld [vmem:[#allocation3 + $0x228] sm:$0xff] }
 0x22d   :  { %2183 = vmatprep.subr.bf16.mxu1 %v6008_v29  ;;  %2142 = vmatprep.subr.bf16.mxu0 %v6013_v2  ;;  %v6032_v29 = vld [vmem:[#allocation3 + $0x238] sm:$0xff]  ;;  %8275 = vst [vmem:[#allocation134_spill] sm:$0xff] %v6035_v4  ;;  %8276 = vst [vmem:[#allocation135_spill] sm:$0xff] %v6037_v33  ;;  %v6041_v2 = vld [vmem:[#allocation3 + $0x230] sm:$0xff] }
 0x22e   :  { %8274 = vst [vmem:[#allocation133_spill] sm:$0xff] %v6032_v29  ;;  %8277 = vst [vmem:[#allocation136_spill] sm:$0xff] %v6041_v2 }
 0x230   :  { %2184 = vmatpush1.bf16.msra.mxu1 %v6017_v15  ;;  %2143 = vmatpush1.bf16.msra.mxu0 %v6023_v7  ;;  %v6047_v15 = vld [vmem:[#allocation3 + $0x220] sm:$0xff]  ;;  %v6049_v7 = vld [vmem:[#allocation3 + $0x268] sm:$0xff] }
 0x231   :  { %2185 = vmatprep.subr.bf16.mxu1 %v6020_v38  ;;  %2144 = vmatprep.subr.bf16.mxu0 %v6025_v8  ;;  %v6044_v38 = vld [vmem:[#allocation3 + $0x278] sm:$0xff]  ;;  %8279 = vst [vmem:[#allocation138_spill] sm:$0xff] %v6047_v15  ;;  %8280 = vst [vmem:[#allocation139_spill] sm:$0xff] %v6049_v7  ;;  %v6053_v8 = vld [vmem:[#allocation3 + $0x270] sm:$0xff] }
 0x232   :  { %8278 = vst [vmem:[#allocation137_spill] sm:$0xff] %v6044_v38  ;;  %8281 = vst [vmem:[#allocation140_spill] sm:$0xff] %v6053_v8 }
 0x234   :  { %2186 = vmatpush1.bf16.msra.mxu1 %v6029_v11  ;;  %2145 = vmatpush1.bf16.msra.mxu0 %v6035_v4  ;;  %v6059_v11 = vld [vmem:[#allocation3 + $0x260] sm:$0xff]  ;;  %v6061_v4 = vld [vmem:[#allocation3 + $0x2a8] sm:$0xff] }
 0x235   :  { %2187 = vmatprep.subr.bf16.mxu1 %v6032_v29  ;;  %2146 = vmatprep.subr.bf16.mxu0 %v6037_v33  ;;  %v6056_v29 = vld [vmem:[#allocation3 + $0x2b8] sm:$0xff]  ;;  %8283 = vst [vmem:[#allocation142_spill] sm:$0xff] %v6059_v11  ;;  %8284 = vst [vmem:[#allocation143_spill] sm:$0xff] %v6061_v4  ;;  %v6065_v33 = vld [vmem:[#allocation3 + $0x2b0] sm:$0xff] }
 0x236   :  { %8282 = vst [vmem:[#allocation141_spill] sm:$0xff] %v6056_v29  ;;  %8285 = vst [vmem:[#allocation144_spill] sm:$0xff] %v6065_v33 }
 0x238   :  { %2188 = vmatpush1.bf16.msra.mxu1 %v6041_v2  ;;  %2147 = vmatpush1.bf16.msra.mxu0 %v6047_v15  ;;  %v6071_v2 = vld [vmem:[#allocation3 + $0x2a0] sm:$0xff]  ;;  %v6073_v15 = vld [vmem:[#allocation3 + $0x2e8] sm:$0xff] }
 0x239   :  { %2189 = vmatprep.subr.bf16.mxu1 %v6044_v38  ;;  %2148 = vmatprep.subr.bf16.mxu0 %v6049_v7  ;;  %v6068_v38 = vld [vmem:[#allocation3 + $0x2f8] sm:$0xff]  ;;  %8287 = vst [vmem:[#allocation146_spill] sm:$0xff] %v6071_v2  ;;  %8288 = vst [vmem:[#allocation147_spill] sm:$0xff] %v6073_v15  ;;  %v6077_v7 = vld [vmem:[#allocation3 + $0x2f0] sm:$0xff] }
 0x23a   :  { %8286 = vst [vmem:[#allocation145_spill] sm:$0xff] %v6068_v38  ;;  %8289 = vst [vmem:[#allocation148_spill] sm:$0xff] %v6077_v7 }
 0x23c   :  { %2190 = vmatpush1.bf16.msra.mxu1 %v6053_v8  ;;  %2149 = vmatpush1.bf16.msra.mxu0 %v6059_v11  ;;  %v6083_v8 = vld [vmem:[#allocation3 + $0x2e0] sm:$0xff]  ;;  %v6085_v11 = vld [vmem:[#allocation3 + $0x328] sm:$0xff] }
 0x23d   :  { %2191 = vmatprep.subr.bf16.mxu1 %v6056_v29  ;;  %2150 = vmatprep.subr.bf16.mxu0 %v6061_v4  ;;  %v6080_v29 = vld [vmem:[#allocation3 + $0x338] sm:$0xff]  ;;  %8291 = vst [vmem:[#allocation150_spill] sm:$0xff] %v6083_v8  ;;  %8292 = vst [vmem:[#allocation151_spill] sm:$0xff] %v6085_v11  ;;  %v6089_v4 = vld [vmem:[#allocation3 + $0x330] sm:$0xff] }
 0x23e   :  { %8290 = vst [vmem:[#allocation149_spill] sm:$0xff] %v6080_v29  ;;  %8293 = vst [vmem:[#allocation152_spill] sm:$0xff] %v6089_v4 }
 0x240   :  { %2192 = vmatpush1.bf16.msra.mxu1 %v6065_v33  ;;  %2151 = vmatpush1.bf16.msra.mxu0 %v6071_v2  ;;  %v6095_v33 = vld [vmem:[#allocation3 + $0x320] sm:$0xff]  ;;  %v6097_v2 = vld [vmem:[#allocation3 + $0x368] sm:$0xff] }
 0x241   :  { %2193 = vmatprep.subr.bf16.mxu1 %v6068_v38  ;;  %2152 = vmatprep.subr.bf16.mxu0 %v6073_v15  ;;  %v6092_v38 = vld [vmem:[#allocation3 + $0x378] sm:$0xff]  ;;  %8295 = vst [vmem:[#allocation154_spill] sm:$0xff] %v6095_v33  ;;  %8296 = vst [vmem:[#allocation155_spill] sm:$0xff] %v6097_v2  ;;  %v6101_v15 = vld [vmem:[#allocation3 + $0x370] sm:$0xff] }
 0x242   :  { %8294 = vst [vmem:[#allocation153_spill] sm:$0xff] %v6092_v38 }
 0x244   :  { %2194 = vmatpush1.bf16.msra.mxu1 %v6077_v7  ;;  %2153 = vmatpush1.bf16.msra.mxu0 %v6083_v8  ;;  %v6107_v7 = vld [vmem:[#allocation3 + $0x360] sm:$0xff]  ;;  %v6109_v8 = vld [vmem:[#allocation3 + $0x3a8] sm:$0xff] }
 0x245   :  { %2195 = vmatprep.subr.bf16.mxu1 %v6080_v29  ;;  %2154 = vmatprep.subr.bf16.mxu0 %v6085_v11  ;;  %v6104_v29 = vld [vmem:[#allocation3 + $0x3b8] sm:$0xff]  ;;  %v6113_v11 = vld [vmem:[#allocation3 + $0x3b0] sm:$0xff] }
 0x246   :  { %8297 = vst [vmem:[#allocation156_spill] sm:$0xff] %v6104_v29 }
 0x248   :  { %2196 = vmatpush1.bf16.msra.mxu1 %v6089_v4  ;;  %2155 = vmatpush1.bf16.msra.mxu0 %v6095_v33  ;;  %v6119_v4 = vld [vmem:[#allocation3 + $0x3a0] sm:$0xff]  ;;  %v6121_v33 = vld [vmem:[#allocation3 + $0x3e8] sm:$0xff] }
 0x249   :  { %2197 = vmatprep.subr.bf16.mxu1 %v6092_v38  ;;  %2156 = vmatprep.subr.bf16.mxu0 %v6097_v2  ;;  %v6116_v38 = vld [vmem:[#allocation3 + $0x3f8] sm:$0xff]  ;;  %v6125_v2 = vld [vmem:[#allocation3 + $0x3f0] sm:$0xff] }
 0x24c   :  { %2198 = vmatpush1.bf16.msra.mxu1 %v6101_v15  ;;  %2157 = vmatpush1.bf16.msra.mxu0 %v6107_v7 }
 0x24d   :  { %2199 = vmatprep.subr.bf16.mxu1 %v6104_v29  ;;  %2158 = vmatprep.subr.bf16.mxu0 %v6109_v8  ;;  %v6129_v29 = vld [vmem:[#allocation3 + $0x3e0] sm:$0xff] }
 0x250   :  { %2200 = vmatpush1.bf16.msra.mxu1 %v6113_v11  ;;  %2159 = vmatpush1.bf16.msra.mxu0 %v6119_v4 }
 0x251   :  { %2201 = vmatprep.subr.bf16.mxu1 %v6116_v38  ;;  %2160 = vmatprep.subr.bf16.mxu0 %v6121_v33 }
 0x254   :  { %2202 = vmatpush1.bf16.msra.mxu1 %v6125_v2  ;;  %2161 = vmatpush1.bf16.msra.mxu0 %v6129_v29 }
 0x255   :  { %2307 = vmatprep.subr.bf16.mxu1 %v5745_v52  ;;  %2266 = vmatprep.subr.bf16.mxu0 %v5752_v58 }
 0x257   :  { %2204 = vmatmul.mubr.bf16.vlgmr.msra.gmra.mrb[36].mxu1 %v8211_v5  ;;  %2163 = vmatmul.mubr.bf16.vlgmr.msra.gmra.mrb[36].mxu0 %v8211_v5  ;;  %v8298_v5 = vld [vmem:[#allocation92_spill] sm:$0xff] }
 0x258   :  { %2308 = vmatpush1.bf16.msra.mxu1 %v5747_v25  ;;  %2267 = vmatpush1.bf16.msra.mxu0 %v5754_v26 }
 0x259   :  { %2309 = vmatprep.subr.bf16.mxu1 %v5749_v35  ;;  %2268 = vmatprep.subr.bf16.mxu0 %v5758_v63 }
 0x25c   :  { %2310 = vmatpush1.bf16.msra.mxu1 %v5761_v57  ;;  %2269 = vmatpush1.bf16.msra.mxu0 %v5767_v17 }
 0x25d   :  { %2311 = vmatprep.subr.bf16.mxu1 %v5764_v49  ;;  %2270 = vmatprep.subr.bf16.mxu0 %v5769_v22 }
 0x260   :  { %2312 = vmatpush1.bf16.msra.mxu1 %v5773_v10  ;;  %2271 = vmatpush1.bf16.msra.mxu0 %v5779_v53 }
 0x261   :  { %2313 = vmatprep.subr.bf16.mxu1 %v5776_v6  ;;  %2272 = vmatprep.subr.bf16.mxu0 %v5781_v60 }
 0x264   :  { %2314 = vmatpush1.bf16.msra.mxu1 %v5785_v56  ;;  %2273 = vmatpush1.bf16.msra.mxu0 %v5791_v9 }
 0x265   :  { %2315 = vmatprep.subr.bf16.mxu1 %v5788_v19  ;;  %2274 = vmatprep.subr.bf16.mxu0 %v5793_v0 }
 0x268   :  { %2316 = vmatpush1.bf16.msra.mxu1 %v5797_v59  ;;  %2275 = vmatpush1.bf16.msra.mxu0 %v5803_v44 }
 0x269   :  { %2317 = vmatprep.subr.bf16.mxu1 %v5800_v48  ;;  %2276 = vmatprep.subr.bf16.mxu0 %v5805_v50 }
 0x26c   :  { %2318 = vmatpush1.bf16.msra.mxu1 %v5809_v47  ;;  %2277 = vmatpush1.bf16.msra.mxu0 %v5815_v21 }
 0x26d   :  { %2319 = vmatprep.subr.bf16.mxu1 %v5812_v61  ;;  %2278 = vmatprep.subr.bf16.mxu0 %v5817_v42 }
 0x270   :  { %2320 = vmatpush1.bf16.msra.mxu1 %v5821_v55  ;;  %2279 = vmatpush1.bf16.msra.mxu0 %v5827_v36 }
 0x271   :  { %2321 = vmatprep.subr.bf16.mxu1 %v5824_v40  ;;  %2280 = vmatprep.subr.bf16.mxu0 %v5829_v43 }
 0x274   :  { %2322 = vmatpush1.bf16.msra.mxu1 %v5833_v39  ;;  %2281 = vmatpush1.bf16.msra.mxu0 %v5839_v37 }
 0x275   :  { %2323 = vmatprep.subr.bf16.mxu1 %v5836_v30  ;;  %2282 = vmatprep.subr.bf16.mxu0 %v5841_v14 }
 0x278   :  { %2324 = vmatpush1.bf16.msra.mxu1 %v5845_v1  ;;  %2283 = vmatpush1.bf16.msra.mxu0 %v5851_v28 }
 0x279   :  { %2325 = vmatprep.subr.bf16.mxu1 %v5848_v32  ;;  %2284 = vmatprep.subr.bf16.mxu0 %v5853_v34  ;;  %v8313_v32 = vld [vmem:[#allocation9_spill] sm:$0xff] }
 0x27c   :  { %2326 = vmatpush1.bf16.msra.mxu1 %v5857_v31  ;;  %2285 = vmatpush1.bf16.msra.mxu0 %v5863_v13  ;;  %v8311_v31 = vld [vmem:[#allocation10_spill] sm:$0xff]  ;;  %v8312_v13 = vld [vmem:[#allocation7_spill] sm:$0xff] }
 0x27d   :  { %2327 = vmatprep.subr.bf16.mxu1 %v5860_v3  ;;  %2286 = vmatprep.subr.bf16.mxu0 %v5865_v54  ;;  %v8310_v54 = vld [vmem:[#allocation8_spill] sm:$0xff] }
 0x280   :  { %2328 = vmatpush1.bf16.msra.mxu1 %v5869_v62  ;;  %2287 = vmatpush1.bf16.msra.mxu0 %v5875_v20 }
 0x281   :  { %2329 = vmatprep.subr.bf16.mxu1 %v5872_v24  ;;  %2288 = vmatprep.subr.bf16.mxu0 %v5879_v23  ;;  %v8299_v24 = vld [vmem:[#allocation94_spill] sm:$0xff]  ;;  %v8300_v23 = vld [vmem:[#allocation93_spill] sm:$0xff] }
 0x284   :  { %2330 = vmatpush1.bf16.msra.mxu1 %v5877_v27  ;;  %2289 = vmatpush1.bf16.msra.mxu0 %v5884_v51  ;;  %v8301_v27 = vld [vmem:[#allocation95_spill] sm:$0xff]  ;;  %v8302_v51 = vld [vmem:[#allocation96_spill] sm:$0xff] }
 0x285   :  { %2331 = vmatprep.subr.bf16.mxu1 %v5882_v46  ;;  %2290 = vmatprep.subr.bf16.mxu0 %v5888_v41  ;;  %v8303_v46 = vld [vmem:[#allocation98_spill] sm:$0xff]  ;;  %v8304_v41 = vld [vmem:[#allocation97_spill] sm:$0xff] }
 0x288   :  { %2332 = vmatpush1.bf16.msra.mxu1 %v5891_v45  ;;  %2291 = vmatpush1.bf16.msra.mxu0 %v5896_v12  ;;  %v8305_v45 = vld [vmem:[#allocation99_spill] sm:$0xff]  ;;  %v8306_v12 = vld [vmem:[#allocation100_spill] sm:$0xff] }
 0x289   :  { %2333 = vmatprep.subr.bf16.mxu1 %v5894_v16  ;;  %2292 = vmatprep.subr.bf16.mxu0 %v5900_v18  ;;  %v8307_v16 = vld [vmem:[#allocation102_spill] sm:$0xff]  ;;  %v8308_v18 = vld [vmem:[#allocation101_spill] sm:$0xff] }
 0x28c   :  { %2334 = vmatpush1.bf16.msra.mxu1 %v8298_v5  ;;  %2293 = vmatpush1.bf16.msra.mxu0 %v8299_v24  ;;  %v8309_v5 = vld [vmem:[#allocation103_spill] sm:$0xff] }
 0x28d   :  { %2335 = vmatprep.subr.bf16.mxu1 %v8300_v23  ;;  %2294 = vmatprep.subr.bf16.mxu0 %v8301_v27 }
 0x290   :  { %2336 = vmatpush1.bf16.msra.mxu1 %v8302_v51  ;;  %2295 = vmatpush1.bf16.msra.mxu0 %v8303_v46 }
 0x291   :  { %2337 = vmatprep.subr.bf16.mxu1 %v8304_v41  ;;  %2296 = vmatprep.subr.bf16.mxu0 %v8305_v45 }
 0x294   :  { %2338 = vmatpush1.bf16.msra.mxu1 %v8306_v12  ;;  %2297 = vmatpush1.bf16.msra.mxu0 %v8307_v16 }
 0x295   :  { %2389 = vmatprep.subr.bf16.mxu1 %v8308_v18  ;;  %2348 = vmatprep.subr.bf16.mxu0 %v8309_v5 }
 0x2ea   :  { %v2123_v24 = vpop.f32.mrb[32].mxu1  ;;  %v2082_v62 = vpop.f32.mrb[32].mxu0 }
 0x2eb   :  { %v2125_v23 = vpop.f32.mrb[33].mxu1  ;;  %v2084_v20 = vpop.f32.mrb[33].mxu0  ;;  %v2214_v41 = vadd.f32 %v2123_v24, %v8310_v54  ;;  %v2212_v12 = vadd.f32 %v2082_v62, %v8312_v13  ;;  %v8315_v24 = vld [vmem:[#allocation42_spill] sm:$0xff] }
 0x2ec   :  { %v2127_v27 = vpop.f32.mrb[34].mxu1  ;;  %v2086_v3 = vpop.f32.mrb[34].mxu0  ;;  %v2215_v45 = vadd.f32 %v2125_v23, %v8311_v31  ;;  %v2213_v16 = vadd.f32 %v2084_v20, %v8313_v32  ;;  %v8316_v31 = vld [vmem:[#allocation39_spill] sm:$0xff] }
 0x2ed   :  { %v2128_v51 = vpop.f32.mrb[35].mxu1  ;;  %v2087_v46 = vpop.f32.mrb[35].mxu0  ;;  %v2222_v34 = vmul.f32 0.5, %v2214_v41  ;;  %v2220_v1 = vmul.f32 0.5, %v2212_v12  ;;  %v8317_v12 = vld [vmem:[#allocation41_spill] sm:$0xff] }
 0x2ee   :  { %v2223_v18 = vmul.f32 0.5, %v2215_v45  ;;  %v2221_v5 = vmul.f32 0.5, %v2213_v16  ;;  %v8314_v51 = vld [vmem:[#allocation40_spill] sm:$0xff] }
 0x2ef   :  { %4113 = vtanh.f32 %v2222_v34 }
 0x2f0   :  { %4115 = vtanh.f32 %v2223_v18 }
 0x2f1   :  { %4117 = vtanh.f32 %v2220_v1 }
 0x2f2   :  { %4119 = vtanh.f32 %v2221_v5 }
 0x2f9   :  { %v4114_v20 = vpop.eup %4113 }
 0x2fa   :  { %v4116_v18 = vpop.eup %4115 }
 0x2fb   :  { %v4118_v1 = vpop.eup %4117  ;;  %v2235_v30 = vmul.f32 0.5, %v4116_v18 }
 0x32a   :  { %v2205_v27 = vpop.f32.mrb[36].mxu1  ;;  %v2164_v28 = vpop.f32.mrb[36].mxu0 }
 0x32b   :  { %v2218_v3 = vadd.f32 %v2205_v27, %v8314_v51  ;;  %v2207_v46 = vpop.f32.mrb[37].mxu1  ;;  %v2216_v62 = vadd.f32 %v2164_v28, %v8316_v31  ;;  %v2166_v13 = vpop.f32.mrb[37].mxu0  ;;  %v2234_v51 = vmul.f32 0.5, %v4114_v20 }
 0x32c   :  { %v2219_v54 = vadd.f32 %v2207_v46, %v8315_v24  ;;  %v2209_v23 = vpop.f32.mrb[38].mxu1  ;;  %v2217_v16 = vadd.f32 %v2166_v13, %v8317_v12  ;;  %v2168_v34 = vpop.f32.mrb[38].mxu0  ;;  %v2232_v46 = vmul.f32 0.5, %v4118_v1 }
 0x32d   :  { %4121 = vtanh.f32 %v2218_v3  ;;  %v2210_v32 = vpop.f32.mrb[39].mxu1  ;;  %v2224_v41 = vmul.f32 0.5, %v2216_v62  ;;  %v2169_v45 = vpop.f32.mrb[39].mxu0  ;;  %v2240_v28 = vadd.f32 0.5, %v2234_v51  ;;  %v2241_v23 = vadd.f32 0.5, %v2235_v30 }
 0x32e   :  { %4123 = vtanh.f32 %v2219_v54  ;;  %v2225_v5 = vmul.f32 0.5, %v2217_v16  ;;  %v4120_v27 = vpop.eup %4119  ;;  %v2238_v3 = vadd.f32 0.5, %v2232_v46 }
 0x32f   :  { %4125 = vtanh.f32 %v2224_v41  ;;  %v2233_v24 = vmul.f32 0.5, %v4120_v27  ;;  %v2246_v12 = vmul.f32 0.0, %v2240_v28  ;;  %v2247_v54 = vmul.f32 0.0, %v2241_v23 }
 0x330   :  { %4127 = vtanh.f32 %v2225_v5 }
 0x331   :  { %v2239_v32 = vadd.f32 0.5, %v2233_v24 }
 0x337   :  { %v4122_v31 = vpop.eup %4121 }
 0x338   :  { %v4124_v13 = vpop.eup %4123  ;;  %v2248_v34 = vmul.f32 %v4122_v31, %v2238_v3  ;;  %v8318_v3 = vld [vmem:[#allocation106_spill] sm:$0xff]  ;;  %v8319_v31 = vld [vmem:[#allocation104_spill] sm:$0xff] }
 0x339   :  { %v2249_v62 = vmul.f32 %v4124_v13, %v2239_v32  ;;  %v4126_v20 = vpop.eup %4125  ;;  %v8320_v32 = vld [vmem:[#allocation107_spill] sm:$0xff]  ;;  %v8321_v13 = vld [vmem:[#allocation105_spill] sm:$0xff] }
 0x33a   :  { %v6209_v45 = vadd.f32 %v2248_v34, %v2246_v12  ;;  %v4128_v18 = vpop.eup %4127  ;;  %v2236_v41 = vmul.f32 0.5, %v4126_v20  ;;  %v8322_v12 = vld [vmem:[#allocation110_spill] sm:$0xff]  ;;  %v8323_v34 = vld [vmem:[#allocation108_spill] sm:$0xff] }
 0x33b   :  { %v6211_v16 = vadd.f32 %v2249_v62, %v2247_v54  ;;  %v2237_v30 = vmul.f32 0.5, %v4128_v18  ;;  %v8324_v54 = vld [vmem:[#allocation111_spill] sm:$0xff]  ;;  %v8325_v62 = vld [vmem:[#allocation109_spill] sm:$0xff]  ;;  %v8326_v20 = vld [vmem:[#allocation114_spill] sm:$0xff] }
 0x33c   :  { %4129 = vtanh.f32 %v6209_v45  ;;  %v2242_v1 = vadd.f32 0.5, %v2236_v41  ;;  %v8327_v18 = vld [vmem:[#allocation112_spill] sm:$0xff]  ;;  %v8328_v41 = vld [vmem:[#allocation115_spill] sm:$0xff] }
 0x33d   :  { %4131 = vtanh.f32 %v6211_v16  ;;  %v2243_v5 = vadd.f32 0.5, %v2237_v30  ;;  %v8329_v30 = vld [vmem:[#allocation113_spill] sm:$0xff] }
 0x346   :  { %v4130_v27 = vpop.eup %4129 }
 0x347   :  { %v4132_v51 = vpop.eup %4131  ;;  %v2254_v46 = vmul.f32 %v4130_v27, %v2242_v1  ;;  %v8330_v1 = vld [vmem:[#allocation118_spill] sm:$0xff]  ;;  %v8332_v27 = vld [vmem:[#allocation119_spill] sm:$0xff] }
 0x348   :  { %v2255_v24 = vmul.f32 %v4132_v51, %v2243_v5  ;;  %v8331_v5 = vld [vmem:[#allocation116_spill] sm:$0xff]  ;;  %v8333_v51 = vld [vmem:[#allocation117_spill] sm:$0xff] }
 0x349   :  { %v6215_v23 = vpack.c.bf16 %v2254_v46, %v2254_v46  ;;  %v8334_v46 = vld [vmem:[#allocation122_spill] sm:$0xff] }
 0x34a   :  { %v2265_v28 = vpack.c.bf16 %v2255_v24, %v2255_v24  ;;  %v8335_v24 = vld [vmem:[#allocation120_spill] sm:$0xff] }
 0x34c   :  { %2298 = vmatprep.mubr.bf16.mxu0 %v2265_v28  ;;  %2339 = vmatprep.mubr.bf16.mxu1 %v2265_v28 }
 0x34d   :  { %2299 = vmatmul.mubr.bf16.vlgmr.msra.gmra.mrb[40].mxu0 %v6215_v23  ;;  %2340 = vmatmul.mubr.bf16.vlgmr.msra.gmra.mrb[40].mxu1 %v6215_v23 }
 0x34e   :  { %2349 = vmatpush1.bf16.msra.mxu0 %v8318_v3  ;;  %2390 = vmatpush1.bf16.msra.mxu1 %v8319_v31 }
 0x34f   :  { %2380 = vmatprep.mubr.bf16.mxu0 %v2265_v28  ;;  %2421 = vmatprep.mubr.bf16.mxu1 %v2265_v28  ;;  %v8336_v28 = vld [vmem:[#allocation123_spill] sm:$0xff] }
 0x350   :  { %2350 = vmatprep.subr.bf16.mxu0 %v8320_v32  ;;  %2391 = vmatprep.subr.bf16.mxu1 %v8321_v13 }
 0x352   :  { %2351 = vmatpush1.bf16.msra.mxu0 %v8322_v12  ;;  %2392 = vmatpush1.bf16.msra.mxu1 %v8323_v34 }
 0x353   :  { %2352 = vmatprep.subr.bf16.mxu0 %v8324_v54  ;;  %2393 = vmatprep.subr.bf16.mxu1 %v8325_v62 }
 0x356   :  { %2353 = vmatpush1.bf16.msra.mxu0 %v8326_v20  ;;  %2394 = vmatpush1.bf16.msra.mxu1 %v8327_v18  ;;  %v8337_v20 = vld [vmem:[#allocation121_spill] sm:$0xff]  ;;  %v8338_v18 = vld [vmem:[#allocation126_spill] sm:$0xff] }
 0x357   :  { %2354 = vmatprep.subr.bf16.mxu0 %v8328_v41  ;;  %2395 = vmatprep.subr.bf16.mxu1 %v8329_v30  ;;  %v8339_v41 = vld [vmem:[#allocation124_spill] sm:$0xff]  ;;  %v8340_v30 = vld [vmem:[#allocation127_spill] sm:$0xff] }
 0x35a   :  { %2355 = vmatpush1.bf16.msra.mxu0 %v8330_v1  ;;  %2396 = vmatpush1.bf16.msra.mxu1 %v8331_v5  ;;  %v8341_v1 = vld [vmem:[#allocation125_spill] sm:$0xff]  ;;  %v8342_v5 = vld [vmem:[#allocation130_spill] sm:$0xff] }
 0x35b   :  { %2356 = vmatprep.subr.bf16.mxu0 %v8332_v27  ;;  %2397 = vmatprep.subr.bf16.mxu1 %v8333_v51  ;;  %v8343_v27 = vld [vmem:[#allocation128_spill] sm:$0xff]  ;;  %v8344_v51 = vld [vmem:[#allocation131_spill] sm:$0xff] }
 0x35e   :  { %2357 = vmatpush1.bf16.msra.mxu0 %v8334_v46  ;;  %2398 = vmatpush1.bf16.msra.mxu1 %v8335_v24  ;;  %v8345_v46 = vld [vmem:[#allocation129_spill] sm:$0xff]  ;;  %v8346_v24 = vld [vmem:[#allocation134_spill] sm:$0xff] }
 0x35f   :  { %2358 = vmatprep.subr.bf16.mxu0 %v8336_v28  ;;  %2399 = vmatprep.subr.bf16.mxu1 %v8337_v20  ;;  %v8347_v28 = vld [vmem:[#allocation132_spill] sm:$0xff]  ;;  %v8348_v20 = vld [vmem:[#allocation135_spill] sm:$0xff] }
 0x362   :  { %2359 = vmatpush1.bf16.msra.mxu0 %v8338_v18  ;;  %2400 = vmatpush1.bf16.msra.mxu1 %v8339_v41  ;;  %v8349_v18 = vld [vmem:[#allocation133_spill] sm:$0xff]  ;;  %v8350_v41 = vld [vmem:[#allocation138_spill] sm:$0xff] }
 0x363   :  { %2360 = vmatprep.subr.bf16.mxu0 %v8340_v30  ;;  %2401 = vmatprep.subr.bf16.mxu1 %v8341_v1  ;;  %v8351_v30 = vld [vmem:[#allocation136_spill] sm:$0xff]  ;;  %v8352_v1 = vld [vmem:[#allocation139_spill] sm:$0xff] }
 0x366   :  { %2361 = vmatpush1.bf16.msra.mxu0 %v8342_v5  ;;  %2402 = vmatpush1.bf16.msra.mxu1 %v8343_v27  ;;  %v8353_v5 = vld [vmem:[#allocation137_spill] sm:$0xff]  ;;  %v8354_v27 = vld [vmem:[#allocation142_spill] sm:$0xff] }
 0x367   :  { %2362 = vmatprep.subr.bf16.mxu0 %v8344_v51  ;;  %2403 = vmatprep.subr.bf16.mxu1 %v8345_v46  ;;  %v8355_v51 = vld [vmem:[#allocation140_spill] sm:$0xff]  ;;  %v8356_v46 = vld [vmem:[#allocation143_spill] sm:$0xff] }
 0x36a   :  { %2363 = vmatpush1.bf16.msra.mxu0 %v8346_v24  ;;  %2404 = vmatpush1.bf16.msra.mxu1 %v8347_v28  ;;  %v8357_v24 = vld [vmem:[#allocation141_spill] sm:$0xff]  ;;  %v8358_v28 = vld [vmem:[#allocation146_spill] sm:$0xff] }
 0x36b   :  { %2364 = vmatprep.subr.bf16.mxu0 %v8348_v20  ;;  %2405 = vmatprep.subr.bf16.mxu1 %v8349_v18  ;;  %v8359_v20 = vld [vmem:[#allocation144_spill] sm:$0xff]  ;;  %v8360_v18 = vld [vmem:[#allocation147_spill] sm:$0xff] }
 0x36e   :  { %2365 = vmatpush1.bf16.msra.mxu0 %v8350_v41  ;;  %2406 = vmatpush1.bf16.msra.mxu1 %v8351_v30  ;;  %v8361_v41 = vld [vmem:[#allocation145_spill] sm:$0xff]  ;;  %v8362_v30 = vld [vmem:[#allocation150_spill] sm:$0xff] }
 0x36f   :  { %2366 = vmatprep.subr.bf16.mxu0 %v8352_v1  ;;  %2407 = vmatprep.subr.bf16.mxu1 %v8353_v5  ;;  %v8363_v1 = vld [vmem:[#allocation148_spill] sm:$0xff]  ;;  %v8364_v5 = vld [vmem:[#allocation151_spill] sm:$0xff] }
 0x372   :  { %2367 = vmatpush1.bf16.msra.mxu0 %v8354_v27  ;;  %2408 = vmatpush1.bf16.msra.mxu1 %v8355_v51  ;;  %v8365_v27 = vld [vmem:[#allocation149_spill] sm:$0xff]  ;;  %v8366_v51 = vld [vmem:[#allocation154_spill] sm:$0xff] }
 0x373   :  { %2368 = vmatprep.subr.bf16.mxu0 %v8356_v46  ;;  %2409 = vmatprep.subr.bf16.mxu1 %v8357_v24  ;;  %v8367_v46 = vld [vmem:[#allocation152_spill] sm:$0xff]  ;;  %v8368_v24 = vld [vmem:[#allocation155_spill] sm:$0xff] }
 0x376   :  { %2369 = vmatpush1.bf16.msra.mxu0 %v8358_v28  ;;  %2410 = vmatpush1.bf16.msra.mxu1 %v8359_v20  ;;  %v8369_v28 = vld [vmem:[#allocation153_spill] sm:$0xff] }
 0x377   :  { %2370 = vmatprep.subr.bf16.mxu0 %v8360_v18  ;;  %2411 = vmatprep.subr.bf16.mxu1 %v8361_v41 }
 0x37a   :  { %2371 = vmatpush1.bf16.msra.mxu0 %v8362_v30  ;;  %2412 = vmatpush1.bf16.msra.mxu1 %v8363_v1  ;;  %v8370_v30 = vld [vmem:[#allocation156_spill] sm:$0xff] }
 0x37b   :  { %2372 = vmatprep.subr.bf16.mxu0 %v8364_v5  ;;  %2413 = vmatprep.subr.bf16.mxu1 %v8365_v27 }
 0x37e   :  { %2373 = vmatpush1.bf16.msra.mxu0 %v8366_v51  ;;  %2414 = vmatpush1.bf16.msra.mxu1 %v8367_v46 }
 0x37f   :  { %2374 = vmatprep.subr.bf16.mxu0 %v8368_v24  ;;  %2415 = vmatprep.subr.bf16.mxu1 %v8369_v28 }
 0x382   :  { %2375 = vmatpush1.bf16.msra.mxu0 %v6107_v7  ;;  %2416 = vmatpush1.bf16.msra.mxu1 %v6101_v15 }
 0x383   :  { %2376 = vmatprep.subr.bf16.mxu0 %v6109_v8  ;;  %2417 = vmatprep.subr.bf16.mxu1 %v8370_v30 }
 0x386   :  { %2377 = vmatpush1.bf16.msra.mxu0 %v6119_v4  ;;  %2418 = vmatpush1.bf16.msra.mxu1 %v6113_v11 }
 0x387   :  { %2378 = vmatprep.subr.bf16.mxu0 %v6121_v33  ;;  %2419 = vmatprep.subr.bf16.mxu1 %v6116_v38 }
 0x38a   :  { %2379 = vmatpush1.bf16.msra.mxu0 %v6129_v29  ;;  %2420 = vmatpush1.bf16.msra.mxu1 %v6125_v2 }
 0x38b   :  { %2484 = vmatprep.subr.bf16.mxu0 %v5752_v58  ;;  %2525 = vmatprep.subr.bf16.mxu1 %v5745_v52  ;;  %v8395_v52 = vld [vmem:[#allocation93_spill] sm:$0xff]  ;;  %v8398_v58 = vld [vmem:[#allocation99_spill] sm:$0xff] }
 0x38d   :  { %2381 = vmatmul.mubr.bf16.vlgmr.msra.gmra.mrb[44].mxu0 %v6215_v23  ;;  %2422 = vmatmul.mubr.bf16.vlgmr.msra.gmra.mrb[44].mxu1 %v6215_v23 }
 0x38e   :  { %2485 = vmatpush1.bf16.msra.mxu0 %v5754_v26  ;;  %2526 = vmatpush1.bf16.msra.mxu1 %v5747_v25  ;;  %v8396_v25 = vld [vmem:[#allocation98_spill] sm:$0xff]  ;;  %v8399_v26 = vld [vmem:[#allocation97_spill] sm:$0xff] }
 0x38f   :  { %2486 = vmatprep.subr.bf16.mxu0 %v5758_v63  ;;  %2527 = vmatprep.subr.bf16.mxu1 %v5749_v35  ;;  %v8397_v35 = vld [vmem:[#allocation96_spill] sm:$0xff]  ;;  %v8400_v63 = vld [vmem:[#allocation102_spill] sm:$0xff] }
 0x392   :  { %2487 = vmatpush1.bf16.msra.mxu0 %v5767_v17  ;;  %2528 = vmatpush1.bf16.msra.mxu1 %v5761_v57  ;;  %v8401_v57 = vld [vmem:[#allocation100_spill] sm:$0xff]  ;;  %v8403_v17 = vld [vmem:[#allocation101_spill] sm:$0xff] }
 0x393   :  { %2488 = vmatprep.subr.bf16.mxu0 %v5769_v22  ;;  %2529 = vmatprep.subr.bf16.mxu1 %v5764_v49  ;;  %v8383_v22 = vld [vmem:[#allocation81_spill] sm:$0xff]  ;;  %v8402_v49 = vld [vmem:[#allocation103_spill] sm:$0xff] }
 0x396   :  { %2489 = vmatpush1.bf16.msra.mxu0 %v5779_v53  ;;  %2530 = vmatpush1.bf16.msra.mxu1 %v5773_v10  ;;  %v8392_v10 = vld [vmem:[#allocation94_spill] sm:$0xff]  ;;  %v8394_v53 = vld [vmem:[#allocation95_spill] sm:$0xff] }
 0x397   :  { %2490 = vmatprep.subr.bf16.mxu0 %v5781_v60  ;;  %2531 = vmatprep.subr.bf16.mxu1 %v5776_v6  ;;  %v8376_v60 = vld [vmem:[#allocation78_spill] sm:$0xff]  ;;  %v8379_v6 = vld [vmem:[#allocation77_spill] sm:$0xff] }
 0x39a   :  { %2491 = vmatpush1.bf16.msra.mxu0 %v5791_v9  ;;  %2532 = vmatpush1.bf16.msra.mxu1 %v5785_v56  ;;  %v8381_v9 = vld [vmem:[#allocation80_spill] sm:$0xff] }
 0x39b   :  { %2492 = vmatprep.subr.bf16.mxu0 %v5793_v0  ;;  %2533 = vmatprep.subr.bf16.mxu1 %v5788_v19  ;;  %v8382_v19 = vld [vmem:[#allocation84_spill] sm:$0xff]  ;;  %v8390_v0 = vld [vmem:[#allocation91_spill] sm:$0xff] }
 0x39c   :  { %v8393_v56 = vld [vmem:[#allocation92_spill] sm:$0xff] }
 0x39e   :  { %2493 = vmatpush1.bf16.msra.mxu0 %v5803_v44  ;;  %2534 = vmatpush1.bf16.msra.mxu1 %v5797_v59  ;;  %v8371_v44 = vld [vmem:[#allocation71_spill] sm:$0xff]  ;;  %v8391_v59 = vld [vmem:[#allocation89_spill] sm:$0xff] }
 0x39f   :  { %2494 = vmatprep.subr.bf16.mxu0 %v5805_v50  ;;  %2535 = vmatprep.subr.bf16.mxu1 %v5800_v48  ;;  %v8373_v48 = vld [vmem:[#allocation72_spill] sm:$0xff]  ;;  %v8374_v50 = vld [vmem:[#allocation75_spill] sm:$0xff] }
 0x3a2   :  { %2495 = vmatpush1.bf16.msra.mxu0 %v5815_v21  ;;  %2536 = vmatpush1.bf16.msra.mxu1 %v5809_v47  ;;  %v8372_v47 = vld [vmem:[#allocation74_spill] sm:$0xff]  ;;  %v8389_v21 = vld [vmem:[#allocation88_spill] sm:$0xff] }
 0x3a3   :  { %2496 = vmatprep.subr.bf16.mxu0 %v5817_v42  ;;  %2537 = vmatprep.subr.bf16.mxu1 %v5812_v61  ;;  %v8386_v42 = vld [vmem:[#allocation87_spill] sm:$0xff]  ;;  %v8388_v61 = vld [vmem:[#allocation90_spill] sm:$0xff] }
 0x3a6   :  { %2497 = vmatpush1.bf16.msra.mxu0 %v5827_v36  ;;  %2538 = vmatpush1.bf16.msra.mxu1 %v5821_v55  ;;  %v8375_v36 = vld [vmem:[#allocation73_spill] sm:$0xff] }
 0x3a7   :  { %2498 = vmatprep.subr.bf16.mxu0 %v5829_v43  ;;  %2539 = vmatprep.subr.bf16.mxu1 %v5824_v40  ;;  %v8377_v43 = vld [vmem:[#allocation76_spill] sm:$0xff]  ;;  %v8378_v40 = vld [vmem:[#allocation79_spill] sm:$0xff]  ;;  %v8387_v55 = vld [vmem:[#allocation85_spill] sm:$0xff] }
 0x3aa   :  { %2499 = vmatpush1.bf16.msra.mxu0 %v5839_v37  ;;  %2540 = vmatpush1.bf16.msra.mxu1 %v5833_v39  ;;  %v8380_v39 = vld [vmem:[#allocation82_spill] sm:$0xff]  ;;  %v8385_v37 = vld [vmem:[#allocation83_spill] sm:$0xff] }
 0x3ab   :  { %2500 = vmatprep.subr.bf16.mxu0 %v5841_v14  ;;  %2541 = vmatprep.subr.bf16.mxu1 %v8371_v44  ;;  %v8384_v14 = vld [vmem:[#allocation86_spill] sm:$0xff] }
 0x3ae   :  { %2501 = vmatpush1.bf16.msra.mxu0 %v8372_v47  ;;  %2542 = vmatpush1.bf16.msra.mxu1 %v8373_v48 }
 0x3af   :  { %2502 = vmatprep.subr.bf16.mxu0 %v8374_v50  ;;  %2543 = vmatprep.subr.bf16.mxu1 %v8375_v36 }
 0x3b2   :  { %2503 = vmatpush1.bf16.msra.mxu0 %v8376_v60  ;;  %2544 = vmatpush1.bf16.msra.mxu1 %v8377_v43 }
 0x3b3   :  { %2504 = vmatprep.subr.bf16.mxu0 %v8378_v40  ;;  %2545 = vmatprep.subr.bf16.mxu1 %v8379_v6  ;;  %v8404_v40 = vld [vmem:[#allocation12_spill] sm:$0xff] }
 0x3b6   :  { %2505 = vmatpush1.bf16.msra.mxu0 %v8380_v39  ;;  %2546 = vmatpush1.bf16.msra.mxu1 %v8381_v9  ;;  %v8405_v39 = vld [vmem:[#allocation14_spill] sm:$0xff] }
 0x3b7   :  { %2506 = vmatprep.subr.bf16.mxu0 %v8382_v19  ;;  %2547 = vmatprep.subr.bf16.mxu1 %v8383_v22  ;;  %v8406_v19 = vld [vmem:[#allocation11_spill] sm:$0xff] }
 0x3ba   :  { %2507 = vmatpush1.bf16.msra.mxu0 %v8384_v14  ;;  %2548 = vmatpush1.bf16.msra.mxu1 %v8385_v37  ;;  %v8407_v14 = vld [vmem:[#allocation13_spill] sm:$0xff] }
 0x3bb   :  { %2508 = vmatprep.subr.bf16.mxu0 %v8386_v42  ;;  %2549 = vmatprep.subr.bf16.mxu1 %v8387_v55 }
 0x3be   :  { %2509 = vmatpush1.bf16.msra.mxu0 %v8388_v61  ;;  %2550 = vmatpush1.bf16.msra.mxu1 %v8389_v21 }
 0x3bf   :  { %2510 = vmatprep.subr.bf16.mxu0 %v8390_v0  ;;  %2551 = vmatprep.subr.bf16.mxu1 %v8391_v59 }
 0x3c2   :  { %2511 = vmatpush1.bf16.msra.mxu0 %v8392_v10  ;;  %2552 = vmatpush1.bf16.msra.mxu1 %v8393_v56  ;;  %v8408_v10 = vld [vmem:[#allocation44_spill] sm:$0xff] }
 0x3c3   :  { %2512 = vmatprep.subr.bf16.mxu0 %v8394_v53  ;;  %2553 = vmatprep.subr.bf16.mxu1 %v8395_v52 }
 0x3c6   :  { %2513 = vmatpush1.bf16.msra.mxu0 %v8396_v25  ;;  %2554 = vmatpush1.bf16.msra.mxu1 %v8397_v35  ;;  %v8409_v25 = vld [vmem:[#allocation43_spill] sm:$0xff] }
 0x3c7   :  { %2514 = vmatprep.subr.bf16.mxu0 %v8398_v58  ;;  %2555 = vmatprep.subr.bf16.mxu1 %v8399_v26  ;;  %v8410_v58 = vld [vmem:[#allocation46_spill] sm:$0xff] }
 0x3ca   :  { %2515 = vmatpush1.bf16.msra.mxu0 %v8400_v63  ;;  %2556 = vmatpush1.bf16.msra.mxu1 %v8401_v57 }
 0x3cb   :  { %2566 = vmatprep.subr.bf16.mxu0 %v8402_v49  ;;  %2607 = vmatprep.subr.bf16.mxu1 %v8403_v17  ;;  %v8411_v17 = vld [vmem:[#allocation45_spill] sm:$0xff] }
 0x420   :  { %v2300_v23 = vpop.f32.mrb[40].mxu0  ;;  %v2341_v44 = vpop.f32.mrb[40].mxu1 }
 0x421   :  { %v2302_v47 = vpop.f32.mrb[41].mxu0  ;;  %v2343_v48 = vpop.f32.mrb[41].mxu1  ;;  %v2432_v6 = vadd.f32 %v2341_v44, %v8404_v40  ;;  %v2430_v22 = vadd.f32 %v2300_v23, %v8406_v19 }
 0x422   :  { %v2304_v50 = vpop.f32.mrb[42].mxu0  ;;  %v2345_v36 = vpop.f32.mrb[42].mxu1  ;;  %v2433_v9 = vadd.f32 %v2343_v48, %v8405_v39  ;;  %v2431_v37 = vadd.f32 %v2302_v47, %v8407_v14 }
 0x423   :  { %v2305_v60 = vpop.f32.mrb[43].mxu0  ;;  %v2346_v43 = vpop.f32.mrb[43].mxu1  ;;  %v2440_v42 = vmul.f32 0.5, %v2432_v6  ;;  %v2438_v61 = vmul.f32 0.5, %v2430_v22 }
 0x424   :  { %v2441_v55 = vmul.f32 0.5, %v2433_v9  ;;  %v2439_v21 = vmul.f32 0.5, %v2431_v37 }
 0x425   :  { %4133 = vtanh.f32 %v2440_v42 }
 0x426   :  { %4135 = vtanh.f32 %v2441_v55 }
 0x427   :  { %4137 = vtanh.f32 %v2438_v61 }
 0x428   :  { %4139 = vtanh.f32 %v2439_v21 }
 0x42f   :  { %v4134_v49 = vpop.eup %4133 }
 0x430   :  { %v4136_v48 = vpop.eup %4135  ;;  %v2452_v60 = vmul.f32 0.5, %v4134_v49 }
 0x431   :  { %v4138_v50 = vpop.eup %4137  ;;  %v2453_v40 = vmul.f32 0.5, %v4136_v48  ;;  %v8423_v48 = vld [vmem:[#allocation121_spill] sm:$0xff] }
 0x432   :  { %v4140_v36 = vpop.eup %4139  ;;  %v2450_v39 = vmul.f32 0.5, %v4138_v50  ;;  %v2458_v19 = vadd.f32 0.5, %v2452_v60  ;;  %v8424_v50 = vld [vmem:[#allocation126_spill] sm:$0xff]  ;;  %v8426_v60 = vld [vmem:[#allocation127_spill] sm:$0xff] }
 0x433   :  { %v2451_v9 = vmul.f32 0.5, %v4140_v36  ;;  %v2459_v22 = vadd.f32 0.5, %v2453_v40  ;;  %v8425_v36 = vld [vmem:[#allocation124_spill] sm:$0xff]  ;;  %v8428_v40 = vld [vmem:[#allocation130_spill] sm:$0xff] }
 0x434   :  { %v2456_v14 = vadd.f32 0.5, %v2450_v39  ;;  %v2464_v61 = vmul.f32 %v2458_v19, %v6209_v45  ;;  %v8430_v39 = vld [vmem:[#allocation131_spill] sm:$0xff]  ;;  %v8432_v19 = vld [vmem:[#allocation134_spill] sm:$0xff] }
 0x435   :  { %v2457_v42 = vadd.f32 0.5, %v2451_v9  ;;  %v8431_v9 = vld [vmem:[#allocation129_spill] sm:$0xff] }
 0x460   :  { %v2382_v0 = vpop.f32.mrb[44].mxu0  ;;  %v2423_v59 = vpop.f32.mrb[44].mxu1 }
 0x461   :  { %v2436_v56 = vadd.f32 %v2423_v59, %v8408_v10  ;;  %v2384_v53 = vpop.f32.mrb[45].mxu0  ;;  %v2425_v52 = vpop.f32.mrb[45].mxu1  ;;  %v2434_v35 = vadd.f32 %v2382_v0, %v8409_v25  ;;  %v2465_v0 = vmul.f32 %v2459_v22, %v6211_v16  ;;  %v8433_v22 = vld [vmem:[#allocation132_spill] sm:$0xff] }
 0x462   :  { %v2437_v26 = vadd.f32 %v2425_v52, %v8410_v58  ;;  %v2386_v63 = vpop.f32.mrb[46].mxu0  ;;  %v2427_v57 = vpop.f32.mrb[46].mxu1  ;;  %v2435_v23 = vadd.f32 %v2384_v53, %v8411_v17 }
 0x463   :  { %4141 = vtanh.f32 %v2436_v56  ;;  %v2387_v44 = vpop.f32.mrb[47].mxu0  ;;  %v2428_v47 = vpop.f32.mrb[47].mxu1  ;;  %v2442_v43 = vmul.f32 0.5, %v2434_v35 }
 0x464   :  { %4143 = vtanh.f32 %v2437_v26  ;;  %v2443_v6 = vmul.f32 0.5, %v2435_v23  ;;  %v8412_v23 = vld [vmem:[#allocation114_spill] sm:$0xff]  ;;  %v8413_v44 = vld [vmem:[#allocation112_spill] sm:$0xff] }
 0x465   :  { %4145 = vtanh.f32 %v2442_v43  ;;  %v8416_v47 = vld [vmem:[#allocation118_spill] sm:$0xff]  ;;  %v8427_v43 = vld [vmem:[#allocation125_spill] sm:$0xff] }
 0x466   :  { %4147 = vtanh.f32 %v2443_v6  ;;  %v8429_v6 = vld [vmem:[#allocation128_spill] sm:$0xff] }
 0x46d   :  { %v4142_v37 = vpop.eup %4141 }
 0x46e   :  { %v4144_v55 = vpop.eup %4143  ;;  %v2466_v21 = vmul.f32 %v4142_v37, %v2456_v14  ;;  %v8434_v14 = vld [vmem:[#allocation135_spill] sm:$0xff]  ;;  %v8435_v37 = vld [vmem:[#allocation133_spill] sm:$0xff] }
 0x46f   :  { %v2467_v59 = vmul.f32 %v4144_v55, %v2457_v42  ;;  %v4146_v53 = vpop.eup %4145  ;;  %v8436_v42 = vld [vmem:[#allocation138_spill] sm:$0xff]  ;;  %v8437_v55 = vld [vmem:[#allocation136_spill] sm:$0xff] }
 0x470   :  { %v6359_v10 = vadd.f32 %v2466_v21, %v2464_v61  ;;  %v4148_v52 = vpop.eup %4147  ;;  %v2454_v25 = vmul.f32 0.5, %v4146_v53  ;;  %v8438_v61 = vld [vmem:[#allocation139_spill] sm:$0xff]  ;;  %v8439_v21 = vld [vmem:[#allocation137_spill] sm:$0xff] }
 0x471   :  { %v6361_v56 = vadd.f32 %v2467_v59, %v2465_v0  ;;  %v2455_v35 = vmul.f32 0.5, %v4148_v52  ;;  %v8440_v0 = vld [vmem:[#allocation142_spill] sm:$0xff]  ;;  %v8441_v59 = vld [vmem:[#allocation140_spill] sm:$0xff]  ;;  %v8442_v53 = vld [vmem:[#allocation143_spill] sm:$0xff] }
 0x472   :  { %4149 = vtanh.f32 %v6359_v10  ;;  %v2460_v58 = vadd.f32 0.5, %v2454_v25  ;;  %v8443_v52 = vld [vmem:[#allocation141_spill] sm:$0xff]  ;;  %v8444_v25 = vld [vmem:[#allocation146_spill] sm:$0xff] }
 0x473   :  { %4151 = vtanh.f32 %v6361_v56  ;;  %v2461_v63 = vadd.f32 0.5, %v2455_v35  ;;  %v8445_v35 = vld [vmem:[#allocation150_spill] sm:$0xff] }
 0x47c   :  { %v4150_v26 = vpop.eup %4149 }
 0x47d   :  { %v4152_v45 = vpop.eup %4151  ;;  %v2472_v57 = vmul.f32 %v4150_v26, %v2460_v58  ;;  %v6493_v58 = vld [vmem:[#allocation3 + $0x148] sm:$0xff]  ;;  %v6496_v26 = vld [vmem:[#allocation3 + $0x158] sm:$0xff] }
 0x47e   :  { %v2473_v49 = vmul.f32 %v4152_v45, %v2461_v63  ;;  %8449 = vst [vmem:[#allocation9_spill] sm:$0xff] %v6493_v58  ;;  %8450 = vst [vmem:[#allocation40_spill] sm:$0xff] %v6496_v26  ;;  %v6499_v63 = vld [vmem:[#allocation3 + $0x140] sm:$0xff]  ;;  %v6502_v45 = vld [vmem:[#allocation3 + $0x150] sm:$0xff] }
 0x47f   :  { %v6365_v17 = vpack.c.bf16 %v2472_v57, %v2472_v57  ;;  %8451 = vst [vmem:[#allocation42_spill] sm:$0xff] %v6499_v63  ;;  %8452 = vst [vmem:[#allocation39_spill] sm:$0xff] %v6502_v45  ;;  %v6505_v57 = vld [vmem:[#allocation3 + $0x188] sm:$0xff] }
 0x480   :  { %v2483_v16 = vpack.c.bf16 %v2473_v49, %v2473_v49  ;;  %8453 = vst [vmem:[#allocation41_spill] sm:$0xff] %v6505_v57  ;;  %v6508_v49 = vld [vmem:[#allocation3 + $0x198] sm:$0xff] }
 0x481   :  { %8454 = vst [vmem:[#allocation106_spill] sm:$0xff] %v6508_v49 }
 0x482   :  { %2516 = vmatprep.mubr.bf16.mxu0 %v2483_v16  ;;  %2557 = vmatprep.mubr.bf16.mxu1 %v2483_v16 }
 0x483   :  { %2517 = vmatmul.mubr.bf16.vlgmr.msra.gmra.mrb[48].mxu0 %v6365_v17  ;;  %2558 = vmatmul.mubr.bf16.vlgmr.msra.gmra.mrb[48].mxu1 %v6365_v17 }
 0x484   :  { %2567 = vmatpush1.bf16.msra.mxu0 %v8318_v3  ;;  %2608 = vmatpush1.bf16.msra.mxu1 %v8319_v31  ;;  %v8414_v3 = vld [vmem:[#allocation115_spill] sm:$0xff]  ;;  %v8415_v31 = vld [vmem:[#allocation113_spill] sm:$0xff] }
 0x485   :  { %2598 = vmatprep.mubr.bf16.mxu0 %v2483_v16  ;;  %2639 = vmatprep.mubr.bf16.mxu1 %v2483_v16  ;;  %v6511_v16 = vld [vmem:[#allocation3 + $0x180] sm:$0xff] }
 0x486   :  { %2568 = vmatprep.subr.bf16.mxu0 %v8320_v32  ;;  %2609 = vmatprep.subr.bf16.mxu1 %v8321_v13  ;;  %v8417_v32 = vld [vmem:[#allocation116_spill] sm:$0xff]  ;;  %v8418_v13 = vld [vmem:[#allocation119_spill] sm:$0xff]  ;;  %8455 = vst [vmem:[#allocation104_spill] sm:$0xff] %v6511_v16 }
 0x488   :  { %2569 = vmatpush1.bf16.msra.mxu0 %v8322_v12  ;;  %2610 = vmatpush1.bf16.msra.mxu1 %v8323_v34  ;;  %v8419_v12 = vld [vmem:[#allocation117_spill] sm:$0xff]  ;;  %v8420_v34 = vld [vmem:[#allocation122_spill] sm:$0xff] }
 0x489   :  { %2570 = vmatprep.subr.bf16.mxu0 %v8324_v54  ;;  %2611 = vmatprep.subr.bf16.mxu1 %v8325_v62  ;;  %v8421_v54 = vld [vmem:[#allocation120_spill] sm:$0xff]  ;;  %v8422_v62 = vld [vmem:[#allocation123_spill] sm:$0xff] }
 0x48c   :  { %2571 = vmatpush1.bf16.msra.mxu0 %v8412_v23  ;;  %2612 = vmatpush1.bf16.msra.mxu1 %v8413_v44  ;;  %v6517_v23 = vld [vmem:[#allocation3 + $0x1c8] sm:$0xff]  ;;  %v6520_v44 = vld [vmem:[#allocation3 + $0x1d8] sm:$0xff] }
 0x48d   :  { %2572 = vmatprep.subr.bf16.mxu0 %v8414_v3  ;;  %2613 = vmatprep.subr.bf16.mxu1 %v8415_v31  ;;  %8457 = vst [vmem:[#allocation105_spill] sm:$0xff] %v6517_v23  ;;  %8458 = vst [vmem:[#allocation110_spill] sm:$0xff] %v6520_v44  ;;  %v6523_v3 = vld [vmem:[#allocation3 + $0x1c0] sm:$0xff]  ;;  %v6526_v31 = vld [vmem:[#allocation3 + $0x1d0] sm:$0xff] }
 0x48e   :  { %8459 = vst [vmem:[#allocation108_spill] sm:$0xff] %v6523_v3  ;;  %8460 = vst [vmem:[#allocation111_spill] sm:$0xff] %v6526_v31 }
 0x490   :  { %2573 = vmatpush1.bf16.msra.mxu0 %v8416_v47  ;;  %2614 = vmatpush1.bf16.msra.mxu1 %v8417_v32  ;;  %v6529_v47 = vld [vmem:[#allocation3 + $0x208] sm:$0xff]  ;;  %v6532_v32 = vld [vmem:[#allocation3 + $0x218] sm:$0xff] }
 0x491   :  { %2574 = vmatprep.subr.bf16.mxu0 %v8418_v13  ;;  %2615 = vmatprep.subr.bf16.mxu1 %v8419_v12  ;;  %8461 = vst [vmem:[#allocation109_spill] sm:$0xff] %v6529_v47  ;;  %8462 = vst [vmem:[#allocation144_spill] sm:$0xff] %v6532_v32  ;;  %v6535_v13 = vld [vmem:[#allocation3 + $0x200] sm:$0xff]  ;;  %v6538_v12 = vld [vmem:[#allocation3 + $0x210] sm:$0xff] }
 0x492   :  { %8463 = vst [vmem:[#allocation147_spill] sm:$0xff] %v6535_v13  ;;  %8464 = vst [vmem:[#allocation145_spill] sm:$0xff] %v6538_v12 }
 0x494   :  { %2575 = vmatpush1.bf16.msra.mxu0 %v8420_v34  ;;  %2616 = vmatpush1.bf16.msra.mxu1 %v8421_v54  ;;  %v6541_v34 = vld [vmem:[#allocation3 + $0x248] sm:$0xff]  ;;  %v6544_v54 = vld [vmem:[#allocation3 + $0x258] sm:$0xff] }
 0x495   :  { %2576 = vmatprep.subr.bf16.mxu0 %v8422_v62  ;;  %2617 = vmatprep.subr.bf16.mxu1 %v8423_v48  ;;  %8465 = vst [vmem:[#allocation148_spill] sm:$0xff] %v6541_v34  ;;  %8466 = vst [vmem:[#allocation151_spill] sm:$0xff] %v6544_v54  ;;  %v6547_v62 = vld [vmem:[#allocation3 + $0x240] sm:$0xff]  ;;  %v6550_v48 = vld [vmem:[#allocation3 + $0x250] sm:$0xff] }
 0x496   :  { %8467 = vst [vmem:[#allocation149_spill] sm:$0xff] %v6547_v62  ;;  %8468 = vst [vmem:[#allocation154_spill] sm:$0xff] %v6550_v48 }
 0x498   :  { %2577 = vmatpush1.bf16.msra.mxu0 %v8424_v50  ;;  %2618 = vmatpush1.bf16.msra.mxu1 %v8425_v36  ;;  %v6553_v50 = vld [vmem:[#allocation3 + $0x288] sm:$0xff]  ;;  %v6556_v36 = vld [vmem:[#allocation3 + $0x298] sm:$0xff] }
 0x499   :  { %2578 = vmatprep.subr.bf16.mxu0 %v8426_v60  ;;  %2619 = vmatprep.subr.bf16.mxu1 %v8427_v43  ;;  %8469 = vst [vmem:[#allocation152_spill] sm:$0xff] %v6553_v50  ;;  %8470 = vst [vmem:[#allocation155_spill] sm:$0xff] %v6556_v36  ;;  %v6559_v60 = vld [vmem:[#allocation3 + $0x280] sm:$0xff]  ;;  %v6562_v43 = vld [vmem:[#allocation3 + $0x290] sm:$0xff] }
 0x49a   :  { %8471 = vst [vmem:[#allocation153_spill] sm:$0xff] %v6559_v60  ;;  %8472 = vst [vmem:[#allocation156_spill] sm:$0xff] %v6562_v43 }
 0x49c   :  { %2579 = vmatpush1.bf16.msra.mxu0 %v8428_v40  ;;  %2620 = vmatpush1.bf16.msra.mxu1 %v8429_v6  ;;  %v6565_v40 = vld [vmem:[#allocation3 + $0x2c8] sm:$0xff]  ;;  %v6568_v6 = vld [vmem:[#allocation3 + $0x2d8] sm:$0xff] }
 0x49d   :  { %2580 = vmatprep.subr.bf16.mxu0 %v8430_v39  ;;  %2621 = vmatprep.subr.bf16.mxu1 %v8431_v9  ;;  %8473 = vst [vmem:[#allocation71_spill] sm:$0xff] %v6565_v40  ;;  %8474 = vst [vmem:[#allocation74_spill] sm:$0xff] %v6568_v6  ;;  %v6571_v39 = vld [vmem:[#allocation3 + $0x2c0] sm:$0xff]  ;;  %v6574_v9 = vld [vmem:[#allocation3 + $0x2d0] sm:$0xff] }
 0x49e   :  { %8475 = vst [vmem:[#allocation72_spill] sm:$0xff] %v6571_v39  ;;  %8476 = vst [vmem:[#allocation75_spill] sm:$0xff] %v6574_v9 }
 0x4a0   :  { %2581 = vmatpush1.bf16.msra.mxu0 %v8432_v19  ;;  %2622 = vmatpush1.bf16.msra.mxu1 %v8433_v22  ;;  %v6577_v19 = vld [vmem:[#allocation3 + $0x308] sm:$0xff]  ;;  %v6580_v22 = vld [vmem:[#allocation3 + $0x318] sm:$0xff] }
 0x4a1   :  { %2582 = vmatprep.subr.bf16.mxu0 %v8434_v14  ;;  %2623 = vmatprep.subr.bf16.mxu1 %v8435_v37  ;;  %8477 = vst [vmem:[#allocation73_spill] sm:$0xff] %v6577_v19  ;;  %8478 = vst [vmem:[#allocation78_spill] sm:$0xff] %v6580_v22  ;;  %v6583_v14 = vld [vmem:[#allocation3 + $0x300] sm:$0xff]  ;;  %v6586_v37 = vld [vmem:[#allocation3 + $0x310] sm:$0xff] }
 0x4a2   :  { %8479 = vst [vmem:[#allocation76_spill] sm:$0xff] %v6583_v14  ;;  %8480 = vst [vmem:[#allocation79_spill] sm:$0xff] %v6586_v37 }
 0x4a4   :  { %2583 = vmatpush1.bf16.msra.mxu0 %v8436_v42  ;;  %2624 = vmatpush1.bf16.msra.mxu1 %v8437_v55  ;;  %v6589_v42 = vld [vmem:[#allocation3 + $0x348] sm:$0xff]  ;;  %v6592_v55 = vld [vmem:[#allocation3 + $0x358] sm:$0xff] }
 0x4a5   :  { %2584 = vmatprep.subr.bf16.mxu0 %v8438_v61  ;;  %2625 = vmatprep.subr.bf16.mxu1 %v8439_v21  ;;  %8481 = vst [vmem:[#allocation77_spill] sm:$0xff] %v6589_v42  ;;  %8482 = vst [vmem:[#allocation82_spill] sm:$0xff] %v6592_v55  ;;  %v6595_v61 = vld [vmem:[#allocation3 + $0x340] sm:$0xff]  ;;  %v6598_v21 = vld [vmem:[#allocation3 + $0x350] sm:$0xff] }
 0x4a6   :  { %8483 = vst [vmem:[#allocation80_spill] sm:$0xff] %v6595_v61  ;;  %8484 = vst [vmem:[#allocation84_spill] sm:$0xff] %v6598_v21 }
 0x4a8   :  { %2585 = vmatpush1.bf16.msra.mxu0 %v8440_v0  ;;  %2626 = vmatpush1.bf16.msra.mxu1 %v8441_v59  ;;  %v6601_v0 = vld [vmem:[#allocation3 + $0x388] sm:$0xff]  ;;  %v6604_v59 = vld [vmem:[#allocation3 + $0x398] sm:$0xff] }
 0x4a9   :  { %2586 = vmatprep.subr.bf16.mxu0 %v8442_v53  ;;  %2627 = vmatprep.subr.bf16.mxu1 %v8443_v52  ;;  %8485 = vst [vmem:[#allocation81_spill] sm:$0xff] %v6601_v0  ;;  %8486 = vst [vmem:[#allocation86_spill] sm:$0xff] %v6604_v59  ;;  %v6607_v53 = vld [vmem:[#allocation3 + $0x380] sm:$0xff]  ;;  %v6610_v52 = vld [vmem:[#allocation3 + $0x390] sm:$0xff] }
 0x4aa   :  { %8487 = vst [vmem:[#allocation83_spill] sm:$0xff] %v6607_v53  ;;  %8488 = vst [vmem:[#allocation87_spill] sm:$0xff] %v6610_v52 }
 0x4ac   :  { %2587 = vmatpush1.bf16.msra.mxu0 %v8444_v25  ;;  %2628 = vmatpush1.bf16.msra.mxu1 %v8359_v20  ;;  %v6431_v20 = vld [vmem:[#allocation3 + $0x8] sm:$0xff] }
 0x4ad   :  { %2588 = vmatprep.subr.bf16.mxu0 %v8360_v18  ;;  %2629 = vmatprep.subr.bf16.mxu1 %v8361_v41  ;;  %v6463_v18 = vld [vmem:[#allocation3 + $0x80] sm:$0xff]  ;;  %v6466_v41 = vld [vmem:[#allocation3 + $0x90] sm:$0xff]  ;;  %v6613_v25 = vld [vmem:[#allocation3 + $0x3c8] sm:$0xff] }
 0x4ae   :  { %8489 = vst [vmem:[#allocation85_spill] sm:$0xff] %v6613_v25 }
 0x4b0   :  { %2589 = vmatpush1.bf16.msra.mxu0 %v8445_v35  ;;  %2630 = vmatpush1.bf16.msra.mxu1 %v8363_v1  ;;  %v6472_v1 = vld [vmem:[#allocation3 + $0xd8] sm:$0xff] }
 0x4b1   :  { %2590 = vmatprep.subr.bf16.mxu0 %v8364_v5  ;;  %2631 = vmatprep.subr.bf16.mxu1 %v8365_v27  ;;  %v6475_v5 = vld [vmem:[#allocation3 + $0xc0] sm:$0xff]  ;;  %v6478_v27 = vld [vmem:[#allocation3 + $0xd0] sm:$0xff]  ;;  %v6616_v35 = vld [vmem:[#allocation3 + $0x3d8] sm:$0xff] }
 0x4b2   :  { %8490 = vst [vmem:[#allocation90_spill] sm:$0xff] %v6616_v35 }
 0x4b4   :  { %2591 = vmatpush1.bf16.msra.mxu0 %v8366_v51  ;;  %2632 = vmatpush1.bf16.msra.mxu1 %v8367_v46  ;;  %v6481_v51 = vld [vmem:[#allocation3 + $0x108] sm:$0xff]  ;;  %v6484_v46 = vld [vmem:[#allocation3 + $0x118] sm:$0xff] }
 0x4b5   :  { %2592 = vmatprep.subr.bf16.mxu0 %v8368_v24  ;;  %2633 = vmatprep.subr.bf16.mxu1 %v8369_v28  ;;  %8446 = vst [vmem:[#allocation8_spill] sm:$0xff] %v6484_v46  ;;  %v6487_v24 = vld [vmem:[#allocation3 + $0x100] sm:$0xff]  ;;  %v6490_v28 = vld [vmem:[#allocation3 + $0x110] sm:$0xff] }
 0x4b6   :  { %8447 = vst [vmem:[#allocation10_spill] sm:$0xff] %v6487_v24  ;;  %8448 = vst [vmem:[#allocation7_spill] sm:$0xff] %v6490_v28 }
 0x4b8   :  { %2593 = vmatpush1.bf16.msra.mxu0 %v6107_v7  ;;  %2634 = vmatpush1.bf16.msra.mxu1 %v6101_v15  ;;  %v6434_v7 = vld [vmem:[#allocation3 + $0x18] sm:$0xff] }
 0x4b9   :  { %2594 = vmatprep.subr.bf16.mxu0 %v6109_v8  ;;  %2635 = vmatprep.subr.bf16.mxu1 %v8370_v30  ;;  %v6442_v8 = vld [vmem:[#allocation3 + $0x10] sm:$0xff]  ;;  %v6448_v15 = vld [vmem:[#allocation3 + $0x58] sm:$0xff]  ;;  %v6469_v30 = vld [vmem:[#allocation3 + $0xc8] sm:$0xff] }
 0x4bc   :  { %2595 = vmatpush1.bf16.msra.mxu0 %v6119_v4  ;;  %2636 = vmatpush1.bf16.msra.mxu1 %v6113_v11  ;;  %v6439_v4 = vld [vmem:[#allocation3] sm:$0xff]  ;;  %v6445_v11 = vld [vmem:[#allocation3 + $0x48] sm:$0xff] }
 0x4bd   :  { %2596 = vmatprep.subr.bf16.mxu0 %v6121_v33  ;;  %2637 = vmatprep.subr.bf16.mxu1 %v6116_v38  ;;  %v6454_v33 = vld [vmem:[#allocation3 + $0x50] sm:$0xff]  ;;  %v6460_v38 = vld [vmem:[#allocation3 + $0x98] sm:$0xff] }
 0x4c0   :  { %2597 = vmatpush1.bf16.msra.mxu0 %v6129_v29  ;;  %2638 = vmatpush1.bf16.msra.mxu1 %v6125_v2  ;;  %v6451_v29 = vld [vmem:[#allocation3 + $0x40] sm:$0xff]  ;;  %v6457_v2 = vld [vmem:[#allocation3 + $0x88] sm:$0xff] }
 0x4c1   :  { %2702 = vmatprep.subr.bf16.mxu0 %v6431_v20  ;;  %2743 = vmatprep.subr.bf16.mxu1 %v6434_v7 }
 0x4c3   :  { %2599 = vmatmul.mubr.bf16.vlgmr.msra.gmra.mrb[52].mxu0 %v6365_v17  ;;  %2640 = vmatmul.mubr.bf16.vlgmr.msra.gmra.mrb[52].mxu1 %v6365_v17  ;;  %v6514_v17 = vld [vmem:[#allocation3 + $0x190] sm:$0xff] }
 0x4c4   :  { %2703 = vmatpush1.bf16.msra.mxu0 %v6439_v4  ;;  %2744 = vmatpush1.bf16.msra.mxu1 %v6442_v8  ;;  %8456 = vst [vmem:[#allocation107_spill] sm:$0xff] %v6514_v17 }
 0x4c5   :  { %2704 = vmatprep.subr.bf16.mxu0 %v6445_v11  ;;  %2745 = vmatprep.subr.bf16.mxu1 %v6448_v15 }
 0x4c8   :  { %2705 = vmatpush1.bf16.msra.mxu0 %v6451_v29  ;;  %2746 = vmatpush1.bf16.msra.mxu1 %v6454_v33 }
 0x4c9   :  { %2706 = vmatprep.subr.bf16.mxu0 %v6457_v2  ;;  %2747 = vmatprep.subr.bf16.mxu1 %v6460_v38 }
 0x4cc   :  { %2707 = vmatpush1.bf16.msra.mxu0 %v6463_v18  ;;  %2748 = vmatpush1.bf16.msra.mxu1 %v6466_v41 }
 0x4cd   :  { %2708 = vmatprep.subr.bf16.mxu0 %v6469_v30  ;;  %2749 = vmatprep.subr.bf16.mxu1 %v6472_v1 }
 0x4d0   :  { %2709 = vmatpush1.bf16.msra.mxu0 %v6475_v5  ;;  %2750 = vmatpush1.bf16.msra.mxu1 %v6478_v27 }
 0x4d1   :  { %2710 = vmatprep.subr.bf16.mxu0 %v6481_v51  ;;  %2751 = vmatprep.subr.bf16.mxu1 %v6484_v46 }
 0x4d4   :  { %2711 = vmatpush1.bf16.msra.mxu0 %v6487_v24  ;;  %2752 = vmatpush1.bf16.msra.mxu1 %v6490_v28 }
 0x4d5   :  { %2712 = vmatprep.subr.bf16.mxu0 %v6493_v58  ;;  %2753 = vmatprep.subr.bf16.mxu1 %v6496_v26 }
 0x4d8   :  { %2713 = vmatpush1.bf16.msra.mxu0 %v6499_v63  ;;  %2754 = vmatpush1.bf16.msra.mxu1 %v6502_v45 }
 0x4d9   :  { %2714 = vmatprep.subr.bf16.mxu0 %v6505_v57  ;;  %2755 = vmatprep.subr.bf16.mxu1 %v6508_v49 }
 0x4dc   :  { %2715 = vmatpush1.bf16.msra.mxu0 %v6511_v16  ;;  %2756 = vmatpush1.bf16.msra.mxu1 %v6514_v17 }
 0x4dd   :  { %2716 = vmatprep.subr.bf16.mxu0 %v6517_v23  ;;  %2757 = vmatprep.subr.bf16.mxu1 %v6520_v44 }
 0x4e0   :  { %2717 = vmatpush1.bf16.msra.mxu0 %v6523_v3  ;;  %2758 = vmatpush1.bf16.msra.mxu1 %v6526_v31 }
 0x4e1   :  { %2718 = vmatprep.subr.bf16.mxu0 %v6529_v47  ;;  %2759 = vmatprep.subr.bf16.mxu1 %v6532_v32 }
 0x4e4   :  { %2719 = vmatpush1.bf16.msra.mxu0 %v6535_v13  ;;  %2760 = vmatpush1.bf16.msra.mxu1 %v6538_v12 }
 0x4e5   :  { %2720 = vmatprep.subr.bf16.mxu0 %v6541_v34  ;;  %2761 = vmatprep.subr.bf16.mxu1 %v6544_v54 }
 0x4e8   :  { %2721 = vmatpush1.bf16.msra.mxu0 %v6547_v62  ;;  %2762 = vmatpush1.bf16.msra.mxu1 %v6550_v48 }
 0x4e9   :  { %2722 = vmatprep.subr.bf16.mxu0 %v6553_v50  ;;  %2763 = vmatprep.subr.bf16.mxu1 %v6556_v36 }
 0x4ec   :  { %2723 = vmatpush1.bf16.msra.mxu0 %v6559_v60  ;;  %2764 = vmatpush1.bf16.msra.mxu1 %v6562_v43 }
 0x4ed   :  { %2724 = vmatprep.subr.bf16.mxu0 %v6565_v40  ;;  %2765 = vmatprep.subr.bf16.mxu1 %v6568_v6  ;;  %v8498_v6 = vld [vmem:[#allocation17_spill] sm:$0xff] }
 0x4f0   :  { %2725 = vmatpush1.bf16.msra.mxu0 %v6571_v39  ;;  %2766 = vmatpush1.bf16.msra.mxu1 %v6574_v9  ;;  %v8497_v9 = vld [vmem:[#allocation15_spill] sm:$0xff] }
 0x4f1   :  { %2726 = vmatprep.subr.bf16.mxu0 %v6577_v19  ;;  %2767 = vmatprep.subr.bf16.mxu1 %v6580_v22  ;;  %v8496_v19 = vld [vmem:[#allocation18_spill] sm:$0xff] }
 0x4f4   :  { %2727 = vmatpush1.bf16.msra.mxu0 %v6583_v14  ;;  %2768 = vmatpush1.bf16.msra.mxu1 %v6586_v37  ;;  %v8495_v14 = vld [vmem:[#allocation16_spill] sm:$0xff] }
 0x4f5   :  { %2728 = vmatprep.subr.bf16.mxu0 %v6589_v42  ;;  %2769 = vmatprep.subr.bf16.mxu1 %v6592_v55 }
 0x4f8   :  { %2729 = vmatpush1.bf16.msra.mxu0 %v6595_v61  ;;  %2770 = vmatpush1.bf16.msra.mxu1 %v6598_v21 }
 0x4f9   :  { %2730 = vmatprep.subr.bf16.mxu0 %v6601_v0  ;;  %2771 = vmatprep.subr.bf16.mxu1 %v6604_v59  ;;  %v6619_v0 = vld [vmem:[#allocation3 + $0x3c0] sm:$0xff]  ;;  %v6622_v59 = vld [vmem:[#allocation3 + $0x3d0] sm:$0xff] }
 0x4fa   :  { %8491 = vst [vmem:[#allocation88_spill] sm:$0xff] %v6619_v0  ;;  %8492 = vst [vmem:[#allocation91_spill] sm:$0xff] %v6622_v59 }
 0x4fc   :  { %2731 = vmatpush1.bf16.msra.mxu0 %v6607_v53  ;;  %2772 = vmatpush1.bf16.msra.mxu1 %v6610_v52  ;;  %v6625_v53 = vld [vmem:[#allocation3 + $0x28] sm:$0xff]  ;;  %v6628_v52 = vld [vmem:[#allocation3 + $0x38] sm:$0xff] }
 0x4fd   :  { %2732 = vmatprep.subr.bf16.mxu0 %v6613_v25  ;;  %2773 = vmatprep.subr.bf16.mxu1 %v6616_v35  ;;  %8493 = vst [vmem:[#allocation89_spill] sm:$0xff] %v6625_v53  ;;  %8494 = vst [vmem:[#allocation94_spill] sm:$0xff] %v6628_v52 }
 0x500   :  { %2733 = vmatpush1.bf16.msra.mxu0 %v6619_v0  ;;  %2774 = vmatpush1.bf16.msra.mxu1 %v6622_v59 }
 0x501   :  { %2784 = vmatprep.subr.bf16.mxu0 %v6625_v53  ;;  %2825 = vmatprep.subr.bf16.mxu1 %v6628_v52 }
 0x556   :  { %v2518_v25 = vpop.f32.mrb[48].mxu0  ;;  %v2559_v21 = vpop.f32.mrb[48].mxu1 }
 0x557   :  { %v2520_v61 = vpop.f32.mrb[49].mxu0  ;;  %v2561_v35 = vpop.f32.mrb[49].mxu1  ;;  %v2650_v22 = vadd.f32 %v2559_v21, %v8495_v14  ;;  %v2648_v39 = vadd.f32 %v2518_v25, %v8497_v9  ;;  %v8500_v21 = vld [vmem:[#allocation47_spill] sm:$0xff] }
 0x558   :  { %v2522_v55 = vpop.f32.mrb[50].mxu0  ;;  %v2563_v42 = vpop.f32.mrb[50].mxu1  ;;  %v2651_v59 = vadd.f32 %v2561_v35, %v8496_v19  ;;  %v2649_v53 = vadd.f32 %v2520_v61, %v8498_v6  ;;  %v8501_v35 = vld [vmem:[#allocation50_spill] sm:$0xff] }
 0x559   :  { %v2523_v37 = vpop.f32.mrb[51].mxu0  ;;  %v2564_v0 = vpop.f32.mrb[51].mxu1  ;;  %v2658_v40 = vmul.f32 0.5, %v2650_v22  ;;  %v2656_v60 = vmul.f32 0.5, %v2648_v39  ;;  %v8502_v39 = vld [vmem:[#allocation49_spill] sm:$0xff] }
 0x55a   :  { %v2659_v43 = vmul.f32 0.5, %v2651_v59  ;;  %v2657_v52 = vmul.f32 0.5, %v2649_v53  ;;  %v8499_v37 = vld [vmem:[#allocation48_spill] sm:$0xff] }
 0x55b   :  { %4153 = vtanh.f32 %v2658_v40 }
 0x55c   :  { %4155 = vtanh.f32 %v2659_v43 }
 0x55d   :  { %4157 = vtanh.f32 %v2656_v60 }
 0x55e   :  { %4159 = vtanh.f32 %v2657_v52 }
 0x565   :  { %v4154_v22 = vpop.eup %4153 }
 0x566   :  { %v4156_v60 = vpop.eup %4155  ;;  %v2670_v52 = vmul.f32 0.5, %v4154_v22 }
 0x567   :  { %v4158_v59 = vpop.eup %4157 }
 0x568   :  { %v4160_v53 = vpop.eup %4159  ;;  %v2668_v48 = vmul.f32 0.5, %v4158_v59 }
 0x596   :  { %v2600_v55 = vpop.f32.mrb[52].mxu0  ;;  %v2641_v42 = vpop.f32.mrb[52].mxu1 }
 0x597   :  { %v2654_v0 = vadd.f32 %v2641_v42, %v8499_v37  ;;  %v2602_v36 = vpop.f32.mrb[53].mxu0  ;;  %v2643_v14 = vpop.f32.mrb[53].mxu1  ;;  %v2652_v19 = vadd.f32 %v2600_v55, %v8500_v21  ;;  %v2671_v37 = vmul.f32 0.5, %v4156_v60  ;;  %v2669_v55 = vmul.f32 0.5, %v4160_v53 }
 0x598   :  { %v2655_v9 = vadd.f32 %v2643_v14, %v8501_v35  ;;  %v2604_v25 = vpop.f32.mrb[54].mxu0  ;;  %v2645_v6 = vpop.f32.mrb[54].mxu1  ;;  %v2653_v61 = vadd.f32 %v2602_v36, %v8502_v39  ;;  %v2676_v21 = vadd.f32 0.5, %v2670_v52  ;;  %v2674_v35 = vadd.f32 0.5, %v2668_v48 }
 0x599   :  { %4161 = vtanh.f32 %v2654_v0  ;;  %v2605_v40 = vpop.f32.mrb[55].mxu0  ;;  %v2646_v43 = vpop.f32.mrb[55].mxu1  ;;  %v2660_v42 = vmul.f32 0.5, %v2652_v19  ;;  %v2677_v14 = vadd.f32 0.5, %v2671_v37  ;;  %v2675_v25 = vadd.f32 0.5, %v2669_v55  ;;  %v6651_v55 = vld [vmem:[#allocation3 + $0x20] sm:$0xff] }
 0x59a   :  { %4163 = vtanh.f32 %v2655_v9  ;;  %v2661_v50 = vmul.f32 0.5, %v2653_v61  ;;  %v2682_v6 = vmul.f32 %v2676_v21, %v6359_v10  ;;  %v6654_v21 = vld [vmem:[#allocation3 + $0x30] sm:$0xff] }
 0x59b   :  { %4165 = vtanh.f32 %v2660_v42  ;;  %v2683_v9 = vmul.f32 %v2677_v14, %v6361_v56  ;;  %v6657_v14 = vld [vmem:[#allocation3 + $0x68] sm:$0xff] }
 0x59c   :  { %4167 = vtanh.f32 %v2661_v50 }
 0x5a3   :  { %v4162_v0 = vpop.eup %4161 }
 0x5a4   :  { %v4164_v36 = vpop.eup %4163  ;;  %v2684_v39 = vmul.f32 %v4162_v0, %v2674_v35  ;;  %v6660_v35 = vld [vmem:[#allocation3 + $0x78] sm:$0xff]  ;;  %v6663_v0 = vld [vmem:[#allocation3 + $0x60] sm:$0xff] }
 0x5a5   :  { %v2685_v40 = vmul.f32 %v4164_v36, %v2675_v25  ;;  %v4166_v61 = vpop.eup %4165  ;;  %v6666_v25 = vld [vmem:[#allocation3 + $0x70] sm:$0xff]  ;;  %v6669_v36 = vld [vmem:[#allocation3 + $0xa8] sm:$0xff] }
 0x5a6   :  { %v6641_v22 = vadd.f32 %v2684_v39, %v2682_v6  ;;  %v4168_v50 = vpop.eup %4167  ;;  %v2672_v48 = vmul.f32 0.5, %v4166_v61  ;;  %v6672_v6 = vld [vmem:[#allocation3 + $0xb8] sm:$0xff]  ;;  %v6675_v39 = vld [vmem:[#allocation3 + $0xa0] sm:$0xff] }
 0x5a7   :  { %v6643_v19 = vadd.f32 %v2685_v40, %v2683_v9  ;;  %v2673_v43 = vmul.f32 0.5, %v4168_v50  ;;  %v6678_v9 = vld [vmem:[#allocation3 + $0xb0] sm:$0xff]  ;;  %v6681_v40 = vld [vmem:[#allocation3 + $0xe8] sm:$0xff]  ;;  %v6684_v61 = vld [vmem:[#allocation3 + $0xf8] sm:$0xff] }
 0x5a8   :  { %4169 = vtanh.f32 %v6641_v22  ;;  %v2678_v60 = vadd.f32 0.5, %v2672_v48  ;;  %v6687_v50 = vld [vmem:[#allocation3 + $0xe0] sm:$0xff]  ;;  %v6690_v48 = vld [vmem:[#allocation3 + $0xf0] sm:$0xff] }
 0x5a9   :  { %4171 = vtanh.f32 %v6643_v19  ;;  %v2679_v53 = vadd.f32 0.5, %v2673_v43  ;;  %v6693_v43 = vld [vmem:[#allocation3 + $0x128] sm:$0xff] }
 0x5b2   :  { %v4170_v59 = vpop.eup %4169 }
 0x5b3   :  { %v4172_v10 = vpop.eup %4171  ;;  %v2690_v52 = vmul.f32 %v4170_v59, %v2678_v60  ;;  %v6696_v60 = vld [vmem:[#allocation3 + $0x138] sm:$0xff]  ;;  %v6699_v59 = vld [vmem:[#allocation3 + $0x120] sm:$0xff] }
 0x5b4   :  { %v2691_v42 = vmul.f32 %v4172_v10, %v2679_v53  ;;  %8503 = vst [vmem:[#allocation92_spill] sm:$0xff] %v6699_v59  ;;  %v6702_v53 = vld [vmem:[#allocation3 + $0x130] sm:$0xff]  ;;  %v6705_v10 = vld [vmem:[#allocation3 + $0x168] sm:$0xff] }
 0x5b5   :  { %v6647_v37 = vpack.c.bf16 %v2690_v52, %v2690_v52  ;;  %8504 = vst [vmem:[#allocation95_spill] sm:$0xff] %v6702_v53  ;;  %8505 = vst [vmem:[#allocation93_spill] sm:$0xff] %v6705_v10  ;;  %v6708_v52 = vld [vmem:[#allocation3 + $0x178] sm:$0xff] }
 0x5b6   :  { %v2701_v56 = vpack.c.bf16 %v2691_v42, %v2691_v42  ;;  %8506 = vst [vmem:[#allocation98_spill] sm:$0xff] %v6708_v52  ;;  %v6711_v42 = vld [vmem:[#allocation3 + $0x160] sm:$0xff] }
 0x5b7   :  { %8507 = vst [vmem:[#allocation96_spill] sm:$0xff] %v6711_v42 }
 0x5b8   :  { %2734 = vmatprep.mubr.bf16.mxu0 %v2701_v56  ;;  %2775 = vmatprep.mubr.bf16.mxu1 %v2701_v56 }
 0x5b9   :  { %2735 = vmatmul.mubr.bf16.vlgmr.msra.gmra.mrb[56].mxu0 %v6647_v37  ;;  %2776 = vmatmul.mubr.bf16.vlgmr.msra.gmra.mrb[56].mxu1 %v6647_v37 }
 0x5ba   :  { %2785 = vmatpush1.bf16.msra.mxu0 %v6651_v55  ;;  %2826 = vmatpush1.bf16.msra.mxu1 %v6654_v21 }
 0x5bb   :  { %2816 = vmatprep.mubr.bf16.mxu0 %v2701_v56  ;;  %2857 = vmatprep.mubr.bf16.mxu1 %v2701_v56  ;;  %v6714_v56 = vld [vmem:[#allocation3 + $0x170] sm:$0xff] }
 0x5bc   :  { %2786 = vmatprep.subr.bf16.mxu0 %v6657_v14  ;;  %2827 = vmatprep.subr.bf16.mxu1 %v6660_v35  ;;  %8508 = vst [vmem:[#allocation99_spill] sm:$0xff] %v6714_v56 }
 0x5be   :  { %2787 = vmatpush1.bf16.msra.mxu0 %v6663_v0  ;;  %2828 = vmatpush1.bf16.msra.mxu1 %v6666_v25 }
 0x5bf   :  { %2788 = vmatprep.subr.bf16.mxu0 %v6669_v36  ;;  %2829 = vmatprep.subr.bf16.mxu1 %v6672_v6 }
 0x5c2   :  { %2789 = vmatpush1.bf16.msra.mxu0 %v6675_v39  ;;  %2830 = vmatpush1.bf16.msra.mxu1 %v6678_v9 }
 0x5c3   :  { %2790 = vmatprep.subr.bf16.mxu0 %v6681_v40  ;;  %2831 = vmatprep.subr.bf16.mxu1 %v6684_v61 }
 0x5c6   :  { %2791 = vmatpush1.bf16.msra.mxu0 %v6687_v50  ;;  %2832 = vmatpush1.bf16.msra.mxu1 %v6690_v48 }
 0x5c7   :  { %2792 = vmatprep.subr.bf16.mxu0 %v6693_v43  ;;  %2833 = vmatprep.subr.bf16.mxu1 %v6696_v60 }
 0x5ca   :  { %2793 = vmatpush1.bf16.msra.mxu0 %v6699_v59  ;;  %2834 = vmatpush1.bf16.msra.mxu1 %v6702_v53  ;;  %v6717_v59 = vld [vmem:[#allocation3 + $0x1a8] sm:$0xff]  ;;  %v6720_v53 = vld [vmem:[#allocation3 + $0x1b8] sm:$0xff] }
 0x5cb   :  { %2794 = vmatprep.subr.bf16.mxu0 %v6705_v10  ;;  %2835 = vmatprep.subr.bf16.mxu1 %v6708_v52  ;;  %8509 = vst [vmem:[#allocation97_spill] sm:$0xff] %v6717_v59  ;;  %8510 = vst [vmem:[#allocation102_spill] sm:$0xff] %v6720_v53  ;;  %v6723_v10 = vld [vmem:[#allocation3 + $0x1a0] sm:$0xff]  ;;  %v6726_v52 = vld [vmem:[#allocation3 + $0x1b0] sm:$0xff] }
 0x5cc   :  { %8511 = vst [vmem:[#allocation100_spill] sm:$0xff] %v6723_v10  ;;  %8512 = vst [vmem:[#allocation103_spill] sm:$0xff] %v6726_v52 }
 0x5ce   :  { %2795 = vmatpush1.bf16.msra.mxu0 %v6711_v42  ;;  %2836 = vmatpush1.bf16.msra.mxu1 %v6714_v56  ;;  %v6729_v42 = vld [vmem:[#allocation3 + $0x1e8] sm:$0xff]  ;;  %v6732_v56 = vld [vmem:[#allocation3 + $0x1f8] sm:$0xff] }
 0x5cf   :  { %2796 = vmatprep.subr.bf16.mxu0 %v6717_v59  ;;  %2837 = vmatprep.subr.bf16.mxu1 %v6720_v53  ;;  %8513 = vst [vmem:[#allocation101_spill] sm:$0xff] %v6729_v42  ;;  %8514 = vst [vmem:[#allocation12_spill] sm:$0xff] %v6732_v56  ;;  %v6735_v59 = vld [vmem:[#allocation3 + $0x1e0] sm:$0xff]  ;;  %v6738_v53 = vld [vmem:[#allocation3 + $0x1f0] sm:$0xff] }
 0x5d0   :  { %8515 = vst [vmem:[#allocation14_spill] sm:$0xff] %v6735_v59  ;;  %8516 = vst [vmem:[#allocation11_spill] sm:$0xff] %v6738_v53 }
 0x5d2   :  { %2797 = vmatpush1.bf16.msra.mxu0 %v6723_v10  ;;  %2838 = vmatpush1.bf16.msra.mxu1 %v6726_v52  ;;  %v6741_v10 = vld [vmem:[#allocation3 + $0x228] sm:$0xff]  ;;  %v6744_v52 = vld [vmem:[#allocation3 + $0x238] sm:$0xff] }
 0x5d3   :  { %2798 = vmatprep.subr.bf16.mxu0 %v6729_v42  ;;  %2839 = vmatprep.subr.bf16.mxu1 %v6732_v56  ;;  %8517 = vst [vmem:[#allocation13_spill] sm:$0xff] %v6741_v10  ;;  %8518 = vst [vmem:[#allocation44_spill] sm:$0xff] %v6744_v52  ;;  %v6747_v42 = vld [vmem:[#allocation3 + $0x220] sm:$0xff]  ;;  %v6750_v56 = vld [vmem:[#allocation3 + $0x230] sm:$0xff] }
 0x5d4   :  { %8519 = vst [vmem:[#allocation43_spill] sm:$0xff] %v6747_v42  ;;  %8520 = vst [vmem:[#allocation46_spill] sm:$0xff] %v6750_v56 }
 0x5d6   :  { %2799 = vmatpush1.bf16.msra.mxu0 %v6735_v59  ;;  %2840 = vmatpush1.bf16.msra.mxu1 %v6738_v53  ;;  %v6753_v59 = vld [vmem:[#allocation3 + $0x268] sm:$0xff]  ;;  %v6756_v53 = vld [vmem:[#allocation3 + $0x278] sm:$0xff] }
 0x5d7   :  { %2800 = vmatprep.subr.bf16.mxu0 %v6741_v10  ;;  %2841 = vmatprep.subr.bf16.mxu1 %v6744_v52  ;;  %8521 = vst [vmem:[#allocation45_spill] sm:$0xff] %v6753_v59  ;;  %8522 = vst [vmem:[#allocation114_spill] sm:$0xff] %v6756_v53  ;;  %v6759_v10 = vld [vmem:[#allocation3 + $0x260] sm:$0xff]  ;;  %v6762_v52 = vld [vmem:[#allocation3 + $0x270] sm:$0xff] }
 0x5d8   :  { %8523 = vst [vmem:[#allocation112_spill] sm:$0xff] %v6759_v10  ;;  %8524 = vst [vmem:[#allocation115_spill] sm:$0xff] %v6762_v52 }
 0x5da   :  { %2801 = vmatpush1.bf16.msra.mxu0 %v6747_v42  ;;  %2842 = vmatpush1.bf16.msra.mxu1 %v6750_v56  ;;  %v6765_v42 = vld [vmem:[#allocation3 + $0x2a8] sm:$0xff]  ;;  %v6768_v56 = vld [vmem:[#allocation3 + $0x2b8] sm:$0xff] }
 0x5db   :  { %2802 = vmatprep.subr.bf16.mxu0 %v6753_v59  ;;  %2843 = vmatprep.subr.bf16.mxu1 %v6756_v53  ;;  %8525 = vst [vmem:[#allocation113_spill] sm:$0xff] %v6765_v42  ;;  %8526 = vst [vmem:[#allocation118_spill] sm:$0xff] %v6768_v56  ;;  %v6771_v59 = vld [vmem:[#allocation3 + $0x2a0] sm:$0xff]  ;;  %v6774_v53 = vld [vmem:[#allocation3 + $0x2b0] sm:$0xff] }
 0x5dc   :  { %8527 = vst [vmem:[#allocation116_spill] sm:$0xff] %v6771_v59  ;;  %8528 = vst [vmem:[#allocation119_spill] sm:$0xff] %v6774_v53 }
 0x5de   :  { %2803 = vmatpush1.bf16.msra.mxu0 %v6759_v10  ;;  %2844 = vmatpush1.bf16.msra.mxu1 %v6762_v52  ;;  %v6777_v10 = vld [vmem:[#allocation3 + $0x2e8] sm:$0xff]  ;;  %v6780_v52 = vld [vmem:[#allocation3 + $0x2f8] sm:$0xff] }
 0x5df   :  { %2804 = vmatprep.subr.bf16.mxu0 %v6765_v42  ;;  %2845 = vmatprep.subr.bf16.mxu1 %v6768_v56  ;;  %8529 = vst [vmem:[#allocation117_spill] sm:$0xff] %v6777_v10  ;;  %8530 = vst [vmem:[#allocation122_spill] sm:$0xff] %v6780_v52  ;;  %v6783_v42 = vld [vmem:[#allocation3 + $0x2e0] sm:$0xff]  ;;  %v6786_v56 = vld [vmem:[#allocation3 + $0x2f0] sm:$0xff] }
 0x5e0   :  { %8531 = vst [vmem:[#allocation120_spill] sm:$0xff] %v6783_v42  ;;  %8532 = vst [vmem:[#allocation123_spill] sm:$0xff] %v6786_v56 }
 0x5e2   :  { %2805 = vmatpush1.bf16.msra.mxu0 %v6771_v59  ;;  %2846 = vmatpush1.bf16.msra.mxu1 %v6774_v53  ;;  %v6789_v59 = vld [vmem:[#allocation3 + $0x328] sm:$0xff]  ;;  %v6792_v53 = vld [vmem:[#allocation3 + $0x338] sm:$0xff] }
 0x5e3   :  { %2806 = vmatprep.subr.bf16.mxu0 %v6777_v10  ;;  %2847 = vmatprep.subr.bf16.mxu1 %v6780_v52  ;;  %8533 = vst [vmem:[#allocation121_spill] sm:$0xff] %v6789_v59  ;;  %8534 = vst [vmem:[#allocation126_spill] sm:$0xff] %v6792_v53  ;;  %v6795_v10 = vld [vmem:[#allocation3 + $0x320] sm:$0xff]  ;;  %v6798_v52 = vld [vmem:[#allocation3 + $0x330] sm:$0xff] }
 0x5e4   :  { %8535 = vst [vmem:[#allocation124_spill] sm:$0xff] %v6795_v10  ;;  %8536 = vst [vmem:[#allocation127_spill] sm:$0xff] %v6798_v52 }
 0x5e6   :  { %2807 = vmatpush1.bf16.msra.mxu0 %v6783_v42  ;;  %2848 = vmatpush1.bf16.msra.mxu1 %v6786_v56  ;;  %v6801_v42 = vld [vmem:[#allocation3 + $0x368] sm:$0xff]  ;;  %v6804_v56 = vld [vmem:[#allocation3 + $0x378] sm:$0xff] }
 0x5e7   :  { %2808 = vmatprep.subr.bf16.mxu0 %v6789_v59  ;;  %2849 = vmatprep.subr.bf16.mxu1 %v6792_v53  ;;  %8537 = vst [vmem:[#allocation125_spill] sm:$0xff] %v6801_v42  ;;  %8538 = vst [vmem:[#allocation130_spill] sm:$0xff] %v6804_v56  ;;  %v6807_v59 = vld [vmem:[#allocation3 + $0x360] sm:$0xff]  ;;  %v6810_v53 = vld [vmem:[#allocation3 + $0x370] sm:$0xff] }
 0x5e8   :  { %8539 = vst [vmem:[#allocation128_spill] sm:$0xff] %v6807_v59  ;;  %8540 = vst [vmem:[#allocation131_spill] sm:$0xff] %v6810_v53 }
 0x5ea   :  { %2809 = vmatpush1.bf16.msra.mxu0 %v6795_v10  ;;  %2850 = vmatpush1.bf16.msra.mxu1 %v6798_v52  ;;  %v6813_v10 = vld [vmem:[#allocation3 + $0x3a8] sm:$0xff]  ;;  %v6816_v52 = vld [vmem:[#allocation3 + $0x3b8] sm:$0xff] }
 0x5eb   :  { %2810 = vmatprep.subr.bf16.mxu0 %v6801_v42  ;;  %2851 = vmatprep.subr.bf16.mxu1 %v6804_v56  ;;  %8541 = vst [vmem:[#allocation129_spill] sm:$0xff] %v6813_v10  ;;  %8542 = vst [vmem:[#allocation134_spill] sm:$0xff] %v6816_v52  ;;  %v6819_v42 = vld [vmem:[#allocation3 + $0x3a0] sm:$0xff]  ;;  %v6822_v56 = vld [vmem:[#allocation3 + $0x3b0] sm:$0xff] }
 0x5ec   :  { %8543 = vst [vmem:[#allocation132_spill] sm:$0xff] %v6822_v56 }
 0x5ee   :  { %2811 = vmatpush1.bf16.msra.mxu0 %v6807_v59  ;;  %2852 = vmatpush1.bf16.msra.mxu1 %v6810_v53  ;;  %v6825_v59 = vld [vmem:[#allocation3 + $0x3e8] sm:$0xff]  ;;  %v6828_v53 = vld [vmem:[#allocation3 + $0x3f8] sm:$0xff] }
 0x5ef   :  { %2812 = vmatprep.subr.bf16.mxu0 %v6813_v10  ;;  %2853 = vmatprep.subr.bf16.mxu1 %v6816_v52  ;;  %8544 = vst [vmem:[#allocation135_spill] sm:$0xff] %v6825_v59  ;;  %8545 = vst [vmem:[#allocation133_spill] sm:$0xff] %v6828_v53  ;;  %v6831_v10 = vld [vmem:[#allocation3 + $0x3e0] sm:$0xff]  ;;  %v6834_v52 = vld [vmem:[#allocation3 + $0x3f0] sm:$0xff] }
 0x5f0   :  { %8546 = vst [vmem:[#allocation138_spill] sm:$0xff] %v6831_v10  ;;  %8547 = vst [vmem:[#allocation136_spill] sm:$0xff] %v6834_v52 }
 0x5f2   :  { %2813 = vmatpush1.bf16.msra.mxu0 %v6819_v42  ;;  %2854 = vmatpush1.bf16.msra.mxu1 %v6822_v56 }
 0x5f3   :  { %2814 = vmatprep.subr.bf16.mxu0 %v6825_v59  ;;  %2855 = vmatprep.subr.bf16.mxu1 %v6828_v53 }
 0x5f6   :  { %2815 = vmatpush1.bf16.msra.mxu0 %v6831_v10  ;;  %2856 = vmatpush1.bf16.msra.mxu1 %v6834_v52 }
 0x5f7   :  { %2920 = vmatprep.subr.bf16.mxu0 %v6431_v20  ;;  %2961 = vmatprep.subr.bf16.mxu1 %v6434_v7 }
 0x5f9   :  { %2817 = vmatmul.mubr.bf16.vlgmr.msra.gmra.mrb[60].mxu0 %v6647_v37  ;;  %2858 = vmatmul.mubr.bf16.vlgmr.msra.gmra.mrb[60].mxu1 %v6647_v37  ;;  %v8548_v37 = vld [vmem:[#allocation154_spill] sm:$0xff] }
 0x5fa   :  { %2921 = vmatpush1.bf16.msra.mxu0 %v6439_v4  ;;  %2962 = vmatpush1.bf16.msra.mxu1 %v6442_v8 }
 0x5fb   :  { %2922 = vmatprep.subr.bf16.mxu0 %v6445_v11  ;;  %2963 = vmatprep.subr.bf16.mxu1 %v6448_v15 }
 0x5fe   :  { %2923 = vmatpush1.bf16.msra.mxu0 %v6451_v29  ;;  %2964 = vmatpush1.bf16.msra.mxu1 %v6454_v33 }
 0x5ff   :  { %2924 = vmatprep.subr.bf16.mxu0 %v6457_v2  ;;  %2965 = vmatprep.subr.bf16.mxu1 %v6460_v38 }
 0x602   :  { %2925 = vmatpush1.bf16.msra.mxu0 %v6463_v18  ;;  %2966 = vmatpush1.bf16.msra.mxu1 %v6466_v41 }
 0x603   :  { %2926 = vmatprep.subr.bf16.mxu0 %v6469_v30  ;;  %2967 = vmatprep.subr.bf16.mxu1 %v6472_v1 }
 0x606   :  { %2927 = vmatpush1.bf16.msra.mxu0 %v6475_v5  ;;  %2968 = vmatpush1.bf16.msra.mxu1 %v6478_v27 }
 0x607   :  { %2928 = vmatprep.subr.bf16.mxu0 %v6481_v51  ;;  %2969 = vmatprep.subr.bf16.mxu1 %v6484_v46 }
 0x60a   :  { %2929 = vmatpush1.bf16.msra.mxu0 %v6487_v24  ;;  %2970 = vmatpush1.bf16.msra.mxu1 %v6490_v28 }
 0x60b   :  { %2930 = vmatprep.subr.bf16.mxu0 %v6493_v58  ;;  %2971 = vmatprep.subr.bf16.mxu1 %v6496_v26 }
 0x60e   :  { %2931 = vmatpush1.bf16.msra.mxu0 %v6499_v63  ;;  %2972 = vmatpush1.bf16.msra.mxu1 %v6502_v45  ;;  %v8577_v45 = vld [vmem:[#allocation19_spill] sm:$0xff]  ;;  %v8578_v63 = vld [vmem:[#allocation21_spill] sm:$0xff] }
 0x60f   :  { %2932 = vmatprep.subr.bf16.mxu0 %v6505_v57  ;;  %2973 = vmatprep.subr.bf16.mxu1 %v6508_v49  ;;  %v8575_v49 = vld [vmem:[#allocation20_spill] sm:$0xff]  ;;  %v8576_v57 = vld [vmem:[#allocation22_spill] sm:$0xff] }
 0x612   :  { %2933 = vmatpush1.bf16.msra.mxu0 %v6511_v16  ;;  %2974 = vmatpush1.bf16.msra.mxu1 %v6514_v17 }
 0x613   :  { %2934 = vmatprep.subr.bf16.mxu0 %v6517_v23  ;;  %2975 = vmatprep.subr.bf16.mxu1 %v6520_v44  ;;  %v8549_v44 = vld [vmem:[#allocation152_spill] sm:$0xff] }
 0x616   :  { %2935 = vmatpush1.bf16.msra.mxu0 %v6523_v3  ;;  %2976 = vmatpush1.bf16.msra.mxu1 %v6526_v31  ;;  %v8550_v3 = vld [vmem:[#allocation155_spill] sm:$0xff]  ;;  %v8551_v31 = vld [vmem:[#allocation153_spill] sm:$0xff] }
 0x617   :  { %2936 = vmatprep.subr.bf16.mxu0 %v6529_v47  ;;  %2977 = vmatprep.subr.bf16.mxu1 %v6532_v32  ;;  %v8552_v47 = vld [vmem:[#allocation156_spill] sm:$0xff]  ;;  %v8553_v32 = vld [vmem:[#allocation71_spill] sm:$0xff] }
 0x61a   :  { %2937 = vmatpush1.bf16.msra.mxu0 %v6535_v13  ;;  %2978 = vmatpush1.bf16.msra.mxu1 %v6538_v12  ;;  %v8554_v13 = vld [vmem:[#allocation74_spill] sm:$0xff]  ;;  %v8555_v12 = vld [vmem:[#allocation72_spill] sm:$0xff] }
 0x61b   :  { %2938 = vmatprep.subr.bf16.mxu0 %v6541_v34  ;;  %2979 = vmatprep.subr.bf16.mxu1 %v6544_v54  ;;  %v8556_v34 = vld [vmem:[#allocation75_spill] sm:$0xff]  ;;  %v8557_v54 = vld [vmem:[#allocation73_spill] sm:$0xff] }
 0x61e   :  { %2939 = vmatpush1.bf16.msra.mxu0 %v6547_v62  ;;  %2980 = vmatpush1.bf16.msra.mxu1 %v8548_v37  ;;  %v8558_v62 = vld [vmem:[#allocation78_spill] sm:$0xff]  ;;  %v8559_v37 = vld [vmem:[#allocation76_spill] sm:$0xff] }
 0x61f   :  { %2940 = vmatprep.subr.bf16.mxu0 %v8549_v44  ;;  %2981 = vmatprep.subr.bf16.mxu1 %v8550_v3  ;;  %v8560_v44 = vld [vmem:[#allocation79_spill] sm:$0xff]  ;;  %v8561_v3 = vld [vmem:[#allocation77_spill] sm:$0xff] }
 0x622   :  { %2941 = vmatpush1.bf16.msra.mxu0 %v8551_v31  ;;  %2982 = vmatpush1.bf16.msra.mxu1 %v8552_v47  ;;  %v8562_v31 = vld [vmem:[#allocation82_spill] sm:$0xff]  ;;  %v8563_v47 = vld [vmem:[#allocation80_spill] sm:$0xff] }
 0x623   :  { %2942 = vmatprep.subr.bf16.mxu0 %v8553_v32  ;;  %2983 = vmatprep.subr.bf16.mxu1 %v8554_v13  ;;  %v8564_v32 = vld [vmem:[#allocation84_spill] sm:$0xff]  ;;  %v8565_v13 = vld [vmem:[#allocation81_spill] sm:$0xff] }
 0x626   :  { %2943 = vmatpush1.bf16.msra.mxu0 %v8555_v12  ;;  %2984 = vmatpush1.bf16.msra.mxu1 %v8556_v34  ;;  %v8566_v12 = vld [vmem:[#allocation86_spill] sm:$0xff]  ;;  %v8567_v34 = vld [vmem:[#allocation83_spill] sm:$0xff] }
 0x627   :  { %2944 = vmatprep.subr.bf16.mxu0 %v8557_v54  ;;  %2985 = vmatprep.subr.bf16.mxu1 %v8558_v62  ;;  %v8568_v54 = vld [vmem:[#allocation87_spill] sm:$0xff]  ;;  %v8569_v62 = vld [vmem:[#allocation85_spill] sm:$0xff] }
 0x62a   :  { %2945 = vmatpush1.bf16.msra.mxu0 %v8559_v37  ;;  %2986 = vmatpush1.bf16.msra.mxu1 %v8560_v44  ;;  %v8570_v37 = vld [vmem:[#allocation90_spill] sm:$0xff]  ;;  %v8571_v44 = vld [vmem:[#allocation88_spill] sm:$0xff] }
 0x62b   :  { %2946 = vmatprep.subr.bf16.mxu0 %v8561_v3  ;;  %2987 = vmatprep.subr.bf16.mxu1 %v8562_v31  ;;  %v8572_v3 = vld [vmem:[#allocation91_spill] sm:$0xff]  ;;  %v8573_v31 = vld [vmem:[#allocation89_spill] sm:$0xff] }
 0x62e   :  { %2947 = vmatpush1.bf16.msra.mxu0 %v8563_v47  ;;  %2988 = vmatpush1.bf16.msra.mxu1 %v8564_v32  ;;  %v8574_v47 = vld [vmem:[#allocation94_spill] sm:$0xff] }
 0x62f   :  { %2948 = vmatprep.subr.bf16.mxu0 %v8565_v13  ;;  %2989 = vmatprep.subr.bf16.mxu1 %v8566_v12 }
 0x632   :  { %2949 = vmatpush1.bf16.msra.mxu0 %v8567_v34  ;;  %2990 = vmatpush1.bf16.msra.mxu1 %v8568_v54 }
 0x633   :  { %2950 = vmatprep.subr.bf16.mxu0 %v8569_v62  ;;  %2991 = vmatprep.subr.bf16.mxu1 %v8570_v37 }
 0x636   :  { %2951 = vmatpush1.bf16.msra.mxu0 %v8571_v44  ;;  %2992 = vmatpush1.bf16.msra.mxu1 %v8572_v3 }
 0x637   :  { %3002 = vmatprep.subr.bf16.mxu0 %v8573_v31  ;;  %3043 = vmatprep.subr.bf16.mxu1 %v8574_v47 }
 0x68c   :  { %v2736_v32 = vpop.f32.mrb[56].mxu0  ;;  %v2777_v13 = vpop.f32.mrb[56].mxu1 }
 0x68d   :  { %v2738_v23 = vpop.f32.mrb[57].mxu0  ;;  %v2779_v12 = vpop.f32.mrb[57].mxu1  ;;  %v2868_v62 = vadd.f32 %v2777_v13, %v8575_v49  ;;  %v2866_v44 = vadd.f32 %v2736_v32, %v8577_v45  ;;  %v8580_v13 = vld [vmem:[#allocation51_spill] sm:$0xff] }
 0x68e   :  { %v2740_v17 = vpop.f32.mrb[58].mxu0  ;;  %v2781_v34 = vpop.f32.mrb[58].mxu1  ;;  %v2869_v37 = vadd.f32 %v2779_v12, %v8576_v57  ;;  %v2867_v3 = vadd.f32 %v2738_v23, %v8578_v63  ;;  %v8581_v12 = vld [vmem:[#allocation54_spill] sm:$0xff] }
 0x68f   :  { %v2741_v16 = vpop.f32.mrb[59].mxu0  ;;  %v2782_v54 = vpop.f32.mrb[59].mxu1  ;;  %v2876_v26 = vmul.f32 0.5, %v2868_v62  ;;  %v2874_v58 = vmul.f32 0.5, %v2866_v44  ;;  %v8582_v44 = vld [vmem:[#allocation53_spill] sm:$0xff] }
 0x690   :  { %v2877_v31 = vmul.f32 0.5, %v2869_v37  ;;  %v2875_v47 = vmul.f32 0.5, %v2867_v3  ;;  %v8579_v16 = vld [vmem:[#allocation52_spill] sm:$0xff] }
 0x691   :  { %4173 = vtanh.f32 %v2876_v26 }
 0x692   :  { %4175 = vtanh.f32 %v2877_v31 }
 0x693   :  { %4177 = vtanh.f32 %v2874_v58 }
 0x694   :  { %4179 = vtanh.f32 %v2875_v47 }
 0x69b   :  { %v4174_v23 = vpop.eup %4173 }
 0x69c   :  { %v4176_v58 = vpop.eup %4175  ;;  %v2888_v37 = vmul.f32 0.5, %v4174_v23 }
 0x69d   :  { %v4178_v47 = vpop.eup %4177 }
 0x69e   :  { %v4180_v62 = vpop.eup %4179  ;;  %v2886_v46 = vmul.f32 0.5, %v4178_v47 }
 0x6cc   :  { %v2818_v17 = vpop.f32.mrb[60].mxu0  ;;  %v2859_v34 = vpop.f32.mrb[60].mxu1 }
 0x6cd   :  { %v2872_v54 = vadd.f32 %v2859_v34, %v8579_v16  ;;  %v2820_v28 = vpop.f32.mrb[61].mxu0  ;;  %v2861_v49 = vpop.f32.mrb[61].mxu1  ;;  %v2870_v57 = vadd.f32 %v2818_v17, %v8580_v13  ;;  %v2889_v16 = vmul.f32 0.5, %v4176_v58  ;;  %v2887_v17 = vmul.f32 0.5, %v4180_v62 }
 0x6ce   :  { %v2873_v45 = vadd.f32 %v2861_v49, %v8581_v12  ;;  %v2822_v32 = vpop.f32.mrb[62].mxu0  ;;  %v2863_v63 = vpop.f32.mrb[62].mxu1  ;;  %v2871_v3 = vadd.f32 %v2820_v28, %v8582_v44  ;;  %v2894_v13 = vadd.f32 0.5, %v2888_v37  ;;  %v2892_v12 = vadd.f32 0.5, %v2886_v46 }
 0x6cf   :  { %4181 = vtanh.f32 %v2872_v54  ;;  %v2823_v26 = vpop.f32.mrb[63].mxu0  ;;  %v2864_v31 = vpop.f32.mrb[63].mxu1  ;;  %v2878_v34 = vmul.f32 0.5, %v2870_v57  ;;  %v2895_v49 = vadd.f32 0.5, %v2889_v16  ;;  %v2893_v32 = vadd.f32 0.5, %v2887_v17  ;;  %v8583_v17 = vld [vmem:[#allocation92_spill] sm:$0xff] }
 0x6d0   :  { %4183 = vtanh.f32 %v2873_v45  ;;  %v2879_v24 = vmul.f32 0.5, %v2871_v3  ;;  %v2900_v63 = vmul.f32 %v2894_v13, %v6641_v22  ;;  %v8584_v13 = vld [vmem:[#allocation95_spill] sm:$0xff] }
 0x6d1   :  { %4185 = vtanh.f32 %v2878_v34  ;;  %v2901_v45 = vmul.f32 %v2895_v49, %v6643_v19  ;;  %v8585_v49 = vld [vmem:[#allocation93_spill] sm:$0xff] }
 0x6d2   :  { %4187 = vtanh.f32 %v2879_v24 }
 0x6d9   :  { %v4182_v54 = vpop.eup %4181 }
 0x6da   :  { %v4184_v28 = vpop.eup %4183  ;;  %v2902_v44 = vmul.f32 %v4182_v54, %v2892_v12  ;;  %v8586_v12 = vld [vmem:[#allocation98_spill] sm:$0xff]  ;;  %v8587_v54 = vld [vmem:[#allocation96_spill] sm:$0xff] }
 0x6db   :  { %v2903_v26 = vmul.f32 %v4184_v28, %v2893_v32  ;;  %v4186_v3 = vpop.eup %4185  ;;  %v8588_v32 = vld [vmem:[#allocation99_spill] sm:$0xff]  ;;  %v8589_v28 = vld [vmem:[#allocation97_spill] sm:$0xff] }
 0x6dc   :  { %v6915_v23 = vadd.f32 %v2902_v44, %v2900_v63  ;;  %v4188_v24 = vpop.eup %4187  ;;  %v2890_v46 = vmul.f32 0.5, %v4186_v3  ;;  %v8590_v63 = vld [vmem:[#allocation102_spill] sm:$0xff]  ;;  %v8591_v44 = vld [vmem:[#allocation100_spill] sm:$0xff] }
 0x6dd   :  { %v6917_v57 = vadd.f32 %v2903_v26, %v2901_v45  ;;  %v2891_v31 = vmul.f32 0.5, %v4188_v24  ;;  %v8592_v45 = vld [vmem:[#allocation103_spill] sm:$0xff]  ;;  %v8593_v26 = vld [vmem:[#allocation101_spill] sm:$0xff]  ;;  %v8594_v3 = vld [vmem:[#allocation12_spill] sm:$0xff] }
 0x6de   :  { %4189 = vtanh.f32 %v6915_v23  ;;  %v2896_v58 = vadd.f32 0.5, %v2890_v46  ;;  %v8595_v24 = vld [vmem:[#allocation14_spill] sm:$0xff]  ;;  %v8596_v46 = vld [vmem:[#allocation11_spill] sm:$0xff] }
 0x6df   :  { %4191 = vtanh.f32 %v6917_v57  ;;  %v2897_v62 = vadd.f32 0.5, %v2891_v31  ;;  %v8597_v31 = vld [vmem:[#allocation13_spill] sm:$0xff] }
 0x6e8   :  { %v4190_v47 = vpop.eup %4189 }
 0x6e9   :  { %v4192_v22 = vpop.eup %4191  ;;  %v2908_v37 = vmul.f32 %v4190_v47, %v2896_v58  ;;  %v8598_v58 = vld [vmem:[#allocation44_spill] sm:$0xff]  ;;  %v8599_v47 = vld [vmem:[#allocation43_spill] sm:$0xff] }
 0x6ea   :  { %v2909_v34 = vmul.f32 %v4192_v22, %v2897_v62  ;;  %v8600_v62 = vld [vmem:[#allocation46_spill] sm:$0xff]  ;;  %v8601_v22 = vld [vmem:[#allocation45_spill] sm:$0xff] }
 0x6eb   :  { %v6921_v16 = vpack.c.bf16 %v2908_v37, %v2908_v37  ;;  %v8602_v37 = vld [vmem:[#allocation114_spill] sm:$0xff] }
 0x6ec   :  { %v2919_v19 = vpack.c.bf16 %v2909_v34, %v2909_v34  ;;  %v8603_v34 = vld [vmem:[#allocation112_spill] sm:$0xff] }
 0x6ee   :  { %2952 = vmatprep.mubr.bf16.mxu0 %v2919_v19  ;;  %2993 = vmatprep.mubr.bf16.mxu1 %v2919_v19 }
 0x6ef   :  { %2953 = vmatmul.mubr.bf16.vlgmr.msra.gmra.mrb[64].mxu0 %v6921_v16  ;;  %2994 = vmatmul.mubr.bf16.vlgmr.msra.gmra.mrb[64].mxu1 %v6921_v16 }
 0x6f0   :  { %3003 = vmatpush1.bf16.msra.mxu0 %v6651_v55  ;;  %3044 = vmatpush1.bf16.msra.mxu1 %v6654_v21 }
 0x6f1   :  { %3034 = vmatprep.mubr.bf16.mxu0 %v2919_v19  ;;  %3075 = vmatprep.mubr.bf16.mxu1 %v2919_v19  ;;  %v8604_v19 = vld [vmem:[#allocation115_spill] sm:$0xff] }
 0x6f2   :  { %3004 = vmatprep.subr.bf16.mxu0 %v6657_v14  ;;  %3045 = vmatprep.subr.bf16.mxu1 %v6660_v35 }
 0x6f4   :  { %3005 = vmatpush1.bf16.msra.mxu0 %v6663_v0  ;;  %3046 = vmatpush1.bf16.msra.mxu1 %v6666_v25 }
 0x6f5   :  { %3006 = vmatprep.subr.bf16.mxu0 %v6669_v36  ;;  %3047 = vmatprep.subr.bf16.mxu1 %v6672_v6 }
 0x6f8   :  { %3007 = vmatpush1.bf16.msra.mxu0 %v6675_v39  ;;  %3048 = vmatpush1.bf16.msra.mxu1 %v6678_v9 }
 0x6f9   :  { %3008 = vmatprep.subr.bf16.mxu0 %v6681_v40  ;;  %3049 = vmatprep.subr.bf16.mxu1 %v6684_v61 }
 0x6fc   :  { %3009 = vmatpush1.bf16.msra.mxu0 %v6687_v50  ;;  %3050 = vmatpush1.bf16.msra.mxu1 %v6690_v48 }
 0x6fd   :  { %3010 = vmatprep.subr.bf16.mxu0 %v6693_v43  ;;  %3051 = vmatprep.subr.bf16.mxu1 %v6696_v60 }
 0x700   :  { %3011 = vmatpush1.bf16.msra.mxu0 %v8583_v17  ;;  %3052 = vmatpush1.bf16.msra.mxu1 %v8584_v13 }
 0x701   :  { %3012 = vmatprep.subr.bf16.mxu0 %v8585_v49  ;;  %3053 = vmatprep.subr.bf16.mxu1 %v8586_v12 }
 0x704   :  { %3013 = vmatpush1.bf16.msra.mxu0 %v8587_v54  ;;  %3054 = vmatpush1.bf16.msra.mxu1 %v8588_v32 }
 0x705   :  { %3014 = vmatprep.subr.bf16.mxu0 %v8589_v28  ;;  %3055 = vmatprep.subr.bf16.mxu1 %v8590_v63 }
 0x708   :  { %3015 = vmatpush1.bf16.msra.mxu0 %v8591_v44  ;;  %3056 = vmatpush1.bf16.msra.mxu1 %v8592_v45 }
 0x709   :  { %3016 = vmatprep.subr.bf16.mxu0 %v8593_v26  ;;  %3057 = vmatprep.subr.bf16.mxu1 %v8594_v3  ;;  %v8605_v3 = vld [vmem:[#allocation113_spill] sm:$0xff] }
 0x70c   :  { %3017 = vmatpush1.bf16.msra.mxu0 %v8595_v24  ;;  %3058 = vmatpush1.bf16.msra.mxu1 %v8596_v46  ;;  %v8606_v24 = vld [vmem:[#allocation118_spill] sm:$0xff]  ;;  %v8607_v46 = vld [vmem:[#allocation116_spill] sm:$0xff] }
 0x70d   :  { %3018 = vmatprep.subr.bf16.mxu0 %v8597_v31  ;;  %3059 = vmatprep.subr.bf16.mxu1 %v8598_v58  ;;  %v8608_v31 = vld [vmem:[#allocation119_spill] sm:$0xff]  ;;  %v8609_v58 = vld [vmem:[#allocation117_spill] sm:$0xff] }
 0x710   :  { %3019 = vmatpush1.bf16.msra.mxu0 %v8599_v47  ;;  %3060 = vmatpush1.bf16.msra.mxu1 %v8600_v62  ;;  %v8610_v47 = vld [vmem:[#allocation122_spill] sm:$0xff]  ;;  %v8611_v62 = vld [vmem:[#allocation120_spill] sm:$0xff] }
 0x711   :  { %3020 = vmatprep.subr.bf16.mxu0 %v8601_v22  ;;  %3061 = vmatprep.subr.bf16.mxu1 %v8602_v37  ;;  %v8612_v22 = vld [vmem:[#allocation123_spill] sm:$0xff]  ;;  %v8613_v37 = vld [vmem:[#allocation121_spill] sm:$0xff] }
 0x714   :  { %3021 = vmatpush1.bf16.msra.mxu0 %v8603_v34  ;;  %3062 = vmatpush1.bf16.msra.mxu1 %v8604_v19  ;;  %v8614_v34 = vld [vmem:[#allocation126_spill] sm:$0xff]  ;;  %v8615_v19 = vld [vmem:[#allocation124_spill] sm:$0xff] }
 0x715   :  { %3022 = vmatprep.subr.bf16.mxu0 %v8605_v3  ;;  %3063 = vmatprep.subr.bf16.mxu1 %v8606_v24  ;;  %v8616_v3 = vld [vmem:[#allocation127_spill] sm:$0xff]  ;;  %v8617_v24 = vld [vmem:[#allocation125_spill] sm:$0xff] }
 0x718   :  { %3023 = vmatpush1.bf16.msra.mxu0 %v8607_v46  ;;  %3064 = vmatpush1.bf16.msra.mxu1 %v8608_v31  ;;  %v8618_v46 = vld [vmem:[#allocation130_spill] sm:$0xff]  ;;  %v8619_v31 = vld [vmem:[#allocation128_spill] sm:$0xff] }
 0x719   :  { %3024 = vmatprep.subr.bf16.mxu0 %v8609_v58  ;;  %3065 = vmatprep.subr.bf16.mxu1 %v8610_v47  ;;  %v8620_v58 = vld [vmem:[#allocation131_spill] sm:$0xff]  ;;  %v8621_v47 = vld [vmem:[#allocation129_spill] sm:$0xff] }
 0x71c   :  { %3025 = vmatpush1.bf16.msra.mxu0 %v8611_v62  ;;  %3066 = vmatpush1.bf16.msra.mxu1 %v8612_v22  ;;  %v8622_v62 = vld [vmem:[#allocation134_spill] sm:$0xff] }
 0x71d   :  { %3026 = vmatprep.subr.bf16.mxu0 %v8613_v37  ;;  %3067 = vmatprep.subr.bf16.mxu1 %v8614_v34 }
 0x720   :  { %3027 = vmatpush1.bf16.msra.mxu0 %v8615_v19  ;;  %3068 = vmatpush1.bf16.msra.mxu1 %v8616_v3 }
 0x721   :  { %3028 = vmatprep.subr.bf16.mxu0 %v8617_v24  ;;  %3069 = vmatprep.subr.bf16.mxu1 %v8618_v46 }
 0x724   :  { %3029 = vmatpush1.bf16.msra.mxu0 %v8619_v31  ;;  %3070 = vmatpush1.bf16.msra.mxu1 %v8620_v58 }
 0x725   :  { %3030 = vmatprep.subr.bf16.mxu0 %v8621_v47  ;;  %3071 = vmatprep.subr.bf16.mxu1 %v8622_v62 }
 0x728   :  { %3031 = vmatpush1.bf16.msra.mxu0 %v6819_v42  ;;  %3072 = vmatpush1.bf16.msra.mxu1 %v6822_v56 }
 0x729   :  { %3032 = vmatprep.subr.bf16.mxu0 %v6825_v59  ;;  %3073 = vmatprep.subr.bf16.mxu1 %v6828_v53 }
 0x72c   :  { %3033 = vmatpush1.bf16.msra.mxu0 %v6831_v10  ;;  %3074 = vmatpush1.bf16.msra.mxu1 %v6834_v52 }
 0x72d   :  { %3138 = vmatprep.subr.bf16.mxu0 %v6431_v20  ;;  %3179 = vmatprep.subr.bf16.mxu1 %v6434_v7  ;;  %v8623_v20 = vld [vmem:[#allocation8_spill] sm:$0xff]  ;;  %v8624_v7 = vld [vmem:[#allocation10_spill] sm:$0xff] }
 0x72f   :  { %3035 = vmatmul.mubr.bf16.vlgmr.msra.gmra.mrb[68].mxu0 %v6921_v16  ;;  %3076 = vmatmul.mubr.bf16.vlgmr.msra.gmra.mrb[68].mxu1 %v6921_v16  ;;  %v8640_v16 = vld [vmem:[#allocation147_spill] sm:$0xff] }
 0x730   :  { %3139 = vmatpush1.bf16.msra.mxu0 %v6439_v4  ;;  %3180 = vmatpush1.bf16.msra.mxu1 %v6442_v8  ;;  %v8625_v4 = vld [vmem:[#allocation7_spill] sm:$0xff]  ;;  %v8626_v8 = vld [vmem:[#allocation9_spill] sm:$0xff] }
 0x731   :  { %3140 = vmatprep.subr.bf16.mxu0 %v6445_v11  ;;  %3181 = vmatprep.subr.bf16.mxu1 %v6448_v15  ;;  %v8627_v11 = vld [vmem:[#allocation40_spill] sm:$0xff]  ;;  %v8628_v15 = vld [vmem:[#allocation42_spill] sm:$0xff] }
 0x734   :  { %3141 = vmatpush1.bf16.msra.mxu0 %v6451_v29  ;;  %3182 = vmatpush1.bf16.msra.mxu1 %v6454_v33  ;;  %v8629_v29 = vld [vmem:[#allocation39_spill] sm:$0xff]  ;;  %v8630_v33 = vld [vmem:[#allocation41_spill] sm:$0xff] }
 0x735   :  { %3142 = vmatprep.subr.bf16.mxu0 %v6457_v2  ;;  %3183 = vmatprep.subr.bf16.mxu1 %v6460_v38  ;;  %v8631_v2 = vld [vmem:[#allocation106_spill] sm:$0xff]  ;;  %v8632_v38 = vld [vmem:[#allocation104_spill] sm:$0xff] }
 0x738   :  { %3143 = vmatpush1.bf16.msra.mxu0 %v6463_v18  ;;  %3184 = vmatpush1.bf16.msra.mxu1 %v6466_v41  ;;  %v8633_v18 = vld [vmem:[#allocation107_spill] sm:$0xff]  ;;  %v8634_v41 = vld [vmem:[#allocation105_spill] sm:$0xff] }
 0x739   :  { %3144 = vmatprep.subr.bf16.mxu0 %v6469_v30  ;;  %3185 = vmatprep.subr.bf16.mxu1 %v6472_v1  ;;  %v8635_v30 = vld [vmem:[#allocation110_spill] sm:$0xff]  ;;  %v8636_v1 = vld [vmem:[#allocation108_spill] sm:$0xff] }
 0x73c   :  { %3145 = vmatpush1.bf16.msra.mxu0 %v6475_v5  ;;  %3186 = vmatpush1.bf16.msra.mxu1 %v6478_v27  ;;  %v8637_v5 = vld [vmem:[#allocation111_spill] sm:$0xff]  ;;  %v8638_v27 = vld [vmem:[#allocation109_spill] sm:$0xff] }
 0x73d   :  { %3146 = vmatprep.subr.bf16.mxu0 %v6481_v51  ;;  %3187 = vmatprep.subr.bf16.mxu1 %v8623_v20  ;;  %v8639_v51 = vld [vmem:[#allocation144_spill] sm:$0xff]  ;;  %v8641_v20 = vld [vmem:[#allocation145_spill] sm:$0xff] }
 0x740   :  { %3147 = vmatpush1.bf16.msra.mxu0 %v8624_v7  ;;  %3188 = vmatpush1.bf16.msra.mxu1 %v8625_v4  ;;  %v8642_v7 = vld [vmem:[#allocation148_spill] sm:$0xff]  ;;  %v8643_v4 = vld [vmem:[#allocation151_spill] sm:$0xff] }
 0x741   :  { %3148 = vmatprep.subr.bf16.mxu0 %v8626_v8  ;;  %3189 = vmatprep.subr.bf16.mxu1 %v8627_v11  ;;  %v8644_v8 = vld [vmem:[#allocation149_spill] sm:$0xff]  ;;  %v8645_v11 = vld [vmem:[#allocation154_spill] sm:$0xff] }
 0x744   :  { %3149 = vmatpush1.bf16.msra.mxu0 %v8628_v15  ;;  %3190 = vmatpush1.bf16.msra.mxu1 %v8629_v29  ;;  %v8646_v15 = vld [vmem:[#allocation152_spill] sm:$0xff]  ;;  %v8647_v29 = vld [vmem:[#allocation155_spill] sm:$0xff] }
 0x745   :  { %3150 = vmatprep.subr.bf16.mxu0 %v8630_v33  ;;  %3191 = vmatprep.subr.bf16.mxu1 %v8631_v2  ;;  %v8648_v33 = vld [vmem:[#allocation153_spill] sm:$0xff]  ;;  %v8649_v2 = vld [vmem:[#allocation156_spill] sm:$0xff] }
 0x748   :  { %3151 = vmatpush1.bf16.msra.mxu0 %v8632_v38  ;;  %3192 = vmatpush1.bf16.msra.mxu1 %v8633_v18  ;;  %v8650_v38 = vld [vmem:[#allocation71_spill] sm:$0xff]  ;;  %v8651_v18 = vld [vmem:[#allocation74_spill] sm:$0xff] }
 0x749   :  { %3152 = vmatprep.subr.bf16.mxu0 %v8634_v41  ;;  %3193 = vmatprep.subr.bf16.mxu1 %v8635_v30  ;;  %v8652_v41 = vld [vmem:[#allocation72_spill] sm:$0xff]  ;;  %v8653_v30 = vld [vmem:[#allocation75_spill] sm:$0xff] }
 0x74c   :  { %3153 = vmatpush1.bf16.msra.mxu0 %v8636_v1  ;;  %3194 = vmatpush1.bf16.msra.mxu1 %v8637_v5  ;;  %v8654_v1 = vld [vmem:[#allocation73_spill] sm:$0xff]  ;;  %v8655_v5 = vld [vmem:[#allocation78_spill] sm:$0xff] }
 0x74d   :  { %3154 = vmatprep.subr.bf16.mxu0 %v8638_v27  ;;  %3195 = vmatprep.subr.bf16.mxu1 %v8639_v51  ;;  %v8656_v27 = vld [vmem:[#allocation76_spill] sm:$0xff]  ;;  %v8657_v51 = vld [vmem:[#allocation79_spill] sm:$0xff] }
 0x750   :  { %3155 = vmatpush1.bf16.msra.mxu0 %v8640_v16  ;;  %3196 = vmatpush1.bf16.msra.mxu1 %v8641_v20  ;;  %v8658_v16 = vld [vmem:[#allocation77_spill] sm:$0xff]  ;;  %v8659_v20 = vld [vmem:[#allocation82_spill] sm:$0xff] }
 0x751   :  { %3156 = vmatprep.subr.bf16.mxu0 %v8642_v7  ;;  %3197 = vmatprep.subr.bf16.mxu1 %v8643_v4  ;;  %v8660_v7 = vld [vmem:[#allocation80_spill] sm:$0xff] }
 0x752   :  { %v8661_v4 = vld [vmem:[#allocation84_spill] sm:$0xff] }
 0x754   :  { %3157 = vmatpush1.bf16.msra.mxu0 %v8644_v8  ;;  %3198 = vmatpush1.bf16.msra.mxu1 %v8645_v11  ;;  %v8662_v8 = vld [vmem:[#allocation81_spill] sm:$0xff]  ;;  %v8663_v11 = vld [vmem:[#allocation86_spill] sm:$0xff] }
 0x755   :  { %3158 = vmatprep.subr.bf16.mxu0 %v8646_v15  ;;  %3199 = vmatprep.subr.bf16.mxu1 %v8647_v29  ;;  %v8664_v15 = vld [vmem:[#allocation83_spill] sm:$0xff] }
 0x756   :  { %v8665_v29 = vld [vmem:[#allocation87_spill] sm:$0xff] }
 0x758   :  { %3159 = vmatpush1.bf16.msra.mxu0 %v8648_v33  ;;  %3200 = vmatpush1.bf16.msra.mxu1 %v8649_v2  ;;  %v8666_v33 = vld [vmem:[#allocation85_spill] sm:$0xff]  ;;  %v8667_v2 = vld [vmem:[#allocation90_spill] sm:$0xff] }
 0x759   :  { %3160 = vmatprep.subr.bf16.mxu0 %v8650_v38  ;;  %3201 = vmatprep.subr.bf16.mxu1 %v8651_v18  ;;  %v8668_v38 = vld [vmem:[#allocation88_spill] sm:$0xff]  ;;  %v8669_v18 = vld [vmem:[#allocation91_spill] sm:$0xff] }
 0x75c   :  { %3161 = vmatpush1.bf16.msra.mxu0 %v8652_v41  ;;  %3202 = vmatpush1.bf16.msra.mxu1 %v8653_v30  ;;  %v8670_v41 = vld [vmem:[#allocation89_spill] sm:$0xff]  ;;  %v8671_v30 = vld [vmem:[#allocation94_spill] sm:$0xff] }
 0x75d   :  { %3162 = vmatprep.subr.bf16.mxu0 %v8654_v1  ;;  %3203 = vmatprep.subr.bf16.mxu1 %v8655_v5 }
 0x760   :  { %3163 = vmatpush1.bf16.msra.mxu0 %v8656_v27  ;;  %3204 = vmatpush1.bf16.msra.mxu1 %v8657_v51 }
 0x761   :  { %3164 = vmatprep.subr.bf16.mxu0 %v8658_v16  ;;  %3205 = vmatprep.subr.bf16.mxu1 %v8659_v20 }
 0x764   :  { %3165 = vmatpush1.bf16.msra.mxu0 %v8660_v7  ;;  %3206 = vmatpush1.bf16.msra.mxu1 %v8661_v4 }
 0x765   :  { %3166 = vmatprep.subr.bf16.mxu0 %v8662_v8  ;;  %3207 = vmatprep.subr.bf16.mxu1 %v8663_v11  ;;  %v8672_v8 = vld [vmem:[#allocation24_spill] sm:$0xff] }
 0x768   :  { %3167 = vmatpush1.bf16.msra.mxu0 %v8664_v15  ;;  %3208 = vmatpush1.bf16.msra.mxu1 %v8665_v29  ;;  %v8673_v15 = vld [vmem:[#allocation26_spill] sm:$0xff] }
 0x769   :  { %3168 = vmatprep.subr.bf16.mxu0 %v8666_v33  ;;  %3209 = vmatprep.subr.bf16.mxu1 %v8667_v2  ;;  %v8674_v33 = vld [vmem:[#allocation23_spill] sm:$0xff] }
 0x76c   :  { %3169 = vmatpush1.bf16.msra.mxu0 %v8668_v38  ;;  %3210 = vmatpush1.bf16.msra.mxu1 %v8669_v18  ;;  %v8675_v38 = vld [vmem:[#allocation25_spill] sm:$0xff] }
 0x76d   :  { %3220 = vmatprep.subr.bf16.mxu0 %v8670_v41  ;;  %3261 = vmatprep.subr.bf16.mxu1 %v8671_v30 }
 0x7c2   :  { %v2954_v1 = vpop.f32.mrb[64].mxu0  ;;  %v2995_v5 = vpop.f32.mrb[64].mxu1 }
 0x7c3   :  { %v2956_v27 = vpop.f32.mrb[65].mxu0  ;;  %v2997_v51 = vpop.f32.mrb[65].mxu1  ;;  %v3086_v11 = vadd.f32 %v2995_v5, %v8672_v8  ;;  %v3084_v2 = vadd.f32 %v2954_v1, %v8674_v33  ;;  %v8677_v8 = vld [vmem:[#allocation55_spill] sm:$0xff] }
 0x7c4   :  { %v2958_v16 = vpop.f32.mrb[66].mxu0  ;;  %v2999_v20 = vpop.f32.mrb[66].mxu1  ;;  %v3087_v29 = vadd.f32 %v2997_v51, %v8673_v15  ;;  %v3085_v18 = vadd.f32 %v2956_v27, %v8675_v38  ;;  %v8678_v15 = vld [vmem:[#allocation58_spill] sm:$0xff] }
 0x7c5   :  { %v2959_v7 = vpop.f32.mrb[67].mxu0  ;;  %v3000_v4 = vpop.f32.mrb[67].mxu1  ;;  %v3094_v52 = vmul.f32 0.5, %v3086_v11  ;;  %v3092_v10 = vmul.f32 0.5, %v3084_v2 }
 0x7c6   :  { %v3095_v41 = vmul.f32 0.5, %v3087_v29  ;;  %v3093_v30 = vmul.f32 0.5, %v3085_v18  ;;  %v8676_v7 = vld [vmem:[#allocation56_spill] sm:$0xff]  ;;  %v8679_v29 = vld [vmem:[#allocation57_spill] sm:$0xff] }
 0x7c7   :  { %4193 = vtanh.f32 %v3094_v52 }
 0x7c8   :  { %4195 = vtanh.f32 %v3095_v41 }
 0x7c9   :  { %4197 = vtanh.f32 %v3092_v10 }
 0x7ca   :  { %4199 = vtanh.f32 %v3093_v30 }
 0x7d1   :  { %v4194_v11 = vpop.eup %4193 }
 0x7d2   :  { %v4196_v10 = vpop.eup %4195  ;;  %v3106_v30 = vmul.f32 0.5, %v4194_v11 }
 0x7d3   :  { %v4198_v18 = vpop.eup %4197 }
 0x7d4   :  { %v4200_v41 = vpop.eup %4199  ;;  %v3104_v56 = vmul.f32 0.5, %v4198_v18 }
 0x802   :  { %v3036_v16 = vpop.f32.mrb[68].mxu0  ;;  %v3077_v20 = vpop.f32.mrb[68].mxu1 }
 0x803   :  { %v3090_v4 = vadd.f32 %v3077_v20, %v8676_v7  ;;  %v3038_v53 = vpop.f32.mrb[69].mxu0  ;;  %v3079_v5 = vpop.f32.mrb[69].mxu1  ;;  %v3088_v51 = vadd.f32 %v3036_v16, %v8677_v8  ;;  %v3107_v7 = vmul.f32 0.5, %v4196_v10  ;;  %v3105_v16 = vmul.f32 0.5, %v4200_v41 }
 0x804   :  { %v3091_v1 = vadd.f32 %v3079_v5, %v8678_v15  ;;  %v3040_v33 = vpop.f32.mrb[70].mxu0  ;;  %v3081_v27 = vpop.f32.mrb[70].mxu1  ;;  %v3089_v2 = vadd.f32 %v3038_v53, %v8679_v29  ;;  %v3112_v8 = vadd.f32 0.5, %v3106_v30  ;;  %v3110_v15 = vadd.f32 0.5, %v3104_v56 }
 0x805   :  { %4201 = vtanh.f32 %v3090_v4  ;;  %v3041_v52 = vpop.f32.mrb[71].mxu0  ;;  %v3082_v38 = vpop.f32.mrb[71].mxu1  ;;  %v3096_v20 = vmul.f32 0.5, %v3088_v51  ;;  %v3113_v5 = vadd.f32 0.5, %v3107_v7  ;;  %v3111_v33 = vadd.f32 0.5, %v3105_v16  ;;  %v7187_v16 = vld [vmem:[#allocation3 + $0x108] sm:$0xff] }
 0x806   :  { %4203 = vtanh.f32 %v3091_v1  ;;  %v3097_v59 = vmul.f32 0.5, %v3089_v2  ;;  %v3118_v27 = vmul.f32 %v3112_v8, %v6915_v23  ;;  %v7190_v8 = vld [vmem:[#allocation3 + $0x118] sm:$0xff] }
 0x807   :  { %4205 = vtanh.f32 %v3096_v20  ;;  %v3119_v1 = vmul.f32 %v3113_v5, %v6917_v57  ;;  %v7193_v5 = vld [vmem:[#allocation3 + $0x100] sm:$0xff] }
 0x808   :  { %4207 = vtanh.f32 %v3097_v59 }
 0x80f   :  { %v4202_v4 = vpop.eup %4201 }
 0x810   :  { %v4204_v53 = vpop.eup %4203  ;;  %v3120_v29 = vmul.f32 %v4202_v4, %v3110_v15  ;;  %v7196_v15 = vld [vmem:[#allocation3 + $0x110] sm:$0xff]  ;;  %v7199_v4 = vld [vmem:[#allocation3 + $0x148] sm:$0xff] }
 0x811   :  { %v3121_v52 = vmul.f32 %v4204_v53, %v3111_v33  ;;  %v4206_v2 = vpop.eup %4205  ;;  %v7202_v33 = vld [vmem:[#allocation3 + $0x158] sm:$0xff]  ;;  %v7205_v53 = vld [vmem:[#allocation3 + $0x140] sm:$0xff] }
 0x812   :  { %v7065_v11 = vadd.f32 %v3120_v29, %v3118_v27  ;;  %v4208_v59 = vpop.eup %4207  ;;  %v3108_v56 = vmul.f32 0.5, %v4206_v2  ;;  %v7208_v27 = vld [vmem:[#allocation3 + $0x150] sm:$0xff]  ;;  %v7211_v29 = vld [vmem:[#allocation3 + $0x188] sm:$0xff] }
 0x813   :  { %v7067_v51 = vadd.f32 %v3121_v52, %v3119_v1  ;;  %v3109_v38 = vmul.f32 0.5, %v4208_v59  ;;  %v7214_v1 = vld [vmem:[#allocation3 + $0x198] sm:$0xff]  ;;  %v7217_v52 = vld [vmem:[#allocation3 + $0x180] sm:$0xff]  ;;  %v7220_v2 = vld [vmem:[#allocation3 + $0x190] sm:$0xff] }
 0x814   :  { %4209 = vtanh.f32 %v7065_v11  ;;  %v3114_v10 = vadd.f32 0.5, %v3108_v56  ;;  %v7223_v59 = vld [vmem:[#allocation3 + $0x1c8] sm:$0xff]  ;;  %v7226_v56 = vld [vmem:[#allocation3 + $0x1d8] sm:$0xff] }
 0x815   :  { %4211 = vtanh.f32 %v7067_v51  ;;  %v3115_v41 = vadd.f32 0.5, %v3109_v38  ;;  %v7229_v38 = vld [vmem:[#allocation3 + $0x1c0] sm:$0xff] }
 0x81e   :  { %v4210_v18 = vpop.eup %4209 }
 0x81f   :  { %v4212_v23 = vpop.eup %4211  ;;  %v3126_v30 = vmul.f32 %v4210_v18, %v3114_v10  ;;  %v7232_v10 = vld [vmem:[#allocation3 + $0x1d0] sm:$0xff]  ;;  %v7235_v18 = vld [vmem:[#allocation3 + $0x208] sm:$0xff] }
 0x820   :  { %v3127_v20 = vmul.f32 %v4212_v23, %v3115_v41  ;;  %v7238_v41 = vld [vmem:[#allocation3 + $0x218] sm:$0xff]  ;;  %v7241_v23 = vld [vmem:[#allocation3 + $0x200] sm:$0xff] }
 0x821   :  { %v7071_v7 = vpack.c.bf16 %v3126_v30, %v3126_v30  ;;  %v7244_v30 = vld [vmem:[#allocation3 + $0x210] sm:$0xff] }
 0x822   :  { %v3137_v57 = vpack.c.bf16 %v3127_v20, %v3127_v20  ;;  %v7247_v20 = vld [vmem:[#allocation3 + $0x248] sm:$0xff] }
 0x824   :  { %3170 = vmatprep.mubr.bf16.mxu0 %v3137_v57  ;;  %3211 = vmatprep.mubr.bf16.mxu1 %v3137_v57 }
 0x825   :  { %3171 = vmatmul.mubr.bf16.vlgmr.msra.gmra.mrb[72].mxu0 %v7071_v7  ;;  %3212 = vmatmul.mubr.bf16.vlgmr.msra.gmra.mrb[72].mxu1 %v7071_v7 }
 0x826   :  { %3221 = vmatpush1.bf16.msra.mxu0 %v6651_v55  ;;  %3262 = vmatpush1.bf16.msra.mxu1 %v6654_v21  ;;  %v8680_v55 = vld [vmem:[#allocation12_spill] sm:$0xff]  ;;  %v8681_v21 = vld [vmem:[#allocation14_spill] sm:$0xff] }
 0x827   :  { %3252 = vmatprep.mubr.bf16.mxu0 %v3137_v57  ;;  %3293 = vmatprep.mubr.bf16.mxu1 %v3137_v57  ;;  %v7250_v57 = vld [vmem:[#allocation3 + $0x258] sm:$0xff] }
 0x828   :  { %3222 = vmatprep.subr.bf16.mxu0 %v6657_v14  ;;  %3263 = vmatprep.subr.bf16.mxu1 %v6660_v35  ;;  %v8682_v14 = vld [vmem:[#allocation11_spill] sm:$0xff]  ;;  %v8683_v35 = vld [vmem:[#allocation13_spill] sm:$0xff] }
 0x82a   :  { %3223 = vmatpush1.bf16.msra.mxu0 %v6663_v0  ;;  %3264 = vmatpush1.bf16.msra.mxu1 %v6666_v25  ;;  %v8684_v0 = vld [vmem:[#allocation44_spill] sm:$0xff]  ;;  %v8685_v25 = vld [vmem:[#allocation43_spill] sm:$0xff] }
 0x82b   :  { %3224 = vmatprep.subr.bf16.mxu0 %v6669_v36  ;;  %3265 = vmatprep.subr.bf16.mxu1 %v6672_v6  ;;  %v8686_v36 = vld [vmem:[#allocation46_spill] sm:$0xff]  ;;  %v8687_v6 = vld [vmem:[#allocation45_spill] sm:$0xff] }
 0x82e   :  { %3225 = vmatpush1.bf16.msra.mxu0 %v6675_v39  ;;  %3266 = vmatpush1.bf16.msra.mxu1 %v6678_v9  ;;  %v8688_v39 = vld [vmem:[#allocation114_spill] sm:$0xff]  ;;  %v8689_v9 = vld [vmem:[#allocation112_spill] sm:$0xff] }
 0x82f   :  { %3226 = vmatprep.subr.bf16.mxu0 %v6681_v40  ;;  %3267 = vmatprep.subr.bf16.mxu1 %v6684_v61  ;;  %v8690_v40 = vld [vmem:[#allocation115_spill] sm:$0xff]  ;;  %v8691_v61 = vld [vmem:[#allocation113_spill] sm:$0xff] }
 0x832   :  { %3227 = vmatpush1.bf16.msra.mxu0 %v6687_v50  ;;  %3268 = vmatpush1.bf16.msra.mxu1 %v6690_v48  ;;  %v8692_v50 = vld [vmem:[#allocation118_spill] sm:$0xff]  ;;  %v8693_v48 = vld [vmem:[#allocation116_spill] sm:$0xff] }
 0x833   :  { %3228 = vmatprep.subr.bf16.mxu0 %v6693_v43  ;;  %3269 = vmatprep.subr.bf16.mxu1 %v6696_v60  ;;  %v8694_v43 = vld [vmem:[#allocation119_spill] sm:$0xff]  ;;  %v8695_v60 = vld [vmem:[#allocation117_spill] sm:$0xff] }
 0x836   :  { %3229 = vmatpush1.bf16.msra.mxu0 %v8583_v17  ;;  %3270 = vmatpush1.bf16.msra.mxu1 %v8584_v13  ;;  %v8696_v17 = vld [vmem:[#allocation122_spill] sm:$0xff]  ;;  %v8697_v13 = vld [vmem:[#allocation120_spill] sm:$0xff] }
 0x837   :  { %3230 = vmatprep.subr.bf16.mxu0 %v8585_v49  ;;  %3271 = vmatprep.subr.bf16.mxu1 %v8586_v12  ;;  %v8698_v49 = vld [vmem:[#allocation132_spill] sm:$0xff]  ;;  %v8699_v12 = vld [vmem:[#allocation135_spill] sm:$0xff] }
 0x83a   :  { %3231 = vmatpush1.bf16.msra.mxu0 %v8587_v54  ;;  %3272 = vmatpush1.bf16.msra.mxu1 %v8588_v32  ;;  %v8700_v54 = vld [vmem:[#allocation133_spill] sm:$0xff]  ;;  %v8701_v32 = vld [vmem:[#allocation138_spill] sm:$0xff] }
 0x83b   :  { %3232 = vmatprep.subr.bf16.mxu0 %v8589_v28  ;;  %3273 = vmatprep.subr.bf16.mxu1 %v8590_v63  ;;  %v8702_v28 = vld [vmem:[#allocation136_spill] sm:$0xff] }
 0x83c   :  { %v7137_v63 = vld [vmem:[#allocation3 + $0x8] sm:$0xff] }
 0x83e   :  { %3233 = vmatpush1.bf16.msra.mxu0 %v8591_v44  ;;  %3274 = vmatpush1.bf16.msra.mxu1 %v8592_v45  ;;  %v7140_v44 = vld [vmem:[#allocation3 + $0x18] sm:$0xff]  ;;  %v7148_v45 = vld [vmem:[#allocation3 + $0x10] sm:$0xff] }
 0x83f   :  { %3234 = vmatprep.subr.bf16.mxu0 %v8593_v26  ;;  %3275 = vmatprep.subr.bf16.mxu1 %v8680_v55  ;;  %v7151_v26 = vld [vmem:[#allocation3 + $0x48] sm:$0xff]  ;;  %v7256_v55 = vld [vmem:[#allocation3 + $0x250] sm:$0xff] }
 0x840   :  { %8703 = vst [vmem:[#allocation139_spill] sm:$0xff] %v7256_v55 }
 0x842   :  { %3235 = vmatpush1.bf16.msra.mxu0 %v8681_v21  ;;  %3276 = vmatpush1.bf16.msra.mxu1 %v8682_v14  ;;  %v7259_v21 = vld [vmem:[#allocation3 + $0x288] sm:$0xff]  ;;  %v7262_v14 = vld [vmem:[#allocation3 + $0x298] sm:$0xff] }
 0x843   :  { %3236 = vmatprep.subr.bf16.mxu0 %v8683_v35  ;;  %3277 = vmatprep.subr.bf16.mxu1 %v8684_v0  ;;  %8704 = vst [vmem:[#allocation137_spill] sm:$0xff] %v7259_v21  ;;  %8705 = vst [vmem:[#allocation142_spill] sm:$0xff] %v7262_v14  ;;  %v7265_v35 = vld [vmem:[#allocation3 + $0x280] sm:$0xff]  ;;  %v7268_v0 = vld [vmem:[#allocation3 + $0x290] sm:$0xff] }
 0x844   :  { %8706 = vst [vmem:[#allocation140_spill] sm:$0xff] %v7265_v35  ;;  %8707 = vst [vmem:[#allocation143_spill] sm:$0xff] %v7268_v0 }
 0x846   :  { %3237 = vmatpush1.bf16.msra.mxu0 %v8685_v25  ;;  %3278 = vmatpush1.bf16.msra.mxu1 %v8686_v36  ;;  %v7271_v25 = vld [vmem:[#allocation3 + $0x2c8] sm:$0xff]  ;;  %v7274_v36 = vld [vmem:[#allocation3 + $0x2d8] sm:$0xff] }
 0x847   :  { %3238 = vmatprep.subr.bf16.mxu0 %v8687_v6  ;;  %3279 = vmatprep.subr.bf16.mxu1 %v8688_v39  ;;  %8708 = vst [vmem:[#allocation141_spill] sm:$0xff] %v7271_v25  ;;  %8709 = vst [vmem:[#allocation146_spill] sm:$0xff] %v7274_v36  ;;  %v7277_v6 = vld [vmem:[#allocation3 + $0x2c0] sm:$0xff]  ;;  %v7280_v39 = vld [vmem:[#allocation3 + $0x2d0] sm:$0xff] }
 0x848   :  { %8710 = vst [vmem:[#allocation150_spill] sm:$0xff] %v7277_v6  ;;  %8711 = vst [vmem:[#allocation16_spill] sm:$0xff] %v7280_v39 }
 0x84a   :  { %3239 = vmatpush1.bf16.msra.mxu0 %v8689_v9  ;;  %3280 = vmatpush1.bf16.msra.mxu1 %v8690_v40  ;;  %v7283_v9 = vld [vmem:[#allocation3 + $0x308] sm:$0xff]  ;;  %v7286_v40 = vld [vmem:[#allocation3 + $0x318] sm:$0xff] }
 0x84b   :  { %3240 = vmatprep.subr.bf16.mxu0 %v8691_v61  ;;  %3281 = vmatprep.subr.bf16.mxu1 %v8692_v50  ;;  %8712 = vst [vmem:[#allocation18_spill] sm:$0xff] %v7283_v9  ;;  %8713 = vst [vmem:[#allocation15_spill] sm:$0xff] %v7286_v40  ;;  %v7289_v61 = vld [vmem:[#allocation3 + $0x300] sm:$0xff]  ;;  %v7292_v50 = vld [vmem:[#allocation3 + $0x310] sm:$0xff] }
 0x84c   :  { %8714 = vst [vmem:[#allocation17_spill] sm:$0xff] %v7289_v61  ;;  %8715 = vst [vmem:[#allocation48_spill] sm:$0xff] %v7292_v50 }
 0x84e   :  { %3241 = vmatpush1.bf16.msra.mxu0 %v8693_v48  ;;  %3282 = vmatpush1.bf16.msra.mxu1 %v8694_v43  ;;  %v7295_v48 = vld [vmem:[#allocation3 + $0x348] sm:$0xff]  ;;  %v7298_v43 = vld [vmem:[#allocation3 + $0x358] sm:$0xff] }
 0x84f   :  { %3242 = vmatprep.subr.bf16.mxu0 %v8695_v60  ;;  %3283 = vmatprep.subr.bf16.mxu1 %v8696_v17  ;;  %8716 = vst [vmem:[#allocation47_spill] sm:$0xff] %v7295_v48  ;;  %8717 = vst [vmem:[#allocation50_spill] sm:$0xff] %v7298_v43  ;;  %v7301_v60 = vld [vmem:[#allocation3 + $0x340] sm:$0xff]  ;;  %v7304_v17 = vld [vmem:[#allocation3 + $0x350] sm:$0xff] }
 0x850   :  { %8718 = vst [vmem:[#allocation49_spill] sm:$0xff] %v7301_v60  ;;  %8719 = vst [vmem:[#allocation20_spill] sm:$0xff] %v7304_v17 }
 0x852   :  { %3243 = vmatpush1.bf16.msra.mxu0 %v8697_v13  ;;  %3284 = vmatpush1.bf16.msra.mxu1 %v8612_v22  ;;  %v7175_v22 = vld [vmem:[#allocation3 + $0xc8] sm:$0xff] }
 0x853   :  { %3244 = vmatprep.subr.bf16.mxu0 %v8613_v37  ;;  %3285 = vmatprep.subr.bf16.mxu1 %v8614_v34  ;;  %v7178_v37 = vld [vmem:[#allocation3 + $0xd8] sm:$0xff]  ;;  %v7181_v34 = vld [vmem:[#allocation3 + $0xc0] sm:$0xff]  ;;  %v7307_v13 = vld [vmem:[#allocation3 + $0x388] sm:$0xff] }
 0x854   :  { %8720 = vst [vmem:[#allocation22_spill] sm:$0xff] %v7307_v13 }
 0x856   :  { %3245 = vmatpush1.bf16.msra.mxu0 %v8615_v19  ;;  %3286 = vmatpush1.bf16.msra.mxu1 %v8616_v3  ;;  %v7154_v3 = vld [vmem:[#allocation3 + $0x58] sm:$0xff]  ;;  %v7184_v19 = vld [vmem:[#allocation3 + $0xd0] sm:$0xff] }
 0x857   :  { %3246 = vmatprep.subr.bf16.mxu0 %v8617_v24  ;;  %3287 = vmatprep.subr.bf16.mxu1 %v8618_v46  ;;  %v7157_v24 = vld [vmem:[#allocation3 + $0x40] sm:$0xff]  ;;  %v7160_v46 = vld [vmem:[#allocation3 + $0x50] sm:$0xff] }
 0x85a   :  { %3247 = vmatpush1.bf16.msra.mxu0 %v8619_v31  ;;  %3288 = vmatpush1.bf16.msra.mxu1 %v8620_v58  ;;  %v7163_v31 = vld [vmem:[#allocation3 + $0x88] sm:$0xff]  ;;  %v7166_v58 = vld [vmem:[#allocation3 + $0x98] sm:$0xff] }
 0x85b   :  { %3248 = vmatprep.subr.bf16.mxu0 %v8621_v47  ;;  %3289 = vmatprep.subr.bf16.mxu1 %v8622_v62  ;;  %v7169_v47 = vld [vmem:[#allocation3 + $0x80] sm:$0xff]  ;;  %v7172_v62 = vld [vmem:[#allocation3 + $0x90] sm:$0xff] }
 0x85e   :  { %3249 = vmatpush1.bf16.msra.mxu0 %v6819_v42  ;;  %3290 = vmatpush1.bf16.msra.mxu1 %v8698_v49  ;;  %v7145_v42 = vld [vmem:[#allocation3] sm:$0xff]  ;;  %v7310_v49 = vld [vmem:[#allocation3 + $0x398] sm:$0xff] }
 0x85f   :  { %3250 = vmatprep.subr.bf16.mxu0 %v8699_v12  ;;  %3291 = vmatprep.subr.bf16.mxu1 %v8700_v54  ;;  %8721 = vst [vmem:[#allocation19_spill] sm:$0xff] %v7310_v49  ;;  %v7313_v12 = vld [vmem:[#allocation3 + $0x380] sm:$0xff]  ;;  %v7316_v54 = vld [vmem:[#allocation3 + $0x390] sm:$0xff] }
 0x860   :  { %8722 = vst [vmem:[#allocation21_spill] sm:$0xff] %v7313_v12  ;;  %8723 = vst [vmem:[#allocation52_spill] sm:$0xff] %v7316_v54 }
 0x862   :  { %3251 = vmatpush1.bf16.msra.mxu0 %v8701_v32  ;;  %3292 = vmatpush1.bf16.msra.mxu1 %v8702_v28  ;;  %v7319_v32 = vld [vmem:[#allocation3 + $0x3c8] sm:$0xff]  ;;  %v7322_v28 = vld [vmem:[#allocation3 + $0x3d8] sm:$0xff] }
 0x863   :  { %3356 = vmatprep.subr.bf16.mxu0 %v7137_v63  ;;  %3397 = vmatprep.subr.bf16.mxu1 %v7140_v44  ;;  %8724 = vst [vmem:[#allocation51_spill] sm:$0xff] %v7319_v32  ;;  %8725 = vst [vmem:[#allocation54_spill] sm:$0xff] %v7322_v28 }
 0x865   :  { %3253 = vmatmul.mubr.bf16.vlgmr.msra.gmra.mrb[76].mxu0 %v7071_v7  ;;  %3294 = vmatmul.mubr.bf16.vlgmr.msra.gmra.mrb[76].mxu1 %v7071_v7  ;;  %v7253_v7 = vld [vmem:[#allocation3 + $0x240] sm:$0xff] }
 0x866   :  { %3357 = vmatpush1.bf16.msra.mxu0 %v7145_v42  ;;  %3398 = vmatpush1.bf16.msra.mxu1 %v7148_v45 }
 0x867   :  { %3358 = vmatprep.subr.bf16.mxu0 %v7151_v26  ;;  %3399 = vmatprep.subr.bf16.mxu1 %v7154_v3 }
 0x86a   :  { %3359 = vmatpush1.bf16.msra.mxu0 %v7157_v24  ;;  %3400 = vmatpush1.bf16.msra.mxu1 %v7160_v46 }
 0x86b   :  { %3360 = vmatprep.subr.bf16.mxu0 %v7163_v31  ;;  %3401 = vmatprep.subr.bf16.mxu1 %v7166_v58 }
 0x86e   :  { %3361 = vmatpush1.bf16.msra.mxu0 %v7169_v47  ;;  %3402 = vmatpush1.bf16.msra.mxu1 %v7172_v62 }
 0x86f   :  { %3362 = vmatprep.subr.bf16.mxu0 %v7175_v22  ;;  %3403 = vmatprep.subr.bf16.mxu1 %v7178_v37 }
 0x872   :  { %3363 = vmatpush1.bf16.msra.mxu0 %v7181_v34  ;;  %3404 = vmatpush1.bf16.msra.mxu1 %v7184_v19 }
 0x873   :  { %3364 = vmatprep.subr.bf16.mxu0 %v7187_v16  ;;  %3405 = vmatprep.subr.bf16.mxu1 %v7190_v8 }
 0x876   :  { %3365 = vmatpush1.bf16.msra.mxu0 %v7193_v5  ;;  %3406 = vmatpush1.bf16.msra.mxu1 %v7196_v15 }
 0x877   :  { %3366 = vmatprep.subr.bf16.mxu0 %v7199_v4  ;;  %3407 = vmatprep.subr.bf16.mxu1 %v7202_v33 }
 0x87a   :  { %3367 = vmatpush1.bf16.msra.mxu0 %v7205_v53  ;;  %3408 = vmatpush1.bf16.msra.mxu1 %v7208_v27 }
 0x87b   :  { %3368 = vmatprep.subr.bf16.mxu0 %v7211_v29  ;;  %3409 = vmatprep.subr.bf16.mxu1 %v7214_v1 }
 0x87e   :  { %3369 = vmatpush1.bf16.msra.mxu0 %v7217_v52  ;;  %3410 = vmatpush1.bf16.msra.mxu1 %v7220_v2 }
 0x87f   :  { %3370 = vmatprep.subr.bf16.mxu0 %v7223_v59  ;;  %3411 = vmatprep.subr.bf16.mxu1 %v7226_v56 }
 0x882   :  { %3371 = vmatpush1.bf16.msra.mxu0 %v7229_v38  ;;  %3412 = vmatpush1.bf16.msra.mxu1 %v7232_v10 }
 0x883   :  { %3372 = vmatprep.subr.bf16.mxu0 %v7235_v18  ;;  %3413 = vmatprep.subr.bf16.mxu1 %v7238_v41 }
 0x886   :  { %3373 = vmatpush1.bf16.msra.mxu0 %v7241_v23  ;;  %3414 = vmatpush1.bf16.msra.mxu1 %v7244_v30 }
 0x887   :  { %3374 = vmatprep.subr.bf16.mxu0 %v7247_v20  ;;  %3415 = vmatprep.subr.bf16.mxu1 %v7250_v57 }
 0x88a   :  { %3375 = vmatpush1.bf16.msra.mxu0 %v7253_v7  ;;  %3416 = vmatpush1.bf16.msra.mxu1 %v7256_v55 }
 0x88b   :  { %3376 = vmatprep.subr.bf16.mxu0 %v7259_v21  ;;  %3417 = vmatprep.subr.bf16.mxu1 %v7262_v14 }
 0x88e   :  { %3377 = vmatpush1.bf16.msra.mxu0 %v7265_v35  ;;  %3418 = vmatpush1.bf16.msra.mxu1 %v7268_v0 }
 0x88f   :  { %3378 = vmatprep.subr.bf16.mxu0 %v7271_v25  ;;  %3419 = vmatprep.subr.bf16.mxu1 %v7274_v36  ;;  %v8733_v36 = vld [vmem:[#allocation29_spill] sm:$0xff] }
 0x892   :  { %3379 = vmatpush1.bf16.msra.mxu0 %v7277_v6  ;;  %3420 = vmatpush1.bf16.msra.mxu1 %v7280_v39  ;;  %v8732_v39 = vld [vmem:[#allocation27_spill] sm:$0xff] }
 0x893   :  { %3380 = vmatprep.subr.bf16.mxu0 %v7283_v9  ;;  %3421 = vmatprep.subr.bf16.mxu1 %v7286_v40  ;;  %v8731_v9 = vld [vmem:[#allocation30_spill] sm:$0xff] }
 0x896   :  { %3381 = vmatpush1.bf16.msra.mxu0 %v7289_v61  ;;  %3422 = vmatpush1.bf16.msra.mxu1 %v7292_v50  ;;  %v8730_v61 = vld [vmem:[#allocation28_spill] sm:$0xff] }
 0x897   :  { %3382 = vmatprep.subr.bf16.mxu0 %v7295_v48  ;;  %3423 = vmatprep.subr.bf16.mxu1 %v7298_v43 }
 0x89a   :  { %3383 = vmatpush1.bf16.msra.mxu0 %v7301_v60  ;;  %3424 = vmatpush1.bf16.msra.mxu1 %v7304_v17 }
 0x89b   :  { %3384 = vmatprep.subr.bf16.mxu0 %v7307_v13  ;;  %3425 = vmatprep.subr.bf16.mxu1 %v7310_v49  ;;  %v7325_v13 = vld [vmem:[#allocation3 + $0x3c0] sm:$0xff]  ;;  %v7328_v49 = vld [vmem:[#allocation3 + $0x3d0] sm:$0xff] }
 0x89c   :  { %8726 = vst [vmem:[#allocation53_spill] sm:$0xff] %v7325_v13  ;;  %8727 = vst [vmem:[#allocation92_spill] sm:$0xff] %v7328_v49 }
 0x89e   :  { %3385 = vmatpush1.bf16.msra.mxu0 %v7313_v12  ;;  %3426 = vmatpush1.bf16.msra.mxu1 %v7316_v54  ;;  %v7331_v12 = vld [vmem:[#allocation3 + $0x28] sm:$0xff]  ;;  %v7334_v54 = vld [vmem:[#allocation3 + $0x38] sm:$0xff] }
 0x89f   :  { %3386 = vmatprep.subr.bf16.mxu0 %v7319_v32  ;;  %3427 = vmatprep.subr.bf16.mxu1 %v7322_v28  ;;  %8728 = vst [vmem:[#allocation95_spill] sm:$0xff] %v7331_v12  ;;  %8729 = vst [vmem:[#allocation93_spill] sm:$0xff] %v7334_v54 }
 0x8a2   :  { %3387 = vmatpush1.bf16.msra.mxu0 %v7325_v13  ;;  %3428 = vmatpush1.bf16.msra.mxu1 %v7328_v49 }
 0x8a3   :  { %3438 = vmatprep.subr.bf16.mxu0 %v7331_v12  ;;  %3479 = vmatprep.subr.bf16.mxu1 %v7334_v54 }
 0x8f8   :  { %v3172_v32 = vpop.f32.mrb[72].mxu0  ;;  %v3213_v17 = vpop.f32.mrb[72].mxu1 }
 0x8f9   :  { %v3174_v60 = vpop.f32.mrb[73].mxu0  ;;  %v3215_v28 = vpop.f32.mrb[73].mxu1  ;;  %v3304_v40 = vadd.f32 %v3213_v17, %v8730_v61  ;;  %v3302_v6 = vadd.f32 %v3172_v32, %v8732_v39  ;;  %v8735_v17 = vld [vmem:[#allocation59_spill] sm:$0xff] }
 0x8fa   :  { %v3176_v43 = vpop.f32.mrb[74].mxu0  ;;  %v3217_v48 = vpop.f32.mrb[74].mxu1  ;;  %v3305_v49 = vadd.f32 %v3215_v28, %v8731_v9  ;;  %v3303_v12 = vadd.f32 %v3174_v60, %v8733_v36  ;;  %v8736_v28 = vld [vmem:[#allocation62_spill] sm:$0xff] }
 0x8fb   :  { %v3177_v50 = vpop.f32.mrb[75].mxu0  ;;  %v3218_v13 = vpop.f32.mrb[75].mxu1  ;;  %v3312_v25 = vmul.f32 0.5, %v3304_v40  ;;  %v3310_v35 = vmul.f32 0.5, %v3302_v6  ;;  %v8737_v6 = vld [vmem:[#allocation61_spill] sm:$0xff] }
 0x8fc   :  { %v3313_v0 = vmul.f32 0.5, %v3305_v49  ;;  %v3311_v54 = vmul.f32 0.5, %v3303_v12  ;;  %v8734_v50 = vld [vmem:[#allocation60_spill] sm:$0xff] }
 0x8fd   :  { %4213 = vtanh.f32 %v3312_v25 }
 0x8fe   :  { %4215 = vtanh.f32 %v3313_v0 }
 0x8ff   :  { %4217 = vtanh.f32 %v3310_v35 }
 0x900   :  { %4219 = vtanh.f32 %v3311_v54 }
 0x907   :  { %v4214_v40 = vpop.eup %4213 }
 0x908   :  { %v4216_v35 = vpop.eup %4215  ;;  %v3324_v54 = vmul.f32 0.5, %v4214_v40 }
 0x909   :  { %v4218_v49 = vpop.eup %4217 }
 0x90a   :  { %v4220_v12 = vpop.eup %4219  ;;  %v3322_v55 = vmul.f32 0.5, %v4218_v49 }
 0x938   :  { %v3254_v43 = vpop.f32.mrb[76].mxu0  ;;  %v3295_v48 = vpop.f32.mrb[76].mxu1 }
 0x939   :  { %v3308_v13 = vadd.f32 %v3295_v48, %v8734_v50  ;;  %v3256_v14 = vpop.f32.mrb[77].mxu0  ;;  %v3297_v61 = vpop.f32.mrb[77].mxu1  ;;  %v3306_v9 = vadd.f32 %v3254_v43, %v8735_v17  ;;  %v3325_v50 = vmul.f32 0.5, %v4216_v35  ;;  %v3323_v43 = vmul.f32 0.5, %v4220_v12 }
 0x93a   :  { %v3309_v39 = vadd.f32 %v3297_v61, %v8736_v28  ;;  %v3258_v32 = vpop.f32.mrb[78].mxu0  ;;  %v3299_v36 = vpop.f32.mrb[78].mxu1  ;;  %v3307_v60 = vadd.f32 %v3256_v14, %v8737_v6  ;;  %v3330_v17 = vadd.f32 0.5, %v3324_v54  ;;  %v3328_v28 = vadd.f32 0.5, %v3322_v55 }
 0x93b   :  { %4221 = vtanh.f32 %v3308_v13  ;;  %v3259_v25 = vpop.f32.mrb[79].mxu0  ;;  %v3300_v0 = vpop.f32.mrb[79].mxu1  ;;  %v3314_v48 = vmul.f32 0.5, %v3306_v9  ;;  %v3331_v61 = vadd.f32 0.5, %v3325_v50  ;;  %v3329_v32 = vadd.f32 0.5, %v3323_v43  ;;  %v7357_v43 = vld [vmem:[#allocation3 + $0x20] sm:$0xff] }
 0x93c   :  { %4223 = vtanh.f32 %v3309_v39  ;;  %v3315_v21 = vmul.f32 0.5, %v3307_v60  ;;  %v3336_v36 = vmul.f32 %v3330_v17, %v7065_v11  ;;  %v7360_v17 = vld [vmem:[#allocation3 + $0x30] sm:$0xff] }
 0x93d   :  { %4225 = vtanh.f32 %v3314_v48  ;;  %v3337_v39 = vmul.f32 %v3331_v61, %v7067_v51  ;;  %v7363_v61 = vld [vmem:[#allocation3 + $0x68] sm:$0xff] }
 0x93e   :  { %4227 = vtanh.f32 %v3315_v21 }
 0x945   :  { %v4222_v13 = vpop.eup %4221 }
 0x946   :  { %v4224_v14 = vpop.eup %4223  ;;  %v3338_v6 = vmul.f32 %v4222_v13, %v3328_v28  ;;  %v7366_v28 = vld [vmem:[#allocation3 + $0x78] sm:$0xff]  ;;  %v7369_v13 = vld [vmem:[#allocation3 + $0x60] sm:$0xff] }
 0x947   :  { %v3339_v25 = vmul.f32 %v4224_v14, %v3329_v32  ;;  %v4226_v60 = vpop.eup %4225  ;;  %v7372_v32 = vld [vmem:[#allocation3 + $0x70] sm:$0xff]  ;;  %v7375_v14 = vld [vmem:[#allocation3 + $0xa8] sm:$0xff] }
 0x948   :  { %v7347_v40 = vadd.f32 %v3338_v6, %v3336_v36  ;;  %v4228_v21 = vpop.eup %4227  ;;  %v3326_v55 = vmul.f32 0.5, %v4226_v60  ;;  %v7378_v36 = vld [vmem:[#allocation3 + $0xb8] sm:$0xff]  ;;  %v7381_v6 = vld [vmem:[#allocation3 + $0xa0] sm:$0xff] }
 0x949   :  { %v7349_v9 = vadd.f32 %v3339_v25, %v3337_v39  ;;  %v3327_v0 = vmul.f32 0.5, %v4228_v21  ;;  %v7384_v39 = vld [vmem:[#allocation3 + $0xb0] sm:$0xff]  ;;  %v7387_v25 = vld [vmem:[#allocation3 + $0xe8] sm:$0xff]  ;;  %v7390_v60 = vld [vmem:[#allocation3 + $0xf8] sm:$0xff] }
 0x94a   :  { %4229 = vtanh.f32 %v7347_v40  ;;  %v3332_v35 = vadd.f32 0.5, %v3326_v55  ;;  %v7393_v21 = vld [vmem:[#allocation3 + $0xe0] sm:$0xff]  ;;  %v7396_v55 = vld [vmem:[#allocation3 + $0xf0] sm:$0xff] }
 0x94b   :  { %4231 = vtanh.f32 %v7349_v9  ;;  %v3333_v12 = vadd.f32 0.5, %v3327_v0  ;;  %v7399_v0 = vld [vmem:[#allocation3 + $0x128] sm:$0xff] }
 0x954   :  { %v4230_v49 = vpop.eup %4229 }
 0x955   :  { %v4232_v11 = vpop.eup %4231  ;;  %v3344_v54 = vmul.f32 %v4230_v49, %v3332_v35  ;;  %v7402_v35 = vld [vmem:[#allocation3 + $0x138] sm:$0xff]  ;;  %v7405_v49 = vld [vmem:[#allocation3 + $0x120] sm:$0xff] }
 0x956   :  { %v3345_v48 = vmul.f32 %v4232_v11, %v3333_v12  ;;  %8738 = vst [vmem:[#allocation98_spill] sm:$0xff] %v7405_v49  ;;  %v7408_v12 = vld [vmem:[#allocation3 + $0x130] sm:$0xff]  ;;  %v7411_v11 = vld [vmem:[#allocation3 + $0x168] sm:$0xff] }
 0x957   :  { %v7353_v50 = vpack.c.bf16 %v3344_v54, %v3344_v54  ;;  %8739 = vst [vmem:[#allocation96_spill] sm:$0xff] %v7408_v12  ;;  %8740 = vst [vmem:[#allocation99_spill] sm:$0xff] %v7411_v11  ;;  %v7414_v54 = vld [vmem:[#allocation3 + $0x178] sm:$0xff] }
 0x958   :  { %v3355_v51 = vpack.c.bf16 %v3345_v48, %v3345_v48  ;;  %8741 = vst [vmem:[#allocation97_spill] sm:$0xff] %v7414_v54  ;;  %v7417_v48 = vld [vmem:[#allocation3 + $0x160] sm:$0xff] }
 0x959   :  { %8742 = vst [vmem:[#allocation102_spill] sm:$0xff] %v7417_v48 }
 0x95a   :  { %3388 = vmatprep.mubr.bf16.mxu0 %v3355_v51  ;;  %3429 = vmatprep.mubr.bf16.mxu1 %v3355_v51 }
 0x95b   :  { %3389 = vmatmul.mubr.bf16.vlgmr.msra.gmra.mrb[80].mxu0 %v7353_v50  ;;  %3430 = vmatmul.mubr.bf16.vlgmr.msra.gmra.mrb[80].mxu1 %v7353_v50 }
 0x95c   :  { %3439 = vmatpush1.bf16.msra.mxu0 %v7357_v43  ;;  %3480 = vmatpush1.bf16.msra.mxu1 %v7360_v17 }
 0x95d   :  { %3470 = vmatprep.mubr.bf16.mxu0 %v3355_v51  ;;  %3511 = vmatprep.mubr.bf16.mxu1 %v3355_v51  ;;  %v7420_v51 = vld [vmem:[#allocation3 + $0x170] sm:$0xff] }
 0x95e   :  { %3440 = vmatprep.subr.bf16.mxu0 %v7363_v61  ;;  %3481 = vmatprep.subr.bf16.mxu1 %v7366_v28  ;;  %8743 = vst [vmem:[#allocation100_spill] sm:$0xff] %v7420_v51 }
 0x960   :  { %3441 = vmatpush1.bf16.msra.mxu0 %v7369_v13  ;;  %3482 = vmatpush1.bf16.msra.mxu1 %v7372_v32 }
 0x961   :  { %3442 = vmatprep.subr.bf16.mxu0 %v7375_v14  ;;  %3483 = vmatprep.subr.bf16.mxu1 %v7378_v36 }
 0x964   :  { %3443 = vmatpush1.bf16.msra.mxu0 %v7381_v6  ;;  %3484 = vmatpush1.bf16.msra.mxu1 %v7384_v39 }
 0x965   :  { %3444 = vmatprep.subr.bf16.mxu0 %v7387_v25  ;;  %3485 = vmatprep.subr.bf16.mxu1 %v7390_v60 }
 0x968   :  { %3445 = vmatpush1.bf16.msra.mxu0 %v7393_v21  ;;  %3486 = vmatpush1.bf16.msra.mxu1 %v7396_v55 }
 0x969   :  { %3446 = vmatprep.subr.bf16.mxu0 %v7399_v0  ;;  %3487 = vmatprep.subr.bf16.mxu1 %v7402_v35 }
 0x96c   :  { %3447 = vmatpush1.bf16.msra.mxu0 %v7405_v49  ;;  %3488 = vmatpush1.bf16.msra.mxu1 %v7408_v12  ;;  %v7423_v49 = vld [vmem:[#allocation3 + $0x1a8] sm:$0xff]  ;;  %v7426_v12 = vld [vmem:[#allocation3 + $0x1b8] sm:$0xff] }
 0x96d   :  { %3448 = vmatprep.subr.bf16.mxu0 %v7411_v11  ;;  %3489 = vmatprep.subr.bf16.mxu1 %v7414_v54  ;;  %8744 = vst [vmem:[#allocation103_spill] sm:$0xff] %v7423_v49  ;;  %8745 = vst [vmem:[#allocation101_spill] sm:$0xff] %v7426_v12  ;;  %v7429_v11 = vld [vmem:[#allocation3 + $0x1a0] sm:$0xff]  ;;  %v7432_v54 = vld [vmem:[#allocation3 + $0x1b0] sm:$0xff] }
 0x96e   :  { %8746 = vst [vmem:[#allocation123_spill] sm:$0xff] %v7429_v11  ;;  %8747 = vst [vmem:[#allocation121_spill] sm:$0xff] %v7432_v54 }
 0x970   :  { %3449 = vmatpush1.bf16.msra.mxu0 %v7417_v48  ;;  %3490 = vmatpush1.bf16.msra.mxu1 %v7420_v51  ;;  %v7435_v48 = vld [vmem:[#allocation3 + $0x1e8] sm:$0xff]  ;;  %v7438_v51 = vld [vmem:[#allocation3 + $0x1f8] sm:$0xff] }
 0x971   :  { %3450 = vmatprep.subr.bf16.mxu0 %v7423_v49  ;;  %3491 = vmatprep.subr.bf16.mxu1 %v7426_v12  ;;  %8748 = vst [vmem:[#allocation126_spill] sm:$0xff] %v7435_v48  ;;  %8749 = vst [vmem:[#allocation124_spill] sm:$0xff] %v7438_v51  ;;  %v7441_v49 = vld [vmem:[#allocation3 + $0x1e0] sm:$0xff]  ;;  %v7444_v12 = vld [vmem:[#allocation3 + $0x1f0] sm:$0xff] }
 0x972   :  { %8750 = vst [vmem:[#allocation127_spill] sm:$0xff] %v7441_v49  ;;  %8751 = vst [vmem:[#allocation125_spill] sm:$0xff] %v7444_v12 }
 0x974   :  { %3451 = vmatpush1.bf16.msra.mxu0 %v7429_v11  ;;  %3492 = vmatpush1.bf16.msra.mxu1 %v7432_v54  ;;  %v7447_v11 = vld [vmem:[#allocation3 + $0x228] sm:$0xff]  ;;  %v7450_v54 = vld [vmem:[#allocation3 + $0x238] sm:$0xff] }
 0x975   :  { %3452 = vmatprep.subr.bf16.mxu0 %v7435_v48  ;;  %3493 = vmatprep.subr.bf16.mxu1 %v7438_v51  ;;  %8752 = vst [vmem:[#allocation130_spill] sm:$0xff] %v7447_v11  ;;  %8753 = vst [vmem:[#allocation128_spill] sm:$0xff] %v7450_v54  ;;  %v7453_v48 = vld [vmem:[#allocation3 + $0x220] sm:$0xff]  ;;  %v7456_v51 = vld [vmem:[#allocation3 + $0x230] sm:$0xff] }
 0x976   :  { %8754 = vst [vmem:[#allocation131_spill] sm:$0xff] %v7453_v48  ;;  %8755 = vst [vmem:[#allocation129_spill] sm:$0xff] %v7456_v51 }
 0x978   :  { %3453 = vmatpush1.bf16.msra.mxu0 %v7441_v49  ;;  %3494 = vmatpush1.bf16.msra.mxu1 %v7444_v12  ;;  %v7459_v49 = vld [vmem:[#allocation3 + $0x268] sm:$0xff]  ;;  %v7462_v12 = vld [vmem:[#allocation3 + $0x278] sm:$0xff] }
 0x979   :  { %3454 = vmatprep.subr.bf16.mxu0 %v7447_v11  ;;  %3495 = vmatprep.subr.bf16.mxu1 %v7450_v54  ;;  %8756 = vst [vmem:[#allocation134_spill] sm:$0xff] %v7459_v49  ;;  %8757 = vst [vmem:[#allocation8_spill] sm:$0xff] %v7462_v12  ;;  %v7465_v11 = vld [vmem:[#allocation3 + $0x260] sm:$0xff]  ;;  %v7468_v54 = vld [vmem:[#allocation3 + $0x270] sm:$0xff] }
 0x97a   :  { %8758 = vst [vmem:[#allocation10_spill] sm:$0xff] %v7465_v11  ;;  %8759 = vst [vmem:[#allocation7_spill] sm:$0xff] %v7468_v54 }
 0x97c   :  { %3455 = vmatpush1.bf16.msra.mxu0 %v7453_v48  ;;  %3496 = vmatpush1.bf16.msra.mxu1 %v7456_v51  ;;  %v7471_v48 = vld [vmem:[#allocation3 + $0x2a8] sm:$0xff]  ;;  %v7474_v51 = vld [vmem:[#allocation3 + $0x2b8] sm:$0xff] }
 0x97d   :  { %3456 = vmatprep.subr.bf16.mxu0 %v7459_v49  ;;  %3497 = vmatprep.subr.bf16.mxu1 %v7462_v12  ;;  %8760 = vst [vmem:[#allocation9_spill] sm:$0xff] %v7471_v48  ;;  %8761 = vst [vmem:[#allocation40_spill] sm:$0xff] %v7474_v51  ;;  %v7477_v49 = vld [vmem:[#allocation3 + $0x2a0] sm:$0xff]  ;;  %v7480_v12 = vld [vmem:[#allocation3 + $0x2b0] sm:$0xff] }
 0x97e   :  { %8762 = vst [vmem:[#allocation42_spill] sm:$0xff] %v7477_v49  ;;  %8763 = vst [vmem:[#allocation39_spill] sm:$0xff] %v7480_v12 }
 0x980   :  { %3457 = vmatpush1.bf16.msra.mxu0 %v7465_v11  ;;  %3498 = vmatpush1.bf16.msra.mxu1 %v7468_v54  ;;  %v7483_v11 = vld [vmem:[#allocation3 + $0x2e8] sm:$0xff]  ;;  %v7486_v54 = vld [vmem:[#allocation3 + $0x2f8] sm:$0xff] }
 0x981   :  { %3458 = vmatprep.subr.bf16.mxu0 %v7471_v48  ;;  %3499 = vmatprep.subr.bf16.mxu1 %v7474_v51  ;;  %8764 = vst [vmem:[#allocation41_spill] sm:$0xff] %v7483_v11  ;;  %8765 = vst [vmem:[#allocation106_spill] sm:$0xff] %v7486_v54  ;;  %v7489_v48 = vld [vmem:[#allocation3 + $0x2e0] sm:$0xff]  ;;  %v7492_v51 = vld [vmem:[#allocation3 + $0x2f0] sm:$0xff] }
 0x982   :  { %8766 = vst [vmem:[#allocation104_spill] sm:$0xff] %v7489_v48  ;;  %8767 = vst [vmem:[#allocation107_spill] sm:$0xff] %v7492_v51 }
 0x984   :  { %3459 = vmatpush1.bf16.msra.mxu0 %v7477_v49  ;;  %3500 = vmatpush1.bf16.msra.mxu1 %v7480_v12  ;;  %v7495_v49 = vld [vmem:[#allocation3 + $0x328] sm:$0xff]  ;;  %v7498_v12 = vld [vmem:[#allocation3 + $0x338] sm:$0xff] }
 0x985   :  { %3460 = vmatprep.subr.bf16.mxu0 %v7483_v11  ;;  %3501 = vmatprep.subr.bf16.mxu1 %v7486_v54  ;;  %8768 = vst [vmem:[#allocation105_spill] sm:$0xff] %v7495_v49  ;;  %8769 = vst [vmem:[#allocation110_spill] sm:$0xff] %v7498_v12  ;;  %v7501_v11 = vld [vmem:[#allocation3 + $0x320] sm:$0xff]  ;;  %v7504_v54 = vld [vmem:[#allocation3 + $0x330] sm:$0xff] }
 0x986   :  { %8770 = vst [vmem:[#allocation108_spill] sm:$0xff] %v7501_v11  ;;  %8771 = vst [vmem:[#allocation111_spill] sm:$0xff] %v7504_v54 }
 0x988   :  { %3461 = vmatpush1.bf16.msra.mxu0 %v7489_v48  ;;  %3502 = vmatpush1.bf16.msra.mxu1 %v7492_v51  ;;  %v7507_v48 = vld [vmem:[#allocation3 + $0x368] sm:$0xff]  ;;  %v7510_v51 = vld [vmem:[#allocation3 + $0x378] sm:$0xff] }
 0x989   :  { %3462 = vmatprep.subr.bf16.mxu0 %v7495_v49  ;;  %3503 = vmatprep.subr.bf16.mxu1 %v7498_v12  ;;  %8772 = vst [vmem:[#allocation109_spill] sm:$0xff] %v7507_v48  ;;  %8773 = vst [vmem:[#allocation144_spill] sm:$0xff] %v7510_v51  ;;  %v7513_v49 = vld [vmem:[#allocation3 + $0x360] sm:$0xff]  ;;  %v7516_v12 = vld [vmem:[#allocation3 + $0x370] sm:$0xff] }
 0x98a   :  { %8774 = vst [vmem:[#allocation147_spill] sm:$0xff] %v7513_v49  ;;  %8775 = vst [vmem:[#allocation145_spill] sm:$0xff] %v7516_v12 }
 0x98c   :  { %3463 = vmatpush1.bf16.msra.mxu0 %v7501_v11  ;;  %3504 = vmatpush1.bf16.msra.mxu1 %v7504_v54  ;;  %v7519_v11 = vld [vmem:[#allocation3 + $0x3a8] sm:$0xff]  ;;  %v7522_v54 = vld [vmem:[#allocation3 + $0x3b8] sm:$0xff] }
 0x98d   :  { %3464 = vmatprep.subr.bf16.mxu0 %v7507_v48  ;;  %3505 = vmatprep.subr.bf16.mxu1 %v7510_v51  ;;  %8776 = vst [vmem:[#allocation148_spill] sm:$0xff] %v7519_v11  ;;  %8777 = vst [vmem:[#allocation151_spill] sm:$0xff] %v7522_v54  ;;  %v7525_v48 = vld [vmem:[#allocation3 + $0x3a0] sm:$0xff]  ;;  %v7528_v51 = vld [vmem:[#allocation3 + $0x3b0] sm:$0xff] }
 0x990   :  { %3465 = vmatpush1.bf16.msra.mxu0 %v7513_v49  ;;  %3506 = vmatpush1.bf16.msra.mxu1 %v7516_v12  ;;  %v7531_v49 = vld [vmem:[#allocation3 + $0x3e8] sm:$0xff]  ;;  %v7534_v12 = vld [vmem:[#allocation3 + $0x3f8] sm:$0xff] }
 0x991   :  { %3466 = vmatprep.subr.bf16.mxu0 %v7519_v11  ;;  %3507 = vmatprep.subr.bf16.mxu1 %v7522_v54  ;;  %v7537_v11 = vld [vmem:[#allocation3 + $0x3e0] sm:$0xff]  ;;  %v7540_v54 = vld [vmem:[#allocation3 + $0x3f0] sm:$0xff] }
 0x994   :  { %3467 = vmatpush1.bf16.msra.mxu0 %v7525_v48  ;;  %3508 = vmatpush1.bf16.msra.mxu1 %v7528_v51 }
 0x995   :  { %3468 = vmatprep.subr.bf16.mxu0 %v7531_v49  ;;  %3509 = vmatprep.subr.bf16.mxu1 %v7534_v12 }
 0x998   :  { %3469 = vmatpush1.bf16.msra.mxu0 %v7537_v11  ;;  %3510 = vmatpush1.bf16.msra.mxu1 %v7540_v54 }
 0x999   :  { %3574 = vmatprep.subr.bf16.mxu0 %v7137_v63  ;;  %3615 = vmatprep.subr.bf16.mxu1 %v7140_v44  ;;  %v8778_v63 = vld [vmem:[#allocation139_spill] sm:$0xff]  ;;  %v8779_v44 = vld [vmem:[#allocation137_spill] sm:$0xff] }
 0x99b   :  { %3471 = vmatmul.mubr.bf16.vlgmr.msra.gmra.mrb[84].mxu0 %v7353_v50  ;;  %3512 = vmatmul.mubr.bf16.vlgmr.msra.gmra.mrb[84].mxu1 %v7353_v50  ;;  %v8807_v50 = vld [vmem:[#allocation31_spill] sm:$0xff] }
 0x99c   :  { %3575 = vmatpush1.bf16.msra.mxu0 %v7145_v42  ;;  %3616 = vmatpush1.bf16.msra.mxu1 %v7148_v45  ;;  %v8780_v42 = vld [vmem:[#allocation142_spill] sm:$0xff]  ;;  %v8781_v45 = vld [vmem:[#allocation140_spill] sm:$0xff] }
 0x99d   :  { %3576 = vmatprep.subr.bf16.mxu0 %v7151_v26  ;;  %3617 = vmatprep.subr.bf16.mxu1 %v7154_v3  ;;  %v8782_v26 = vld [vmem:[#allocation143_spill] sm:$0xff]  ;;  %v8783_v3 = vld [vmem:[#allocation141_spill] sm:$0xff] }
 0x9a0   :  { %3577 = vmatpush1.bf16.msra.mxu0 %v7157_v24  ;;  %3618 = vmatpush1.bf16.msra.mxu1 %v7160_v46  ;;  %v8784_v24 = vld [vmem:[#allocation146_spill] sm:$0xff] }
 0x9a1   :  { %3578 = vmatprep.subr.bf16.mxu0 %v7163_v31  ;;  %3619 = vmatprep.subr.bf16.mxu1 %v7166_v58  ;;  %v8785_v46 = vld [vmem:[#allocation150_spill] sm:$0xff]  ;;  %v8786_v31 = vld [vmem:[#allocation16_spill] sm:$0xff] }
 0x9a2   :  { %v8787_v58 = vld [vmem:[#allocation18_spill] sm:$0xff] }
 0x9a4   :  { %3579 = vmatpush1.bf16.msra.mxu0 %v7169_v47  ;;  %3620 = vmatpush1.bf16.msra.mxu1 %v7172_v62  ;;  %v8788_v47 = vld [vmem:[#allocation15_spill] sm:$0xff]  ;;  %v8789_v62 = vld [vmem:[#allocation17_spill] sm:$0xff] }
 0x9a5   :  { %3580 = vmatprep.subr.bf16.mxu0 %v7175_v22  ;;  %3621 = vmatprep.subr.bf16.mxu1 %v7178_v37  ;;  %v8790_v22 = vld [vmem:[#allocation48_spill] sm:$0xff]  ;;  %v8791_v37 = vld [vmem:[#allocation47_spill] sm:$0xff] }
 0x9a8   :  { %3581 = vmatpush1.bf16.msra.mxu0 %v7181_v34  ;;  %3622 = vmatpush1.bf16.msra.mxu1 %v7184_v19  ;;  %v8792_v34 = vld [vmem:[#allocation50_spill] sm:$0xff]  ;;  %v8793_v19 = vld [vmem:[#allocation49_spill] sm:$0xff] }
 0x9a9   :  { %3582 = vmatprep.subr.bf16.mxu0 %v7187_v16  ;;  %3623 = vmatprep.subr.bf16.mxu1 %v7190_v8  ;;  %v8794_v16 = vld [vmem:[#allocation20_spill] sm:$0xff]  ;;  %v8795_v8 = vld [vmem:[#allocation22_spill] sm:$0xff] }
 0x9ac   :  { %3583 = vmatpush1.bf16.msra.mxu0 %v7193_v5  ;;  %3624 = vmatpush1.bf16.msra.mxu1 %v7196_v15  ;;  %v8796_v5 = vld [vmem:[#allocation19_spill] sm:$0xff]  ;;  %v8797_v15 = vld [vmem:[#allocation21_spill] sm:$0xff] }
 0x9ad   :  { %3584 = vmatprep.subr.bf16.mxu0 %v7199_v4  ;;  %3625 = vmatprep.subr.bf16.mxu1 %v7202_v33  ;;  %v8798_v4 = vld [vmem:[#allocation52_spill] sm:$0xff]  ;;  %v8799_v33 = vld [vmem:[#allocation51_spill] sm:$0xff] }
 0x9b0   :  { %3585 = vmatpush1.bf16.msra.mxu0 %v7205_v53  ;;  %3626 = vmatpush1.bf16.msra.mxu1 %v7208_v27  ;;  %v8800_v53 = vld [vmem:[#allocation54_spill] sm:$0xff]  ;;  %v8801_v27 = vld [vmem:[#allocation53_spill] sm:$0xff] }
 0x9b1   :  { %3586 = vmatprep.subr.bf16.mxu0 %v7211_v29  ;;  %3627 = vmatprep.subr.bf16.mxu1 %v7214_v1  ;;  %v8802_v29 = vld [vmem:[#allocation92_spill] sm:$0xff]  ;;  %v8803_v1 = vld [vmem:[#allocation95_spill] sm:$0xff] }
 0x9b4   :  { %3587 = vmatpush1.bf16.msra.mxu0 %v7217_v52  ;;  %3628 = vmatpush1.bf16.msra.mxu1 %v7220_v2  ;;  %v8804_v52 = vld [vmem:[#allocation93_spill] sm:$0xff] }
 0x9b5   :  { %3588 = vmatprep.subr.bf16.mxu0 %v7223_v59  ;;  %3629 = vmatprep.subr.bf16.mxu1 %v7226_v56 }
 0x9b8   :  { %3589 = vmatpush1.bf16.msra.mxu0 %v7229_v38  ;;  %3630 = vmatpush1.bf16.msra.mxu1 %v7232_v10 }
 0x9b9   :  { %3590 = vmatprep.subr.bf16.mxu0 %v7235_v18  ;;  %3631 = vmatprep.subr.bf16.mxu1 %v7238_v41 }
 0x9bc   :  { %3591 = vmatpush1.bf16.msra.mxu0 %v7241_v23  ;;  %3632 = vmatpush1.bf16.msra.mxu1 %v7244_v30  ;;  %v8805_v30 = vld [vmem:[#allocation32_spill] sm:$0xff] }
 0x9bd   :  { %3592 = vmatprep.subr.bf16.mxu0 %v7247_v20  ;;  %3633 = vmatprep.subr.bf16.mxu1 %v7250_v57  ;;  %v8806_v57 = vld [vmem:[#allocation34_spill] sm:$0xff] }
 0x9c0   :  { %3593 = vmatpush1.bf16.msra.mxu0 %v7253_v7  ;;  %3634 = vmatpush1.bf16.msra.mxu1 %v8778_v63 }
 0x9c1   :  { %3594 = vmatprep.subr.bf16.mxu0 %v8779_v44  ;;  %3635 = vmatprep.subr.bf16.mxu1 %v8780_v42  ;;  %v8808_v44 = vld [vmem:[#allocation33_spill] sm:$0xff] }
 0x9c4   :  { %3595 = vmatpush1.bf16.msra.mxu0 %v8781_v45  ;;  %3636 = vmatpush1.bf16.msra.mxu1 %v8782_v26 }
 0x9c5   :  { %3596 = vmatprep.subr.bf16.mxu0 %v8783_v3  ;;  %3637 = vmatprep.subr.bf16.mxu1 %v8784_v24 }
 0x9c8   :  { %3597 = vmatpush1.bf16.msra.mxu0 %v8785_v46  ;;  %3638 = vmatpush1.bf16.msra.mxu1 %v8786_v31 }
 0x9c9   :  { %3598 = vmatprep.subr.bf16.mxu0 %v8787_v58  ;;  %3639 = vmatprep.subr.bf16.mxu1 %v8788_v47  ;;  %v8809_v58 = vld [vmem:[#allocation64_spill] sm:$0xff] }
 0x9cc   :  { %3599 = vmatpush1.bf16.msra.mxu0 %v8789_v62  ;;  %3640 = vmatpush1.bf16.msra.mxu1 %v8790_v22 }
 0x9cd   :  { %3600 = vmatprep.subr.bf16.mxu0 %v8791_v37  ;;  %3641 = vmatprep.subr.bf16.mxu1 %v8792_v34  ;;  %v8810_v37 = vld [vmem:[#allocation63_spill] sm:$0xff] }
 0x9d0   :  { %3601 = vmatpush1.bf16.msra.mxu0 %v8793_v19  ;;  %3642 = vmatpush1.bf16.msra.mxu1 %v8794_v16  ;;  %v8811_v19 = vld [vmem:[#allocation66_spill] sm:$0xff] }
 0x9d1   :  { %3602 = vmatprep.subr.bf16.mxu0 %v8795_v8  ;;  %3643 = vmatprep.subr.bf16.mxu1 %v8796_v5 }
 0x9d4   :  { %3603 = vmatpush1.bf16.msra.mxu0 %v8797_v15  ;;  %3644 = vmatpush1.bf16.msra.mxu1 %v8798_v4  ;;  %v8812_v4 = vld [vmem:[#allocation65_spill] sm:$0xff] }
 0x9d5   :  { %3604 = vmatprep.subr.bf16.mxu0 %v8799_v33  ;;  %3645 = vmatprep.subr.bf16.mxu1 %v8800_v53 }
 0x9d8   :  { %3605 = vmatpush1.bf16.msra.mxu0 %v8801_v27  ;;  %3646 = vmatpush1.bf16.msra.mxu1 %v8802_v29 }
 0x9d9   :  { %3656 = vmatprep.subr.bf16.mxu0 %v8803_v1  ;;  %3697 = vmatprep.subr.bf16.mxu1 %v8804_v52 }
 0xa2e   :  { %v3390_v2 = vpop.f32.mrb[80].mxu0  ;;  %v3431_v59 = vpop.f32.mrb[80].mxu1 }
 0xa2f   :  { %v3392_v56 = vpop.f32.mrb[81].mxu0  ;;  %v3433_v38 = vpop.f32.mrb[81].mxu1  ;;  %v3522_v20 = vadd.f32 %v3431_v59, %v8805_v30  ;;  %v3520_v63 = vadd.f32 %v3390_v2, %v8807_v50 }
 0xa30   :  { %v3394_v10 = vpop.f32.mrb[82].mxu0  ;;  %v3435_v18 = vpop.f32.mrb[82].mxu1  ;;  %v3523_v7 = vadd.f32 %v3433_v38, %v8806_v57  ;;  %v3521_v42 = vadd.f32 %v3392_v56, %v8808_v44 }
 0xa31   :  { %v3395_v41 = vpop.f32.mrb[83].mxu0  ;;  %v3436_v23 = vpop.f32.mrb[83].mxu1  ;;  %v3530_v45 = vmul.f32 0.5, %v3522_v20  ;;  %v3528_v3 = vmul.f32 0.5, %v3520_v63 }
 0xa32   :  { %v3531_v26 = vmul.f32 0.5, %v3523_v7  ;;  %v3529_v24 = vmul.f32 0.5, %v3521_v42 }
 0xa33   :  { %4233 = vtanh.f32 %v3530_v45 }
 0xa34   :  { %4235 = vtanh.f32 %v3531_v26 }
 0xa35   :  { %4237 = vtanh.f32 %v3528_v3 }
 0xa36   :  { %4239 = vtanh.f32 %v3529_v24 }
 0xa3d   :  { %v4234_v15 = vpop.eup %4233 }
 0xa3e   :  { %v4236_v29 = vpop.eup %4235  ;;  %v3542_v2 = vmul.f32 0.5, %v4234_v15  ;;  %v8833_v15 = vld [vmem:[#allocation10_spill] sm:$0xff] }
 0xa3f   :  { %v4238_v1 = vpop.eup %4237  ;;  %v3543_v56 = vmul.f32 0.5, %v4236_v29  ;;  %v8838_v29 = vld [vmem:[#allocation39_spill] sm:$0xff] }
 0xa40   :  { %v4240_v52 = vpop.eup %4239  ;;  %v3540_v10 = vmul.f32 0.5, %v4238_v1  ;;  %v3548_v41 = vadd.f32 0.5, %v3542_v2  ;;  %v8839_v1 = vld [vmem:[#allocation41_spill] sm:$0xff]  ;;  %v8841_v2 = vld [vmem:[#allocation104_spill] sm:$0xff] }
 0xa41   :  { %v3541_v18 = vmul.f32 0.5, %v4240_v52  ;;  %v3549_v23 = vadd.f32 0.5, %v3543_v56  ;;  %v8840_v52 = vld [vmem:[#allocation106_spill] sm:$0xff]  ;;  %v8843_v56 = vld [vmem:[#allocation105_spill] sm:$0xff] }
 0xa42   :  { %v3546_v30 = vadd.f32 0.5, %v3540_v10  ;;  %v3554_v50 = vmul.f32 %v3548_v41, %v7347_v40  ;;  %v8845_v10 = vld [vmem:[#allocation108_spill] sm:$0xff]  ;;  %v8847_v41 = vld [vmem:[#allocation109_spill] sm:$0xff] }
 0xa43   :  { %v3547_v57 = vadd.f32 0.5, %v3541_v18  ;;  %v3555_v44 = vmul.f32 %v3549_v23, %v7349_v9  ;;  %v8846_v18 = vld [vmem:[#allocation111_spill] sm:$0xff]  ;;  %v8848_v23 = vld [vmem:[#allocation144_spill] sm:$0xff] }
 0xa6e   :  { %v3472_v46 = vpop.f32.mrb[84].mxu0  ;;  %v3513_v31 = vpop.f32.mrb[84].mxu1 }
 0xa6f   :  { %v3526_v47 = vadd.f32 %v3513_v31, %v8809_v58  ;;  %v3474_v62 = vpop.f32.mrb[85].mxu0  ;;  %v3515_v22 = vpop.f32.mrb[85].mxu1  ;;  %v3524_v34 = vadd.f32 %v3472_v46, %v8810_v37 }
 0xa70   :  { %v3527_v16 = vadd.f32 %v3515_v22, %v8811_v19  ;;  %v3476_v8 = vpop.f32.mrb[86].mxu0  ;;  %v3517_v5 = vpop.f32.mrb[86].mxu1  ;;  %v3525_v33 = vadd.f32 %v3474_v62, %v8812_v4  ;;  %v8829_v19 = vld [vmem:[#allocation131_spill] sm:$0xff] }
 0xa71   :  { %4241 = vtanh.f32 %v3526_v47  ;;  %v3477_v53 = vpop.f32.mrb[87].mxu0  ;;  %v3518_v27 = vpop.f32.mrb[87].mxu1  ;;  %v3532_v59 = vmul.f32 0.5, %v3524_v34  ;;  %v8831_v8 = vld [vmem:[#allocation134_spill] sm:$0xff]  ;;  %v8832_v5 = vld [vmem:[#allocation8_spill] sm:$0xff]  ;;  %v8834_v4 = vld [vmem:[#allocation7_spill] sm:$0xff] }
 0xa72   :  { %4243 = vtanh.f32 %v3527_v16  ;;  %v3533_v38 = vmul.f32 0.5, %v3525_v33  ;;  %v8830_v16 = vld [vmem:[#allocation129_spill] sm:$0xff]  ;;  %v8836_v53 = vld [vmem:[#allocation40_spill] sm:$0xff]  ;;  %v8837_v27 = vld [vmem:[#allocation42_spill] sm:$0xff] }
 0xa73   :  { %4245 = vtanh.f32 %v3532_v59  ;;  %v8835_v33 = vld [vmem:[#allocation9_spill] sm:$0xff]  ;;  %v8842_v59 = vld [vmem:[#allocation107_spill] sm:$0xff] }
 0xa74   :  { %4247 = vtanh.f32 %v3533_v38  ;;  %v8844_v38 = vld [vmem:[#allocation110_spill] sm:$0xff] }
 0xa7b   :  { %v4242_v20 = vpop.eup %4241 }
 0xa7c   :  { %v4244_v7 = vpop.eup %4243  ;;  %v3556_v63 = vmul.f32 %v4242_v20, %v3546_v30  ;;  %v8849_v30 = vld [vmem:[#allocation147_spill] sm:$0xff]  ;;  %v8850_v20 = vld [vmem:[#allocation145_spill] sm:$0xff] }
 0xa7d   :  { %v3557_v42 = vmul.f32 %v4244_v7, %v3547_v57  ;;  %v4246_v3 = vpop.eup %4245  ;;  %v8851_v57 = vld [vmem:[#allocation148_spill] sm:$0xff]  ;;  %v8852_v7 = vld [vmem:[#allocation151_spill] sm:$0xff] }
 0xa7e   :  { %v7621_v45 = vadd.f32 %v3556_v63, %v3554_v50  ;;  %v4248_v24 = vpop.eup %4247  ;;  %v3544_v46 = vmul.f32 0.5, %v4246_v3  ;;  %v4097_v50 = vld [vmem:[%s7763_s4 + $0x40] sm:$0xff]   ;;  %v4104_v63 = vld [vmem:[%s7763_s4 + $0x18] sm:$0xff]   ;;  %v4107_v3 = vld [vmem:[%s7763_s4 + $0x68] sm:$0xff]  }
 0xa7f   :  { %v7623_v26 = vadd.f32 %v3557_v42, %v3555_v44  ;;  %v3545_v31 = vmul.f32 0.5, %v4248_v24  ;;  %v4105_v44 = vld [vmem:[%s7763_s4 + $0x60] sm:$0xff]   ;;  %v4108_v24 = vld [vmem:[%s7763_s4 + $0x28] sm:$0xff]  }
 0xa80   :  { %4249 = vtanh.f32 %v7621_v45  ;;  %v3550_v58 = vadd.f32 0.5, %v3544_v46  ;;  %v4106_v42 = vld [vmem:[%s7763_s4 + $0x20] sm:$0xff]   ;;  %v4109_v46 = vld [vmem:[%s7763_s4 + $0x70] sm:$0xff]  }
 0xa81   :  { %4251 = vtanh.f32 %v7623_v26  ;;  %v3551_v62 = vadd.f32 0.5, %v3545_v31  ;;  %v4110_v31 = vld [vmem:[%s7763_s4 + $0x30] sm:$0xff]  }
 0xa8a   :  { %v4250_v47 = vpop.eup %4249 }
 0xa8b   :  { %v4252_v40 = vpop.eup %4251  ;;  %v3562_v22 = vmul.f32 %v4250_v47, %v3550_v58  ;;  %v4111_v58 = vld [vmem:[%s7763_s4 + $0x78] sm:$0xff]  }
 0xa8c   :  { %v3563_v37 = vmul.f32 %v4252_v40, %v3551_v62  ;;  %v4112_v47 = vld [vmem:[%s7763_s4 + $0x38] sm:$0xff]  }
 0xa8d   :  { %v7627_v34 = vpack.c.bf16 %v3562_v22, %v3562_v22 }
 0xa8e   :  { %v3573_v9 = vpack.c.bf16 %v3563_v37, %v3563_v37 }
 0xa90   :  { %3606 = vmatprep.mubr.bf16.mxu0 %v3573_v9  ;;  %3647 = vmatprep.mubr.bf16.mxu1 %v3573_v9 }
 0xa91   :  { %3607 = vmatmul.mubr.bf16.vlgmr.msra.gmra.mrb[88].mxu0 %v7627_v34  ;;  %3648 = vmatmul.mubr.bf16.vlgmr.msra.gmra.mrb[88].mxu1 %v7627_v34 }
 0xa92   :  { %3657 = vmatpush1.bf16.msra.mxu0 %v7357_v43  ;;  %3698 = vmatpush1.bf16.msra.mxu1 %v7360_v17  ;;  %v8813_v43 = vld [vmem:[#allocation98_spill] sm:$0xff]  ;;  %v8814_v17 = vld [vmem:[#allocation96_spill] sm:$0xff] }
 0xa93   :  { %3688 = vmatprep.mubr.bf16.mxu0 %v3573_v9  ;;  %3729 = vmatprep.mubr.bf16.mxu1 %v3573_v9 }
 0xa94   :  { %3658 = vmatprep.subr.bf16.mxu0 %v7363_v61  ;;  %3699 = vmatprep.subr.bf16.mxu1 %v7366_v28  ;;  %v8815_v61 = vld [vmem:[#allocation99_spill] sm:$0xff]  ;;  %v8816_v28 = vld [vmem:[#allocation97_spill] sm:$0xff] }
 0xa96   :  { %3659 = vmatpush1.bf16.msra.mxu0 %v7369_v13  ;;  %3700 = vmatpush1.bf16.msra.mxu1 %v7372_v32  ;;  %v8817_v13 = vld [vmem:[#allocation102_spill] sm:$0xff]  ;;  %v8818_v32 = vld [vmem:[#allocation100_spill] sm:$0xff] }
 0xa97   :  { %3660 = vmatprep.subr.bf16.mxu0 %v7375_v14  ;;  %3701 = vmatprep.subr.bf16.mxu1 %v7378_v36  ;;  %v8819_v14 = vld [vmem:[#allocation103_spill] sm:$0xff]  ;;  %v8820_v36 = vld [vmem:[#allocation101_spill] sm:$0xff] }
 0xa9a   :  { %3661 = vmatpush1.bf16.msra.mxu0 %v7381_v6  ;;  %3702 = vmatpush1.bf16.msra.mxu1 %v7384_v39  ;;  %v8821_v6 = vld [vmem:[#allocation123_spill] sm:$0xff]  ;;  %v8822_v39 = vld [vmem:[#allocation121_spill] sm:$0xff] }
 0xa9b   :  { %3662 = vmatprep.subr.bf16.mxu0 %v7387_v25  ;;  %3703 = vmatprep.subr.bf16.mxu1 %v7390_v60  ;;  %v8823_v25 = vld [vmem:[#allocation126_spill] sm:$0xff]  ;;  %v8824_v60 = vld [vmem:[#allocation124_spill] sm:$0xff] }
 0xa9e   :  { %3663 = vmatpush1.bf16.msra.mxu0 %v7393_v21  ;;  %3704 = vmatpush1.bf16.msra.mxu1 %v7396_v55  ;;  %v8825_v21 = vld [vmem:[#allocation127_spill] sm:$0xff]  ;;  %v8826_v55 = vld [vmem:[#allocation125_spill] sm:$0xff] }
 0xa9f   :  { %3664 = vmatprep.subr.bf16.mxu0 %v7399_v0  ;;  %3705 = vmatprep.subr.bf16.mxu1 %v7402_v35  ;;  %v8827_v0 = vld [vmem:[#allocation130_spill] sm:$0xff]  ;;  %v8828_v35 = vld [vmem:[#allocation128_spill] sm:$0xff] }
 0xaa2   :  { %3665 = vmatpush1.bf16.msra.mxu0 %v8813_v43  ;;  %3706 = vmatpush1.bf16.msra.mxu1 %v8814_v17 }
 0xaa3   :  { %3666 = vmatprep.subr.bf16.mxu0 %v8815_v61  ;;  %3707 = vmatprep.subr.bf16.mxu1 %v8816_v28  ;;  %v8853_v61 = vld [vmem:[#allocation36_spill] sm:$0xff] }
 0xaa6   :  { %3667 = vmatpush1.bf16.msra.mxu0 %v8817_v13  ;;  %3708 = vmatpush1.bf16.msra.mxu1 %v8818_v32  ;;  %v8854_v13 = vld [vmem:[#allocation38_spill] sm:$0xff] }
 0xaa7   :  { %3668 = vmatprep.subr.bf16.mxu0 %v8819_v14  ;;  %3709 = vmatprep.subr.bf16.mxu1 %v8820_v36  ;;  %v8855_v14 = vld [vmem:[#allocation35_spill] sm:$0xff] }
 0xaaa   :  { %3669 = vmatpush1.bf16.msra.mxu0 %v8821_v6  ;;  %3710 = vmatpush1.bf16.msra.mxu1 %v8822_v39  ;;  %v8856_v6 = vld [vmem:[#allocation37_spill] sm:$0xff] }
 0xaab   :  { %3670 = vmatprep.subr.bf16.mxu0 %v8823_v25  ;;  %3711 = vmatprep.subr.bf16.mxu1 %v8824_v60 }
 0xaae   :  { %3671 = vmatpush1.bf16.msra.mxu0 %v8825_v21  ;;  %3712 = vmatpush1.bf16.msra.mxu1 %v8826_v55 }
 0xaaf   :  { %3672 = vmatprep.subr.bf16.mxu0 %v8827_v0  ;;  %3713 = vmatprep.subr.bf16.mxu1 %v8828_v35 }
 0xab2   :  { %3673 = vmatpush1.bf16.msra.mxu0 %v8829_v19  ;;  %3714 = vmatpush1.bf16.msra.mxu1 %v8830_v16  ;;  %v8857_v19 = vld [vmem:[#allocation68_spill] sm:$0xff] }
 0xab3   :  { %3674 = vmatprep.subr.bf16.mxu0 %v8831_v8  ;;  %3715 = vmatprep.subr.bf16.mxu1 %v8832_v5 }
 0xab6   :  { %3675 = vmatpush1.bf16.msra.mxu0 %v8833_v15  ;;  %3716 = vmatpush1.bf16.msra.mxu1 %v8834_v4  ;;  %v8858_v15 = vld [vmem:[#allocation67_spill] sm:$0xff] }
 0xab7   :  { %3676 = vmatprep.subr.bf16.mxu0 %v8835_v33  ;;  %3717 = vmatprep.subr.bf16.mxu1 %v8836_v53  ;;  %v8859_v33 = vld [vmem:[#allocation70_spill] sm:$0xff] }
 0xaba   :  { %3677 = vmatpush1.bf16.msra.mxu0 %v8837_v27  ;;  %3718 = vmatpush1.bf16.msra.mxu1 %v8838_v29 }
 0xabb   :  { %3678 = vmatprep.subr.bf16.mxu0 %v8839_v1  ;;  %3719 = vmatprep.subr.bf16.mxu1 %v8840_v52  ;;  %v8860_v52 = vld [vmem:[#allocation69_spill] sm:$0xff] }
 0xabe   :  { %3679 = vmatpush1.bf16.msra.mxu0 %v8841_v2  ;;  %3720 = vmatpush1.bf16.msra.mxu1 %v8842_v59 }
 0xabf   :  { %3680 = vmatprep.subr.bf16.mxu0 %v8843_v56  ;;  %3721 = vmatprep.subr.bf16.mxu1 %v8844_v38 }
 0xac2   :  { %3681 = vmatpush1.bf16.msra.mxu0 %v8845_v10  ;;  %3722 = vmatpush1.bf16.msra.mxu1 %v8846_v18 }
 0xac3   :  { %3682 = vmatprep.subr.bf16.mxu0 %v8847_v41  ;;  %3723 = vmatprep.subr.bf16.mxu1 %v8848_v23 }
 0xac6   :  { %3683 = vmatpush1.bf16.msra.mxu0 %v8849_v30  ;;  %3724 = vmatpush1.bf16.msra.mxu1 %v8850_v20 }
 0xac7   :  { %3684 = vmatprep.subr.bf16.mxu0 %v8851_v57  ;;  %3725 = vmatprep.subr.bf16.mxu1 %v8852_v7 }
 0xaca   :  { %3685 = vmatpush1.bf16.msra.mxu0 %v7525_v48  ;;  %3726 = vmatpush1.bf16.msra.mxu1 %v7528_v51  ;;  %v4098_v48 = vld [vmem:[%s7763_s4] sm:$0xff]   ;;  %v4103_v51 = vld [vmem:[%s7763_s4 + $0x58] sm:$0xff]  }
 0xacb   :  { %3686 = vmatprep.subr.bf16.mxu0 %v7531_v49  ;;  %3727 = vmatprep.subr.bf16.mxu1 %v7534_v12  ;;  %v4099_v49 = vld [vmem:[%s7763_s4 + $0x48] sm:$0xff]  }
 0xacc   :  { %v4100_v12 = vld [vmem:[%s7763_s4 + $0x8] sm:$0xff]  }
 0xace   :  { %3687 = vmatpush1.bf16.msra.mxu0 %v7537_v11  ;;  %3728 = vmatpush1.bf16.msra.mxu1 %v7540_v54  ;;  %v4101_v11 = vld [vmem:[%s7763_s4 + $0x50] sm:$0xff]  }
 0xacf   :  { %4070 = vmatprep.subr.bf16.mxu0 %v4097_v50  ;;  %v4102_v54 = vld [vmem:[%s7763_s4 + $0x10] sm:$0xff]  }
 0xad1   :  { %3689 = vmatmul.mubr.bf16.vlgmr.msra.gmra.mrb[92].mxu0 %v7627_v34  ;;  %3730 = vmatmul.mubr.bf16.vlgmr.msra.gmra.mrb[92].mxu1 %v7627_v34 }
 0xad2   :  { %4071 = vmatpush3.bf16.msra.mxu0 %v4098_v48 }
 0xad3   :  { %4072 = vmatprep.subr.bf16.mxu0 %v4099_v49 }
 0xad6   :  { %4073 = vmatpush3.bf16.msra.mxu0 %v4100_v12 }
 0xad7   :  { %4074 = vmatprep.subr.bf16.mxu0 %v4101_v11 }
 0xada   :  { %4075 = vmatpush3.bf16.msra.mxu0 %v4102_v54 }
 0xadb   :  { %4076 = vmatprep.subr.bf16.mxu0 %v4103_v51 }
 0xade   :  { %4077 = vmatpush3.bf16.msra.mxu0 %v4104_v63 }
 0xadf   :  { %4078 = vmatprep.subr.bf16.mxu0 %v4105_v44 }
 0xae2   :  { %4079 = vmatpush3.bf16.msra.mxu0 %v4106_v42 }
 0xae3   :  { %4080 = vmatprep.subr.bf16.mxu0 %v4107_v3 }
 0xae6   :  { %4081 = vmatpush3.bf16.msra.mxu0 %v4108_v24 }
 0xae7   :  { %4082 = vmatprep.subr.bf16.mxu0 %v4109_v46 }
 0xaea   :  { %4083 = vmatpush3.bf16.msra.mxu0 %v4110_v31 }
 0xaeb   :  { %4084 = vmatprep.subr.bf16.mxu0 %v4111_v58 }
 0xaee   :  { %4085 = vmatpush3.bf16.msra.mxu0 %v4112_v47 }
 0xb64   :  { %v3608_v62 = vpop.f32.mrb[88].mxu0  ;;  %v3649_v40 = vpop.f32.mrb[88].mxu1 }
 0xb65   :  { %v3610_v22 = vpop.f32.mrb[89].mxu0  ;;  %v3651_v37 = vpop.f32.mrb[89].mxu1  ;;  %v3740_v28 = vadd.f32 %v3649_v40, %v8853_v61  ;;  %v3738_v36 = vadd.f32 %v3608_v62, %v8855_v14 }
 0xb66   :  { %v3612_v9 = vpop.f32.mrb[90].mxu0  ;;  %v3653_v34 = vpop.f32.mrb[90].mxu1  ;;  %v3741_v32 = vadd.f32 %v3651_v37, %v8854_v13  ;;  %v3739_v39 = vadd.f32 %v3610_v22, %v8856_v6 }
 0xb67   :  { %v3613_v43 = vpop.f32.mrb[91].mxu0  ;;  %v3654_v17 = vpop.f32.mrb[91].mxu1  ;;  %v3748_v25 = vmul.f32 0.5, %v3740_v28  ;;  %v3746_v21 = vmul.f32 0.5, %v3738_v36 }
 0xb68   :  { %v3749_v60 = vmul.f32 0.5, %v3741_v32  ;;  %v3747_v55 = vmul.f32 0.5, %v3739_v39  ;;  %v4052_v17 = vld [vmem:[%s7764_s5] ss:$0 sm:$0xff] }
 0xb69   :  { %4253 = vtanh.f32 %v3748_v25 }
 0xb6a   :  { %4255 = vtanh.f32 %v3749_v60 }
 0xb6b   :  { %4257 = vtanh.f32 %v3746_v21 }
 0xb6c   :  { %4259 = vtanh.f32 %v3747_v55 }
 0xb73   :  { %v4254_v1 = vpop.eup %4253 }
 0xb74   :  { %v4256_v38 = vpop.eup %4255  ;;  %v3760_v41 = vmul.f32 0.5, %v4254_v1 }
 0xb75   :  { %v4258_v10 = vpop.eup %4257  ;;  %v3761_v30 = vmul.f32 0.5, %v4256_v38 }
 0xb76   :  { %v4260_v18 = vpop.eup %4259  ;;  %v3758_v57 = vmul.f32 0.5, %v4258_v10  ;;  %v3766_v50 = vadd.f32 0.5, %v3760_v41 }
 0xb77   :  { %v3759_v7 = vmul.f32 0.5, %v4260_v18  ;;  %v3767_v48 = vadd.f32 0.5, %v3761_v30 }
 0xb78   :  { %v3764_v49 = vadd.f32 0.5, %v3758_v57  ;;  %v3772_v51 = vmul.f32 %v3766_v50, %v7621_v45 }
 0xb79   :  { %v3765_v11 = vadd.f32 0.5, %v3759_v7  ;;  %v3773_v44 = vmul.f32 %v3767_v48, %v7623_v26 }
 0xba4   :  { %v3690_v0 = vpop.f32.mrb[92].mxu0  ;;  %v3731_v35 = vpop.f32.mrb[92].mxu1 }
 0xba5   :  { %v3744_v16 = vadd.f32 %v3731_v35, %v8857_v19  ;;  %v3692_v8 = vpop.f32.mrb[93].mxu0  ;;  %v3733_v5 = vpop.f32.mrb[93].mxu1  ;;  %v3742_v4 = vadd.f32 %v3690_v0, %v8858_v15 }
 0xba6   :  { %v3745_v53 = vadd.f32 %v3733_v5, %v8859_v33  ;;  %v3694_v27 = vpop.f32.mrb[94].mxu0  ;;  %v3735_v29 = vpop.f32.mrb[94].mxu1  ;;  %v3743_v2 = vadd.f32 %v3692_v8, %v8860_v52 }
 0xba7   :  { %4261 = vtanh.f32 %v3744_v16  ;;  %v3695_v59 = vpop.f32.mrb[95].mxu0  ;;  %v3736_v56 = vpop.f32.mrb[95].mxu1  ;;  %v3750_v23 = vmul.f32 0.5, %v3742_v4 }
 0xba8   :  { %4263 = vtanh.f32 %v3745_v53  ;;  %v3751_v20 = vmul.f32 0.5, %v3743_v2 }
 0xba9   :  { %4265 = vtanh.f32 %v3750_v23 }
 0xbaa   :  { %4267 = vtanh.f32 %v3751_v20 }
 0xbb1   :  { %v4262_v12 = vpop.eup %4261 }
 0xbb2   :  { %v4264_v54 = vpop.eup %4263  ;;  %v3774_v63 = vmul.f32 %v4262_v12, %v3764_v49 }
 0xbb3   :  { %v3775_v42 = vmul.f32 %v4264_v54, %v3765_v11  ;;  %v4266_v46 = vpop.eup %4265 }
 0xbb4   :  { %v3776_v3 = vadd.f32 %v3774_v63, %v3772_v51  ;;  %v4268_v31 = vpop.eup %4267  ;;  %v3762_v58 = vmul.f32 0.5, %v4266_v46 }
 0xbb5   :  { %v3777_v24 = vadd.f32 %v3775_v42, %v3773_v44  ;;  %v3763_v47 = vmul.f32 0.5, %v4268_v31 }
 0xbb6   :  { %4269 = vtanh.f32 %v3776_v3  ;;  %v3768_v62 = vadd.f32 0.5, %v3762_v58 }
 0xbb7   :  { %4271 = vtanh.f32 %v3777_v24  ;;  %v3769_v22 = vadd.f32 0.5, %v3763_v47 }
 0xbc0   :  { %v4270_v40 = vpop.eup %4269 }
 0xbc1   :  { %v4272_v37 = vpop.eup %4271  ;;  %v3780_v9 = vmul.f32 %v4270_v40, %v3768_v62 }
 0xbc2   :  { %v3781_v34 = vmul.f32 %v4272_v37, %v3769_v22 }
 0xbc3   :  { %v3782_v45 = vpack.c.bf16 %v3780_v9, %v3780_v9 }
 0xbc4   :  { %v3783_v43 = vpack.c.bf16 %v3781_v34, %v3781_v34 }
 0xbc6   :  { %3951 = vmatprep.mubr.bf16.mxu0 %v3783_v43 }
 0xbc7   :  { %3952 = vmatmul.mubr.bf16.vlgmr.msra.gmra.mrb[96].mxu0 %v3782_v45 }
 0xc9a   :  { %v4086_v26 = vpop.f32.mrb[96].mxu0 }
 0xc9b   :  { %v4087_v61 = vpop.f32.mrb[97].mxu0 }
 0xc9c   :  { %v4088_v28 = vadd.f32 %v4087_v61, %v4086_v26  ;;  %v4089_v13 = vpop.f32.mrb[98].mxu0 }
 0xc9d   :  { %v4090_v32 = vpop.f32.mrb[99].mxu0 }
 0xc9e   :  { %v3954_v14 = vadd.f32 %v4088_v28, %v4052_v17 }
 0xca0   :  { %3959 = vst [vmem:[%s7765_s6] sm:$0xff] %v3954_v14 }
 0xca1   :  { %3964 = vsyncmov [#allocation4] }
 0xca4   :  { %s3965_s15 = vpop.sfrf %3964 }
 0xca5   :  { %p4069_p0 = scmp.ne.s32.totalorder %s3965_s15, 0 }
 0xca7   :  { %3969 = shalt.err (%p4069_p0)  }

</bundles_post_ra>
